<compile_context>
chip_gen: v6e
topology: v6e:2x2x1
jax: 0.10.0
libtpu: 0.0.40
codegen_flags: <defaults>
</compile_context>

<pallas_src>
import functools

import jax
import jax.numpy as jnp
from jax.experimental import pallas as pl
from jax.experimental.pallas import tpu as pltpu


def _round_up(x, m):
    return (x + m - 1) // m * m


def _conv3x3_bn_relu_kernel(x_ref, w_ref, scale_ref, bias_ref, o_ref, xcol_ref):
    # x_ref:     (1, 1, TH+2, W+2, C_in)  one zero-padded row strip (bf16), halo included
    # w_ref:     (9*C_in, TCo)            im2col weights (bf16), tap-major (dy, dx, c)
    # scale_ref: (1, TCo)  f32            folded BN scale
    # bias_ref:  (1, TCo)  f32            folded BN + conv bias
    # o_ref:     (1, TH, W, TCo)          output tile (lane-dense: TCo % 128 == 0)
    # xcol_ref:  (TH*W, 9*C_in) bf16      VMEM scratch for the im2col slab
    _, TH, W, TCo = o_ref.shape
    C_in = x_ref.shape[-1]

    # Build the im2col slab once (9 shifted tap views packed along K), then a single
    # well-shaped MXU matmul instead of 9 K=C_in ones.  Each tap is a static ref slice
    # so only the needed window is loaded (no whole-strip vreg load -> no spills).
    for dy in range(3):
        for dx in range(3):
            t = dy * 3 + dx
            tap = x_ref[0, 0, dy:dy + TH, dx:dx + W, :]        # (TH, W, C_in) bf16
            xcol_ref[:, t * C_in:(t + 1) * C_in] = tap.reshape(TH * W, C_in)

    acc = jnp.dot(xcol_ref[...], w_ref[...],
                  preferred_element_type=jnp.float32)          # (TH*W, TCo) f32

    y = acc * scale_ref[0, :] + bias_ref[0, :]                 # folded BN (+conv bias)
    y = jnp.maximum(y, 0.0)                                    # ReLU
    o_ref[0, :, :, :] = y.reshape(TH, W, TCo).astype(o_ref.dtype)


@functools.partial(jax.jit, static_argnames=("block_h", "block_co"))
def conv3x3_forward(x_nchw, w_oihw, conv_bias, bn_gamma, bn_beta, bn_mean, bn_var,
                    block_h=8, block_co=512):
    """Forward of conv3x3 module. x_nchw: (N, C_in, H, W) -> (N, C_out, H, W).

    block_h:  minimum rows per strip (strip height is raised automatically for narrow
              images so the matmul M dim TH*W >= 256).
    block_co: output-channel tile (multiple of 128).
    """
    eps = 1e-5
    N, C_in, H, W = x_nchw.shape
    C_out = w_oihw.shape[0]

    # ---- fold BN (inference) + conv bias into per-channel scale / bias (kept in f32) ----
    scale = bn_gamma / jnp.sqrt(bn_var + eps)                 # (C_out,)
    bias = (conv_bias - bn_mean) * scale + bn_beta            # (C_out,)

    # ---- tile sizes ----
    # Aim for TH*W >= 256 rows of M (MXU-friendly) without exploding VMEM for wide images.
    th = min(H, max(block_h, -(-256 // W)))
    h_pad = _round_up(H, th)
    n_h = h_pad // th
    cout_pad = _round_up(C_out, 128)                          # lane-dense output stores
    tco = min(block_co, cout_pad)
    if cout_pad % tco != 0:
        tco = 128
    n_co = cout_pad // tco

    mm_dtype = jnp.bfloat16                                   # bf16 MXU operands

    # ---- input: NCHW -> NHWC, zero-pad (conv halo + H rounding), cast to bf16 ----
    x_nhwc = jnp.transpose(x_nchw, (0, 2, 3, 1))
    x_padded = jnp.pad(x_nhwc, ((0, 0), (1, 1 + (h_pad - H)), (1, 1), (0, 0)))
    x_padded = x_padded.astype(mm_dtype)
    # Materialize overlapping row strips (2-row halo) with static slices (no gather) so
    # plain Blocked BlockSpecs stay correct; row duplication is only 2/th of the input.
    x_strips = jnp.stack(
        [x_padded[:, i * th:i * th + th + 2] for i in range(n_h)], axis=1
    )                                                         # (N, n_h, th+2, W+2, C_in)

    # ---- weights: OIHW -> (kh, kw, in, out) -> im2col (9*C_in, C_out) -> pad, bf16 ----
    w_hwio = jnp.transpose(w_oihw, (2, 3, 1, 0))
    w_mat = w_hwio.reshape(9 * C_in, C_out)
    w_mat = jnp.pad(w_mat, ((0, 0), (0, cout_pad - C_out))).astype(mm_dtype)

    scale_p = jnp.pad(scale, (0, cout_pad - C_out)).reshape(1, cout_pad).astype(jnp.float32)
    bias_p = jnp.pad(bias, (0, cout_pad - C_out)).reshape(1, cout_pad).astype(jnp.float32)

    out_nhwc = pl.pallas_call(
        _conv3x3_bn_relu_kernel,
        out_shape=jax.ShapeDtypeStruct((N, h_pad, W, cout_pad), x_nchw.dtype),
        grid_spec=pltpu.PrefetchScalarGridSpec(
            num_scalar_prefetch=0,
            grid=(N, n_h, n_co),
            in_specs=[
                pl.BlockSpec((1, 1, th + 2, W + 2, C_in),
                             lambda b, i, j: (b, i, 0, 0, 0)),
                pl.BlockSpec((9 * C_in, tco), lambda b, i, j: (0, j)),   # resident weights
                pl.BlockSpec((1, tco), lambda b, i, j: (0, j)),
                pl.BlockSpec((1, tco), lambda b, i, j: (0, j)),
            ],
            out_specs=pl.BlockSpec((1, th, W, tco), lambda b, i, j: (b, i, 0, j)),
            scratch_shapes=[pltpu.VMEM((th * W, 9 * C_in), mm_dtype)],
        ),
        compiler_params=pltpu.CompilerParams(
            dimension_semantics=("parallel", "parallel", "arbitrary"),
            vmem_limit_bytes=48 * 1024 * 1024,
        ),
    )(x_strips, w_mat, scale_p, bias_p)

    # Strip H / C_out padding, NHWC -> NCHW to match the PyTorch convention.
    out_nhwc = out_nhwc[:, :H, :, :C_out]
    return jnp.transpose(out_nhwc, (0, 3, 1, 2))


def _reference(x_nchw, w_oihw, conv_bias, bn_gamma, bn_beta, bn_mean, bn_var):
    eps = 1e-5
    # Mimic the kernel's bf16 operand cast so the check isolates implementation error
    # (bf16 x bf16 products are exact in f32; only accumulation order differs).
    x32 = x_nchw.astype(jnp.bfloat16).astype(jnp.float32)
    w32 = w_oihw.astype(jnp.bfloat16).astype(jnp.float32)
    y = jax.lax.conv_general_dilated(
        x32, w32, window_strides=(1, 1), padding=((1, 1), (1, 1)),
        dimension_numbers=("NCHW", "OIHW", "NCHW"),
        precision=jax.lax.Precision.HIGHEST,
    )
    y = y + conv_bias[None, :, None, None]
    y = (y - bn_mean[None, :, None, None]) / jnp.sqrt(bn_var[None, :, None, None] + eps)
    y = y * bn_gamma[None, :, None, None] + bn_beta[None, :, None, None]
    return jnp.maximum(y, 0.0)


if __name__ == "__main__":
    key = jax.random.PRNGKey(0)
    k_x, k_w, k_b, k_g, k_bt, k_m, k_v = jax.random.split(key, 7)

    N, C_in, H, W = 2, 4, 16, 16
    C_out = 8

    x = jax.random.normal(k_x, (N, C_in, H, W), dtype=jnp.float32)
    w = jax.random.normal(k_w, (C_out, C_in, 3, 3), dtype=jnp.float32) * 0.1
    conv_bias = jax.random.normal(k_b, (C_out,), dtype=jnp.float32) * 0.1
    bn_gamma = 1.0 + 0.1 * jax.random.normal(k_g, (C_out,), dtype=jnp.float32)
    bn_beta = 0.1 * jax.random.normal(k_bt, (C_out,), dtype=jnp.float32)
    bn_mean = 0.1 * jax.random.normal(k_m, (C_out,), dtype=jnp.float32)
    bn_var = jnp.abs(jax.random.normal(k_v, (C_out,), dtype=jnp.float32)) + 0.5

    out = conv3x3_forward(x, w, conv_bias, bn_gamma, bn_beta, bn_mean, bn_var)
    out = jax.block_until_ready(out)

    ref = _reference(x, w, conv_bias, bn_gamma, bn_beta, bn_mean, bn_var)
    assert out.shape == (N, C_out, H, W)
    assert jnp.allclose(out, ref, atol=2e-3, rtol=2e-3)

    print("KERNEL_OK")
</pallas_src>

<mosaic_0001>
module attributes {stable_mosaic.version = 11 : i64} {
  func.func @_conv3x3_bn_relu_kernel(%arg0: i32, %arg1: i32, %arg2: i32, %arg3: memref<1x1x18x18x4xbf16, #tpu.memory_space<vmem>>, %arg4: memref<36x128xbf16, #tpu.memory_space<vmem>>, %arg5: memref<1x128xf32, #tpu.memory_space<vmem>>, %arg6: memref<1x128xf32, #tpu.memory_space<vmem>>, %arg7: memref<1x16x16x128xf32, #tpu.memory_space<vmem>>, %arg8: memref<256x36xbf16, #tpu.memory_space<vmem>>) attributes {dimension_semantics = [#tpu.dimension_semantics<parallel>, #tpu.dimension_semantics<parallel>, #tpu.dimension_semantics<arbitrary>], iteration_bounds = array<i64: 2, 1, 1>, scalar_prefetch = 0 : i64, scratch_operands = 1 : i64, tpu.core_type = #tpu.core_type<tc>, window_params = [{transform_indices = @transform_0, window_bounds = array<i64: 1, 1, 18, 18, 4>}, {transform_indices = @transform_1, window_bounds = array<i64: 36, 128>}, {transform_indices = @transform_2, window_bounds = array<i64: 1, 128>}, {transform_indices = @transform_3, window_bounds = array<i64: 1, 128>}, {transform_indices = @transform_4, window_bounds = array<i64: 1, 16, 16, 128>}]} {
    %c0 = arith.constant 0 : index
    %c0_0 = arith.constant 0 : index
    %c0_1 = arith.constant 0 : index
    %c0_2 = arith.constant 0 : index
    %c0_3 = arith.constant 0 : index
    %0 = vector.load %arg3[%c0, %c0_0, %c0_1, %c0_2, %c0_3] : memref<1x1x18x18x4xbf16, #tpu.memory_space<vmem>>, vector<1x1x16x16x4xbf16>
    %1 = vector.shape_cast %0 : vector<1x1x16x16x4xbf16> to vector<16x16x4xbf16>
    %2 = vector.shape_cast %1 : vector<16x16x4xbf16> to vector<256x4xbf16>
    %c0_4 = arith.constant 0 : index
    %c0_5 = arith.constant 0 : index
    %3 = vector.load %arg8[%c0_4, %c0_5] : memref<256x36xbf16, #tpu.memory_space<vmem>>, vector<256x4xbf16>
    tpu.vector_store %arg8[%c0_4, %c0_5], %2 {strides = array<i32>} : memref<256x36xbf16, #tpu.memory_space<vmem>>, vector<256x4xbf16>,
    %c0_6 = arith.constant 0 : index
    %c0_7 = arith.constant 0 : index
    %c0_8 = arith.constant 0 : index
    %c1 = arith.constant 1 : index
    %c0_9 = arith.constant 0 : index
    %4 = vector.load %arg3[%c0_6, %c0_7, %c0_8, %c1, %c0_9] : memref<1x1x18x18x4xbf16, #tpu.memory_space<vmem>>, vector<1x1x16x16x4xbf16>
    %5 = vector.shape_cast %4 : vector<1x1x16x16x4xbf16> to vector<16x16x4xbf16>
    %6 = vector.shape_cast %5 : vector<16x16x4xbf16> to vector<256x4xbf16>
    %c0_10 = arith.constant 0 : index
    %c4 = arith.constant 4 : index
    %7 = vector.load %arg8[%c0_10, %c4] : memref<256x36xbf16, #tpu.memory_space<vmem>>, vector<256x4xbf16>
    tpu.vector_store %arg8[%c0_10, %c4], %6 {strides = array<i32>} : memref<256x36xbf16, #tpu.memory_space<vmem>>, vector<256x4xbf16>,
    %c0_11 = arith.constant 0 : index
    %c0_12 = arith.constant 0 : index
    %c0_13 = arith.constant 0 : index
    %c2 = arith.constant 2 : index
    %c0_14 = arith.constant 0 : index
    %8 = vector.load %arg3[%c0_11, %c0_12, %c0_13, %c2, %c0_14] : memref<1x1x18x18x4xbf16, #tpu.memory_space<vmem>>, vector<1x1x16x16x4xbf16>
    %9 = vector.shape_cast %8 : vector<1x1x16x16x4xbf16> to vector<16x16x4xbf16>
    %10 = vector.shape_cast %9 : vector<16x16x4xbf16> to vector<256x4xbf16>
    %c0_15 = arith.constant 0 : index
    %c8 = arith.constant 8 : index
    %11 = vector.load %arg8[%c0_15, %c8] : memref<256x36xbf16, #tpu.memory_space<vmem>>, vector<256x4xbf16>
    tpu.vector_store %arg8[%c0_15, %c8], %10 {strides = array<i32>} : memref<256x36xbf16, #tpu.memory_space<vmem>>, vector<256x4xbf16>,
    %c0_16 = arith.constant 0 : index
    %c0_17 = arith.constant 0 : index
    %c1_18 = arith.constant 1 : index
    %c0_19 = arith.constant 0 : index
    %c0_20 = arith.constant 0 : index
    %12 = vector.load %arg3[%c0_16, %c0_17, %c1_18, %c0_19, %c0_20] : memref<1x1x18x18x4xbf16, #tpu.memory_space<vmem>>, vector<1x1x16x16x4xbf16>
    %13 = vector.shape_cast %12 : vector<1x1x16x16x4xbf16> to vector<16x16x4xbf16>
    %14 = vector.shape_cast %13 : vector<16x16x4xbf16> to vector<256x4xbf16>
    %c0_21 = arith.constant 0 : index
    %c12 = arith.constant 12 : index
    %15 = vector.load %arg8[%c0_21, %c12] : memref<256x36xbf16, #tpu.memory_space<vmem>>, vector<256x4xbf16>
    tpu.vector_store %arg8[%c0_21, %c12], %14 {strides = array<i32>} : memref<256x36xbf16, #tpu.memory_space<vmem>>, vector<256x4xbf16>,
    %c0_22 = arith.constant 0 : index
    %c0_23 = arith.constant 0 : index
    %c1_24 = arith.constant 1 : index
    %c1_25 = arith.constant 1 : index
    %c0_26 = arith.constant 0 : index
    %16 = vector.load %arg3[%c0_22, %c0_23, %c1_24, %c1_25, %c0_26] : memref<1x1x18x18x4xbf16, #tpu.memory_space<vmem>>, vector<1x1x16x16x4xbf16>
    %17 = vector.shape_cast %16 : vector<1x1x16x16x4xbf16> to vector<16x16x4xbf16>
    %18 = vector.shape_cast %17 : vector<16x16x4xbf16> to vector<256x4xbf16>
    %c0_27 = arith.constant 0 : index
    %c16 = arith.constant 16 : index
    %19 = vector.load %arg8[%c0_27, %c16] : memref<256x36xbf16, #tpu.memory_space<vmem>>, vector<256x4xbf16>
    tpu.vector_store %arg8[%c0_27, %c16], %18 {strides = array<i32>} : memref<256x36xbf16, #tpu.memory_space<vmem>>, vector<256x4xbf16>,
    %c0_28 = arith.constant 0 : index
    %c0_29 = arith.constant 0 : index
    %c1_30 = arith.constant 1 : index
    %c2_31 = arith.constant 2 : index
    %c0_32 = arith.constant 0 : index
    %20 = vector.load %arg3[%c0_28, %c0_29, %c1_30, %c2_31, %c0_32] : memref<1x1x18x18x4xbf16, #tpu.memory_space<vmem>>, vector<1x1x16x16x4xbf16>
    %21 = vector.shape_cast %20 : vector<1x1x16x16x4xbf16> to vector<16x16x4xbf16>
    %22 = vector.shape_cast %21 : vector<16x16x4xbf16> to vector<256x4xbf16>
    %c0_33 = arith.constant 0 : index
    %c20 = arith.constant 20 : index
    %23 = vector.load %arg8[%c0_33, %c20] : memref<256x36xbf16, #tpu.memory_space<vmem>>, vector<256x4xbf16>
    tpu.vector_store %arg8[%c0_33, %c20], %22 {strides = array<i32>} : memref<256x36xbf16, #tpu.memory_space<vmem>>, vector<256x4xbf16>,
    %c0_34 = arith.constant 0 : index
    %c0_35 = arith.constant 0 : index
    %c2_36 = arith.constant 2 : index
    %c0_37 = arith.constant 0 : index
    %c0_38 = arith.constant 0 : index
    %24 = vector.load %arg3[%c0_34, %c0_35, %c2_36, %c0_37, %c0_38] : memref<1x1x18x18x4xbf16, #tpu.memory_space<vmem>>, vector<1x1x16x16x4xbf16>
    %25 = vector.shape_cast %24 : vector<1x1x16x16x4xbf16> to vector<16x16x4xbf16>
    %26 = vector.shape_cast %25 : vector<16x16x4xbf16> to vector<256x4xbf16>
    %c0_39 = arith.constant 0 : index
    %c24 = arith.constant 24 : index
    %27 = vector.load %arg8[%c0_39, %c24] : memref<256x36xbf16, #tpu.memory_space<vmem>>, vector<256x4xbf16>
    tpu.vector_store %arg8[%c0_39, %c24], %26 {strides = array<i32>} : memref<256x36xbf16, #tpu.memory_space<vmem>>, vector<256x4xbf16>,
    %c0_40 = arith.constant 0 : index
    %c0_41 = arith.constant 0 : index
    %c2_42 = arith.constant 2 : index
    %c1_43 = arith.constant 1 : index
    %c0_44 = arith.constant 0 : index
    %28 = vector.load %arg3[%c0_40, %c0_41, %c2_42, %c1_43, %c0_44] : memref<1x1x18x18x4xbf16, #tpu.memory_space<vmem>>, vector<1x1x16x16x4xbf16>
    %29 = vector.shape_cast %28 : vector<1x1x16x16x4xbf16> to vector<16x16x4xbf16>
    %30 = vector.shape_cast %29 : vector<16x16x4xbf16> to vector<256x4xbf16>
    %c0_45 = arith.constant 0 : index
    %c28 = arith.constant 28 : index
    %31 = vector.load %arg8[%c0_45, %c28] : memref<256x36xbf16, #tpu.memory_space<vmem>>, vector<256x4xbf16>
    tpu.vector_store %arg8[%c0_45, %c28], %30 {strides = array<i32>} : memref<256x36xbf16, #tpu.memory_space<vmem>>, vector<256x4xbf16>,
    %c0_46 = arith.constant 0 : index
    %c0_47 = arith.constant 0 : index
    %c2_48 = arith.constant 2 : index
    %c2_49 = arith.constant 2 : index
    %c0_50 = arith.constant 0 : index
    %32 = vector.load %arg3[%c0_46, %c0_47, %c2_48, %c2_49, %c0_50] : memref<1x1x18x18x4xbf16, #tpu.memory_space<vmem>>, vector<1x1x16x16x4xbf16>
    %33 = vector.shape_cast %32 : vector<1x1x16x16x4xbf16> to vector<16x16x4xbf16>
    %34 = vector.shape_cast %33 : vector<16x16x4xbf16> to vector<256x4xbf16>
    %c0_51 = arith.constant 0 : index
    %c32 = arith.constant 32 : index
    %35 = vector.load %arg8[%c0_51, %c32] : memref<256x36xbf16, #tpu.memory_space<vmem>>, vector<256x4xbf16>
    tpu.vector_store %arg8[%c0_51, %c32], %34 {strides = array<i32>} : memref<256x36xbf16, #tpu.memory_space<vmem>>, vector<256x4xbf16>,
    %c0_52 = arith.constant 0 : index
    %c0_53 = arith.constant 0 : index
    %36 = vector.load %arg8[%c0_52, %c0_53] : memref<256x36xbf16, #tpu.memory_space<vmem>>, vector<256x36xbf16>
    %c0_54 = arith.constant 0 : index
    %c0_55 = arith.constant 0 : index
    %37 = vector.load %arg4[%c0_54, %c0_55] : memref<36x128xbf16, #tpu.memory_space<vmem>>, vector<36x128xbf16>
    %cst = arith.constant dense<0.000000e+00> : vector<256x128xf32>
    %38 = tpu.matmul %36, %37, %cst {dimension_numbers = #tpu.dot_dimension_numbers<[1], [0], [0], [1], [0, 0, 1, 1], [], []>} : vector<256x36xbf16>, vector<36x128xbf16>, vector<256x128xf32> -> vector<256x128xf32>
    %c0_56 = arith.constant 0 : index
    %c0_57 = arith.constant 0 : index
    %39 = vector.load %arg5[%c0_56, %c0_57] : memref<1x128xf32, #tpu.memory_space<vmem>>, vector<1x128xf32>
    %40 = vector.shape_cast %39 : vector<1x128xf32> to vector<128xf32>
    %41 = vector.shape_cast %40 : vector<128xf32> to vector<1x128xf32>
    %42 = vector.broadcast %41 : vector<1x128xf32> to vector<256x128xf32>
    %43 = arith.mulf %38, %42 : vector<256x128xf32>
    %c0_58 = arith.constant 0 : index
    %c0_59 = arith.constant 0 : index
    %44 = vector.load %arg6[%c0_58, %c0_59] : memref<1x128xf32, #tpu.memory_space<vmem>>, vector<1x128xf32>
    %45 = vector.shape_cast %44 : vector<1x128xf32> to vector<128xf32>
    %46 = vector.shape_cast %45 : vector<128xf32> to vector<1x128xf32>
    %47 = vector.broadcast %46 : vector<1x128xf32> to vector<256x128xf32>
    %48 = arith.addf %43, %47 : vector<256x128xf32>
    %cst_60 = arith.constant 0.000000e+00 : f32
    %49 = vector.broadcast %cst_60 : f32 to vector<256x128xf32>
    %50 = arith.maximumf %48, %49 : vector<256x128xf32>
    %51 = vector.shape_cast %50 : vector<256x128xf32> to vector<16x16x128xf32>
    %c0_61 = arith.constant 0 : index
    %c0_62 = arith.constant 0 : index
    %c0_63 = arith.constant 0 : index
    %c0_64 = arith.constant 0 : index
    %52 = vector.load %arg7[%c0_61, %c0_62, %c0_63, %c0_64] : memref<1x16x16x128xf32, #tpu.memory_space<vmem>>, vector<1x16x16x128xf32>
    %53 = vector.shape_cast %52 : vector<1x16x16x128xf32> to vector<16x16x128xf32>
    %54 = vector.shape_cast %51 : vector<16x16x128xf32> to vector<1x16x16x128xf32>
    tpu.vector_store %arg7[%c0_61, %c0_62, %c0_63, %c0_64], %54 {strides = array<i32>} : memref<1x16x16x128xf32, #tpu.memory_space<vmem>>, vector<1x16x16x128xf32>,
    return
  }
  func.func @transform_0(%arg0: i32, %arg1: i32, %arg2: i32) -> (i32, i32, i32, i32, i32) {
    %c0_i32 = arith.constant 0 : i32
    %c0_i32_0 = arith.constant 0 : i32
    %c0_i32_1 = arith.constant 0 : i32
    %c0_i32_2 = arith.constant 0 : i32
    return %arg0, %arg1, %c0_i32, %c0_i32_0, %c0_i32_1 : i32, i32, i32, i32, i32
  }
  func.func @transform_1(%arg0: i32, %arg1: i32, %arg2: i32) -> (i32, i32) {
    %c0_i32 = arith.constant 0 : i32
    %c0_i32_0 = arith.constant 0 : i32
    return %c0_i32, %arg2 : i32, i32
  }
  func.func @transform_2(%arg0: i32, %arg1: i32, %arg2: i32) -> (i32, i32) {
    %c0_i32 = arith.constant 0 : i32
    %c0_i32_0 = arith.constant 0 : i32
    return %c0_i32, %arg2 : i32, i32
  }
  func.func @transform_3(%arg0: i32, %arg1: i32, %arg2: i32) -> (i32, i32) {
    %c0_i32 = arith.constant 0 : i32
    %c0_i32_0 = arith.constant 0 : i32
    return %c0_i32, %arg2 : i32, i32
  }
  func.func @transform_4(%arg0: i32, %arg1: i32, %arg2: i32) -> (i32, i32, i32, i32) {
    %c0_i32 = arith.constant 0 : i32
    %c0_i32_0 = arith.constant 0 : i32
    return %arg0, %arg1, %c0_i32, %arg2 : i32, i32, i32, i32
  }
}

</mosaic_0001>

<bundles_post_ra>
// kernel: conv3x3_forward.1
= control target key start
LH: loop header
LB: loop body
LE: loop exit
PB: predicated region body
PF: predicated region fallthrough
CT: control target
= control target key end

     0   :  { %s4617_s15 = smov 0   ;;  %s4619_s16 = smov 0   ;;  %s6204_s0 = inlined_call_operand.vmem [shape: bf16[2,1,18,18,4], index: 0, kind: input, shape index: {}]   ;;  %s6205_s1 = inlined_call_operand.vmem [shape: bf16[36,128], index: 1, kind: input, shape index: {}]   ;;  %s6206_s2 = inlined_call_operand.vmem [shape: f32[1,128], index: 2, kind: input, shape index: {}]   ;;  %s6207_s3 = inlined_call_operand.vmem [shape: f32[1,128], index: 3, kind: input, shape index: {}]   ;;  %s6208_s4 = inlined_call_operand.vmem [shape: f32[2,16,16,128], index: 4, kind: output, shape index: {}]  }
   0x1   :  { %s4621_s17 = smov 0  }
   0x2 LB: > { %s33_s18 = sadd.s32 1, %s4578_s16  ;;  %p4094_p0 = scmp.ge.s32.totalorder %s4582_s17, 1  ;;  %s4582_s17 = sphi %s4621_s17, %s14_s17   ;;  %s4578_s16 = sphi %s4619_s16, %s6214_s16   ;;  %s4574_s15 = sphi %s4617_s15, %s6213_s15  }
   0x3   : > { %p35_p1 = scmp.ge.s32.totalorder %s33_s18, 2  ;;  %p216_p2 = scmp.lt.s32.totalorder %s4582_s17, 3 }
   0x5   : > { %s6216_s18 = smov (%p35_p1, %s33_s18), 0  ;;  %p217_p3 = pnand %p4094_p0, %p216_p2 }
   0x6   : > { %p264_p4 = scmp.lt.s32.totalorder (!%p217_p3), %s4574_s15, 1  ;;  %s4584_s23 = smov (!%p217_p3), 4  }
   0x7   : > { %220 = sbr.rel (%p217_p3) target bundleno = 864 (0x360), region = 36  ;;  %s4585_s24 = smov (!%p217_p3), 8  }
   0x8   : > { %s4586_s25 = smov (!%p217_p3), 12   ;;  %s4587_s26 = smov (!%p217_p3), 16  }
   0x9   : > { %s4588_s27 = smov (!%p217_p3), 20   ;;  %s4589_s28 = smov (!%p217_p3), 24  }
   0xa   : > { %s4590_s29 = smov (!%p217_p3), 28   ;;  %s4591_s8 = smov (!%p217_p3), 32  }
   0xc   : > { %s6218_s15 = smov (!%p264_p4, %s4574_s15), 1  ;;  %vm411_vm0 = vsmask.f32 3328  ;;  %vm412_vm1 = vsmask.f32 7440  ;;  %vm330_vm3 = vcmask 27648  }
   0xd   : > { %s4507_s19 = smul.u32 216, %s6218_s15  ;;  %vm4652_vm2 = vmor %vm411_vm0, %vm412_vm1  ;;  %vm1023_vm4 = vcmask 1042432   ;;  %vm1024_vm5 = vcmask 1046532   ;;  %vm894_vm7 = vcmask 60448   ;;  %vm1234_vm8 = vcmask 93248  }
   0xe   : > { %vm4796_vm6 = vmor %vm1023_vm4, %vm1024_vm5  ;;  %vm1428_vm9 = vcmask 126048   ;;  %vm3632_vm10 = vcmask 1041408   ;;  %vm1989_vm11 = vcmask 158848   ;;  %vm2326_vm12 = vcmask 191648  }
   0xf   : > { %s4641_s22 = scalar_lea.vmem %s6204_s0, %s4507_s19  ;;  %vm2520_vm13 = vcmask 224448   ;;  %vm3081_vm14 = vcmask 257248   ;;  %vm3418_vm15 = vcmask 290048   ;;  %vm3583_vm0 = vcmask 293888   ;;  %s4441_s19 = sshll.u32 %s6218_s15, 8 }
  0x10   : > { %v366_v0 = vld [vmem:[%s4641_s22 + $0xc] sm:$0xf]  ;;  %v367_v1 = vld [vmem:[%s4641_s22 + $0x10] sm:$0xf]  ;;  %v363_v2 = vld [vmem:[%s4641_s22] sm:$0xf] }
  0x11   : > { %v439_v3 = vshrl.u32 %v366_v0, 16  ;;  %v442_v4 = vshll.u32 %v366_v0, 16  ;;  %v448_v5 = vshll.u32 %v367_v1, 16  ;;  %v452_v6 = vshrl.u32 %v367_v1, 16  ;;  %v364_v7 = vld [vmem:[%s4641_s22 + $0x4] sm:$0xf] }
  0x12   : > { %v415_v8 = vshrl.u32 %v363_v2, 16  ;;  %v418_v9 = vshll.u32 %v363_v2, 16  ;;  %v424_v10 = vshll.u32 %v364_v7, 16  ;;  %v428_v11 = vshrl.u32 %v364_v7, 16  ;;  %v368_v12 = vld [vmem:[%s4641_s22 + $0x14] sm:$0x1] }
  0x13   : > { %v441_v13 = vrot.slane %v439_v3, 4  ;;  %v444_v14 = vrot.slane %v442_v4, 5  ;;  %v450_v15 = vrot.slane %v448_v5, 5  ;;  %v454_v16 = vrot.slane %v452_v6, 4  ;;  %v365_v17 = vld [vmem:[%s4641_s22 + $0x8] sm:$0x1] }
  0x14   : > { %v417_v18 = vrot.slane %v415_v8, 4  ;;  %v420_v19 = vrot.slane %v418_v9, 5  ;;  %v426_v20 = vrot.slane %v424_v10, 5  ;;  %v430_v21 = vrot.slane %v428_v11, 4  ;;  %v370_v22 = vld [vmem:[%s4641_s22 + $0x1c] sm:$0xf] }
  0x15   : > { %v445_v23 = vor.u32 %v444_v14, %v441_v13  ;;  %v455_v24 = vor.u32 %v454_v16, %v450_v15  ;;  %v458_v25 = vshll.u32 %v368_v12, 16  ;;  %v434_v26 = vshll.u32 %v365_v17, 16  ;;  %v371_v30 = vld [vmem:[%s4641_s22 + $0x20] sm:$0x1]  ;;  %v369_v33 = vld [vmem:[%s4641_s22 + $0x18] sm:$0xf] }
  0x16   : > { %v421_v28 = vor.u32 %v420_v19, %v417_v18  ;;  %v431_v29 = vor.u32 %v430_v21, %v426_v20  ;;  %v472_v31 = vshll.u32 %v370_v22, 16  ;;  %v476_v32 = vshrl.u32 %v370_v22, 16  ;;  %v373_v42 = vld [vmem:[%s4641_s22 + $0x28] sm:$0xf]  ;;  %v374_v47 = vld [vmem:[%s4641_s22 + $0x2c] sm:$0x1] }
  0x17   : > { %v446_v34 = vrot.slane %v445_v23, 4  ;;  %v456_v35 = vrot.slane %v455_v24, 4  ;;  %v460_v36 = vrot.slane %v458_v25, 5  ;;  %v436_v37 = vrot.slane %v434_v26, 5  ;;  %v372_v48 = vld [vmem:[%s4641_s22 + $0x24] sm:$0xf] }
  0x18   : > { %v422_v38 = vrot.slane %v421_v28, 4  ;;  %v432_v39 = vrot.slane %v431_v29, 4  ;;  %v474_v40 = vrot.slane %v472_v31, 5  ;;  %v478_v41 = vrot.slane %v476_v32, 4  ;;  %v376_v53 = vld [vmem:[%s4641_s22 + $0x34] sm:$0xf] }
  0x19   : > { %v451_v43 = vsel %vm4652_vm2, %v446_v34, %v450_v15  ;;  %v461_v44 = vsel %vm4652_vm2, %v456_v35, %v460_v36  ;;  %v482_v45 = vshll.u32 %v371_v30, 16  ;;  %v463_v46 = vshrl.u32 %v369_v33, 16  ;;  %v377_v62 = vld [vmem:[%s4641_s22 + $0x38] sm:$0x1]  ;;  %v375_v3 = vld [vmem:[%s4641_s22 + $0x30] sm:$0xf] }
  0x1a   : > { %802 = vrot.lane.b32.xlu1 %v451_v43, %s4584_s23  ;;  %v427_v49 = vsel %vm4652_vm2, %v422_v38, %v426_v20  ;;  %v437_v50 = vsel %vm4652_vm2, %v432_v39, %v436_v37  ;;  %v479_v51 = vor.u32 %v478_v41, %v474_v40  ;;  %v466_v52 = vshll.u32 %v369_v33, 16  ;;  %v379_v8 = vld [vmem:[%s4641_s22 + $0x40] sm:$0xf]  ;;  %v380_v17 = vld [vmem:[%s4641_s22 + $0x44] sm:$0x1] }
  0x1b   : > { %798 = vrot.lane.b32.xlu0 %v427_v49, %s4584_s23  ;;  %v484_v54 = vrot.slane %v482_v45, 5  ;;  %v465_v55 = vrot.slane %v463_v46, 4  ;;  %v496_v56 = vshll.u32 %v373_v42, 16  ;;  %v500_v57 = vshrl.u32 %v373_v42, 16  ;;  %v378_v22 = vld [vmem:[%s4641_s22 + $0x3c] sm:$0xf] }
  0x1c   : > { %v480_v58 = vrot.slane %v479_v51, 4  ;;  %v468_v59 = vrot.slane %v466_v52, 5  ;;  %v506_v60 = vshll.u32 %v374_v47, 16  ;;  %v487_v61 = vshrl.u32 %v372_v48, 16  ;;  %v382_v28 = vld [vmem:[%s4641_s22 + $0x4c] sm:$0xf] }
  0x1d   : > { %v498_v63 = vrot.slane %v496_v56, 5  ;;  %v502_v0 = vrot.slane %v500_v57, 4  ;;  %v490_v1 = vshll.u32 %v372_v48, 16  ;;  %v520_v2 = vshll.u32 %v376_v53, 16  ;;  %v383_v37 = vld [vmem:[%s4641_s22 + $0x50] sm:$0x1] }
  0x1e   : > { %804 = vrot.lane.b32.xlu1 %v461_v44, %s4584_s23  ;;  %v485_v4 = vsel %vm4652_vm2, %v480_v58, %v484_v54  ;;  %v469_v5 = vor.u32 %v468_v59, %v465_v55  ;;  %v508_v6 = vrot.slane %v506_v60, 5  ;;  %v489_v7 = vrot.slane %v487_v61, 4  ;;  %v381_v42 = vld [vmem:[%s4641_s22 + $0x48] sm:$0xf]  ;;  %v385_v47 = vld [vmem:[%s4641_s22 + $0x58] sm:$0xf] }
  0x1f   : > { %800 = vrot.lane.b32.xlu0 %v437_v50, %s4584_s23  ;;  %v503_v9 = vor.u32 %v502_v0, %v498_v63  ;;  %v492_v10 = vrot.slane %v490_v1, 5  ;;  %v522_v11 = vrot.slane %v520_v2, 5  ;;  %v524_v12 = vshrl.u32 %v376_v53, 16  ;;  %v386_v56 = vld [vmem:[%s4641_s22 + $0x5c] sm:$0x1] }
  0x20   : > { %v470_v13 = vrot.slane %v469_v5, 4  ;;  %v530_v14 = vshll.u32 %v377_v62, 16  ;;  %v511_v15 = vshrl.u32 %v375_v3, 16  ;;  %v514_v16 = vshll.u32 %v375_v3, 16  ;;  %v384_v61 = vld [vmem:[%s4641_s22 + $0x54] sm:$0xf] }
  0x21   : > { %v504_v18 = vrot.slane %v503_v9, 4  ;;  %v493_v19 = vor.u32 %v492_v10, %v489_v7  ;;  %v526_v20 = vrot.slane %v524_v12, 4  ;;  %v544_v21 = vshll.u32 %v379_v8, 16 }
  0x22   : > { %808 = vrot.lane.b32.xlu1 %v485_v4, %s4584_s23  ;;  %v475_v23 = vsel %vm4652_vm2, %v470_v13, %v474_v40  ;;  %v532_v24 = vrot.slane %v530_v14, 5  ;;  %v513_v25 = vrot.slane %v511_v15, 4  ;;  %v516_v26 = vrot.slane %v514_v16, 5  ;;  %v389_v15 = vld [vmem:[%s4641_s22 + $0x68] sm:$0x1] }
  0x23   : > { %806 = vrot.lane.b32.xlu0 %v475_v23, %s4584_s23  ;;  %v509_v29 = vsel %vm4652_vm2, %v504_v18, %v508_v6  ;;  %v494_v30 = vrot.slane %v493_v19, 4  ;;  %v527_v31 = vor.u32 %v526_v20, %v522_v11  ;;  %v546_v32 = vrot.slane %v544_v21, 5  ;;  %v388_v6 = vld [vmem:[%s4641_s22 + $0x64] sm:$0xf]  ;;  %v387_v16 = vld [vmem:[%s4641_s22 + $0x60] sm:$0xf] }
  0x24   : > { %v517_v33 = vor.u32 %v516_v26, %v513_v25  ;;  %v548_v34 = vshrl.u32 %v379_v8, 16  ;;  %v554_v35 = vshll.u32 %v380_v17, 16  ;;  %v535_v36 = vshrl.u32 %v378_v22, 16  ;;  %v391_v25 = vld [vmem:[%s4641_s22 + $0x70] sm:$0xf] }
  0x25   : > { %v499_v38 = vsel %vm4652_vm2, %v494_v30, %v498_v63  ;;  %v528_v39 = vrot.slane %v527_v31, 4  ;;  %v538_v40 = vshll.u32 %v378_v22, 16  ;;  %v568_v41 = vshll.u32 %v382_v28, 16 }
  0x26   : > { %812 = vrot.lane.b32.xlu1 %v509_v29, %s4584_s23  ;;  %v518_v43 = vrot.slane %v517_v33, 4  ;;  %v550_v44 = vrot.slane %v548_v34, 4  ;;  %v556_v45 = vrot.slane %v554_v35, 5  ;;  %v537_v46 = vrot.slane %v535_v36, 4  ;;  %v392_v35 = vld [vmem:[%s4641_s22 + $0x74] sm:$0x1] }
  0x27   : > { %810 = vrot.lane.b32.xlu0 %v499_v38, %s4584_s23  ;;  %v533_v48 = vsel %vm4652_vm2, %v528_v39, %v532_v24  ;;  %v540_v49 = vrot.slane %v538_v40, 5  ;;  %v570_v50 = vrot.slane %v568_v41, 5  ;;  %v572_v51 = vshrl.u32 %v382_v28, 16  ;;  %v390_v36 = vld [vmem:[%s4641_s22 + $0x6c] sm:$0xf] }
  0x28   : > { %v523_v52 = vsel %vm4652_vm2, %v518_v43, %v522_v11  ;;  %v551_v53 = vor.u32 %v550_v44, %v546_v32  ;;  %v578_v54 = vshll.u32 %v383_v37, 16  ;;  %v559_v55 = vshrl.u32 %v381_v42, 16 }
  0x29   : > { %v541_v57 = vor.u32 %v540_v49, %v537_v46  ;;  %v574_v58 = vrot.slane %v572_v51, 4  ;;  %v562_v59 = vshll.u32 %v381_v42, 16  ;;  %v592_v60 = vshll.u32 %v385_v47, 16 }
  0x2a   : > { %816 = vrot.lane.b32.xlu1 %v533_v48, %s4584_s23  ;;  %v552_v62 = vrot.slane %v551_v53, 4  ;;  %v580_v63 = vrot.slane %v578_v54, 5  ;;  %v561_v0 = vrot.slane %v559_v55, 4  ;;  %v596_v1 = vshrl.u32 %v385_v47, 16  ;;  %v395_v54 = vld [vmem:[%s4641_s22 + $0x80] sm:$0x1] }
  0x2b   : > { %814 = vrot.lane.b32.xlu0 %v523_v52, %s4584_s23  ;;  %v542_v2 = vrot.slane %v541_v57, 4  ;;  %v575_v3 = vor.u32 %v574_v58, %v570_v50  ;;  %v564_v4 = vrot.slane %v562_v59, 5  ;;  %v594_v5 = vrot.slane %v592_v60, 5  ;;  %v393_v55 = vld [vmem:[%s4641_s22 + $0x78] sm:$0xf] }
  0x2c   : > { %v557_v7 = vsel %vm4652_vm2, %v552_v62, %v556_v45  ;;  %v598_v8 = vrot.slane %v596_v1, 4  ;;  %v602_v9 = vshll.u32 %v386_v56, 16  ;;  %v583_v10 = vshrl.u32 %v384_v61, 16  ;;  %v394_v45 = vld [vmem:[%s4641_s22 + $0x7c] sm:$0xf] }
  0x2d   : > { %v547_v11 = vsel %vm4652_vm2, %v542_v2, %v546_v32  ;;  %v576_v12 = vrot.slane %v575_v3, 4  ;;  %v565_v13 = vor.u32 %v564_v4, %v561_v0  ;;  %v586_v14 = vshll.u32 %v384_v61, 16  ;;  %v397_v0 = vld [vmem:[%s4641_s22 + $0x88] sm:$0xf] }
  0x2e   : > { %820 = vrot.lane.b32.xlu1 %v557_v7, %s4584_s23  ;;  %v599_v17 = vor.u32 %v598_v8, %v594_v5  ;;  %v604_v18 = vrot.slane %v602_v9, 5  ;;  %v585_v19 = vrot.slane %v583_v10, 4  ;;  %v616_v20 = vshll.u32 %v388_v6, 16  ;;  %v396_v10 = vld [vmem:[%s4641_s22 + $0x84] sm:$0xf] }
  0x2f   : > { %818 = vrot.lane.b32.xlu0 %v547_v11, %s4584_s23  ;;  %v581_v21 = vsel %vm4652_vm2, %v576_v12, %v580_v63  ;;  %v566_v22 = vrot.slane %v565_v13, 4  ;;  %v588_v23 = vrot.slane %v586_v14, 5  ;;  %v620_v24 = vshrl.u32 %v388_v6, 16 }
  0x30   : > { %v600_v26 = vrot.slane %v599_v17, 4  ;;  %v618_v28 = vrot.slane %v616_v20, 5  ;;  %v626_v29 = vshll.u32 %v389_v15, 16  ;;  %v607_v30 = vshrl.u32 %v387_v16, 16 }
  0x31   : > { %v571_v31 = vsel %vm4652_vm2, %v566_v22, %v570_v50  ;;  %v589_v32 = vor.u32 %v588_v23, %v585_v19  ;;  %v622_v33 = vrot.slane %v620_v24, 4  ;;  %v610_v34 = vshll.u32 %v387_v16, 16  ;;  %v400_v19 = vld [vmem:[%s4641_s22 + $0x94] sm:$0xf]  ;;  %v401_v24 = vld [vmem:[%s4641_s22 + $0x98] sm:$0x1] }
  0x32   : > { %824 = vrot.lane.b32.xlu1 %v581_v21, %s4584_s23  ;;  %v605_v37 = vsel %vm4652_vm2, %v600_v26, %v604_v18  ;;  %v628_v38 = vrot.slane %v626_v29, 5  ;;  %v609_v39 = vrot.slane %v607_v30, 4  ;;  %v640_v40 = vshll.u32 %v391_v25, 16  ;;  %v399_v30 = vld [vmem:[%s4641_s22 + $0x90] sm:$0xf] }
  0x33   : > { %822 = vrot.lane.b32.xlu0 %v571_v31, %s4584_s23  ;;  %v590_v41 = vrot.slane %v589_v32, 4  ;;  %v623_v42 = vor.u32 %v622_v33, %v618_v28  ;;  %v612_v43 = vrot.slane %v610_v34, 5  ;;  %v644_v44 = vshrl.u32 %v391_v25, 16 }
  0x34   : > { %v642_v46 = vrot.slane %v640_v40, 5  ;;  %v650_v47 = vshll.u32 %v392_v35, 16  ;;  %v631_v48 = vshrl.u32 %v390_v36, 16  ;;  %v634_v49 = vshll.u32 %v390_v36, 16 }
  0x35   : > { %v595_v50 = vsel %vm4652_vm2, %v590_v41, %v594_v5  ;;  %v624_v51 = vrot.slane %v623_v42, 4  ;;  %v613_v52 = vor.u32 %v612_v43, %v609_v39  ;;  %v646_v53 = vrot.slane %v644_v44, 4  ;;  %v398_v5 = vld [vmem:[%s4641_s22 + $0x8c] sm:$0x1]  ;;  %v403_v39 = vld [vmem:[%s4641_s22 + $0xa0] sm:$0xf] }
  0x36   : > { %828 = vrot.lane.b32.xlu1 %v605_v37, %s4584_s23  ;;  %v652_v56 = vrot.slane %v650_v47, 5  ;;  %v633_v57 = vrot.slane %v631_v48, 4  ;;  %v636_v58 = vrot.slane %v634_v49, 5  ;;  %v664_v59 = vshll.u32 %v394_v45, 16  ;;  %v404_v48 = vld [vmem:[%s4641_s22 + $0xa4] sm:$0x1] }
  0x37   : > { %826 = vrot.lane.b32.xlu0 %v595_v50, %s4584_s23  ;;  %v629_v60 = vsel %vm4652_vm2, %v624_v51, %v628_v38  ;;  %v614_v61 = vrot.slane %v613_v52, 4  ;;  %v647_v62 = vor.u32 %v646_v53, %v642_v46  ;;  %v668_v63 = vshrl.u32 %v394_v45, 16  ;;  %v402_v49 = vld [vmem:[%s4641_s22 + $0x9c] sm:$0xf] }
  0x38   : > { %v637_v1 = vor.u32 %v636_v58, %v633_v57  ;;  %v666_v2 = vrot.slane %v664_v59, 5  ;;  %v674_v3 = vshll.u32 %v395_v54, 16  ;;  %v655_v4 = vshrl.u32 %v393_v55, 16  ;;  %v406_v58 = vld [vmem:[%s4641_s22 + $0xac] sm:$0xf] }
  0x39   : > { %v619_v6 = vsel %vm4652_vm2, %v614_v61, %v618_v28  ;;  %v648_v7 = vrot.slane %v647_v62, 4  ;;  %v670_v8 = vrot.slane %v668_v63, 4  ;;  %v658_v9 = vshll.u32 %v393_v55, 16 }
  0x3a   : > { %832 = vrot.lane.b32.xlu1 %v629_v60, %s4584_s23  ;;  %v638_v11 = vrot.slane %v637_v1, 4  ;;  %v676_v12 = vrot.slane %v674_v3, 5  ;;  %v657_v13 = vrot.slane %v655_v4, 4  ;;  %v688_v14 = vshll.u32 %v397_v0, 16  ;;  %v407_v3 = vld [vmem:[%s4641_s22 + $0xb0] sm:$0x1] }
  0x3b   : > { %830 = vrot.lane.b32.xlu0 %v619_v6, %s4584_s23  ;;  %v653_v15 = vsel %vm4652_vm2, %v648_v7, %v652_v56  ;;  %v671_v16 = vor.u32 %v670_v8, %v666_v2  ;;  %v660_v17 = vrot.slane %v658_v9, 5  ;;  %v692_v18 = vshrl.u32 %v397_v0, 16  ;;  %v405_v4 = vld [vmem:[%s4641_s22 + $0xa8] sm:$0xf] }
  0x3c   : > { %v643_v20 = vsel %vm4652_vm2, %v638_v11, %v642_v46  ;;  %v690_v21 = vrot.slane %v688_v14, 5  ;;  %v698_v22 = vshll.u32 %v398_v5, 16  ;;  %v679_v23 = vshrl.u32 %v396_v10, 16 }
  0x3d   : > { %v672_v25 = vrot.slane %v671_v16, 4  ;;  %v661_v26 = vor.u32 %v660_v17, %v657_v13  ;;  %v694_v28 = vrot.slane %v692_v18, 4  ;;  %v682_v29 = vshll.u32 %v396_v10, 16  ;;  %v409_v13 = vld [vmem:[%s4641_s22 + $0xb8] sm:$0xf] }
  0x3e   : > { %836 = vrot.lane.b32.xlu1 %v653_v15, %s4584_s23  ;;  %v700_v31 = vrot.slane %v698_v22, 5  ;;  %v681_v32 = vrot.slane %v679_v23, 4  ;;  %v712_v33 = vshll.u32 %v400_v19, 16  ;;  %v716_v34 = vshrl.u32 %v400_v19, 16  ;;  %v410_v22 = vld [vmem:[%s4641_s22 + $0xbc] sm:$0x1] }
  0x3f   : > { %834 = vrot.lane.b32.xlu0 %v643_v20, %s4584_s23  ;;  %v677_v35 = vsel %vm4652_vm2, %v672_v25, %v676_v12  ;;  %v662_v36 = vrot.slane %v661_v26, 4  ;;  %v695_v37 = vor.u32 %v694_v28, %v690_v21  ;;  %v684_v38 = vrot.slane %v682_v29, 5  ;;  %v408_v23 = vld [vmem:[%s4641_s22 + $0xb4] sm:$0xf] }
  0x40   : > { %v714_v40 = vrot.slane %v712_v33, 5  ;;  %v718_v41 = vrot.slane %v716_v34, 4  ;;  %v722_v42 = vshll.u32 %v401_v24, 16  ;;  %v703_v43 = vshrl.u32 %v399_v30, 16 }
  0x41   : > { %v667_v44 = vsel %vm4652_vm2, %v662_v36, %v666_v2  ;;  %v696_v45 = vrot.slane %v695_v37, 4  ;;  %v685_v46 = vor.u32 %v684_v38, %v681_v32  ;;  %v706_v47 = vshll.u32 %v399_v30, 16  ;;  %v928_v37 = vld [vmem:[%s4641_s22 + $0x4] sm:$0xf] }
  0x42   : > { %840 = vrot.lane.b32.xlu1 %v677_v35, %s4584_s23  ;;  %v719_v50 = vor.u32 %v718_v41, %v714_v40  ;;  %v724_v51 = vrot.slane %v722_v42, 5  ;;  %v705_v52 = vrot.slane %v703_v43, 4  ;;  %v736_v53 = vshll.u32 %v403_v39, 16 }
  0x43   : > { %838 = vrot.lane.b32.xlu0 %v667_v44, %s4584_s23  ;;  %v701_v54 = vsel %vm4652_vm2, %v696_v45, %v700_v31  ;;  %v686_v55 = vrot.slane %v685_v46, 4  ;;  %v708_v56 = vrot.slane %v706_v47, 5  ;;  %v740_v57 = vshrl.u32 %v403_v39, 16 }
  0x44   : > { %v720_v59 = vrot.slane %v719_v50, 4  ;;  %v738_v60 = vrot.slane %v736_v53, 5  ;;  %v746_v61 = vshll.u32 %v404_v48, 16  ;;  %v727_v62 = vshrl.u32 %v402_v49, 16  ;;  %v929_v48 = vld [vmem:[%s4641_s22 + $0x8] sm:$0x1] }
  0x45   : > { %v691_v63 = vsel %vm4652_vm2, %v686_v55, %v690_v21  ;;  %v709_v0 = vor.u32 %v708_v56, %v705_v52  ;;  %v742_v1 = vrot.slane %v740_v57, 4  ;;  %v730_v2 = vshll.u32 %v402_v49, 16  ;;  %v300_v56 = vld [vmem:[%s4641_s22 + $0xc] sm:$0xf] }
  0x46   : > { %844 = vrot.lane.b32.xlu1 %v701_v54, %s4584_s23  ;;  %v725_v5 = vsel %vm4652_vm2, %v720_v59, %v724_v51  ;;  %v748_v6 = vrot.slane %v746_v61, 5  ;;  %v729_v7 = vrot.slane %v727_v62, 4  ;;  %v760_v8 = vshll.u32 %v406_v58, 16  ;;  %v931_v51 = vld [vmem:[%s4641_s22 + $0x10] sm:$0xf] }
  0x47   : > { %842 = vrot.lane.b32.xlu0 %v691_v63, %s4584_s23  ;;  %v710_v9 = vrot.slane %v709_v0, 4  ;;  %v743_v10 = vor.u32 %v742_v1, %v738_v60  ;;  %v732_v11 = vrot.slane %v730_v2, 5  ;;  %v764_v12 = vshrl.u32 %v406_v58, 16  ;;  %v927_v54 = vld [vmem:[%s4641_s22] sm:$0xe] }
  0x48   : > { %v762_v14 = vrot.slane %v760_v8, 5  ;;  %v770_v15 = vshll.u32 %v407_v3, 16  ;;  %v751_v16 = vshrl.u32 %v405_v4, 16  ;;  %v754_v17 = vshll.u32 %v405_v4, 16  ;;  %333 = vst.msk [vmem:[#allocation2 + $0x8] sm:$0xf] %vm330_vm3, %v300_v56 }
  0x49   : > { %v715_v18 = vsel %vm4652_vm2, %v710_v9, %v714_v40  ;;  %v744_v19 = vrot.slane %v743_v10, 4  ;;  %v733_v20 = vor.u32 %v732_v11, %v729_v7  ;;  %v766_v21 = vrot.slane %v764_v12, 4  ;;  %v298_v61 = vld [vmem:[%s4641_s22] sm:$0xf]  ;;  %v932_v0 = vld [vmem:[%s4641_s22 + $0x14] sm:$0x1] }
  0x4a   : > { %848 = vrot.lane.b32.xlu1 %v725_v5, %s4584_s23  ;;  %v772_v24 = vrot.slane %v770_v15, 5  ;;  %v753_v25 = vrot.slane %v751_v16, 4  ;;  %v756_v26 = vrot.slane %v754_v17, 5  ;;  %v784_v28 = vshll.u32 %v409_v13, 16  ;;  %v934_v1 = vld [vmem:[%s4641_s22 + $0x1c] sm:$0xf] }
  0x4b   : > { %846 = vrot.lane.b32.xlu0 %v715_v18, %s4584_s23  ;;  %v749_v29 = vsel %vm4652_vm2, %v744_v19, %v748_v6  ;;  %v734_v30 = vrot.slane %v733_v20, 4  ;;  %v767_v31 = vor.u32 %v766_v21, %v762_v14  ;;  %v788_v32 = vshrl.u32 %v409_v13, 16  ;;  %331 = vst.msk [vmem:[#allocation2] sm:$0xf] %vm330_vm3, %v298_v61  ;;  %v930_v3 = vld [vmem:[%s4641_s22 + $0xc] sm:$0xe] }
  0x4c   : > { %v757_v33 = vor.u32 %v756_v26, %v753_v25  ;;  %v786_v34 = vrot.slane %v784_v28, 5  ;;  %v794_v35 = vshll.u32 %v410_v22, 16  ;;  %v775_v36 = vshrl.u32 %v408_v23, 16  ;;  %v301_v4 = vld [vmem:[%s4641_s22 + $0x10] sm:$0xf] }
  0x4d   : > { %v739_v38 = vsel %vm4652_vm2, %v734_v30, %v738_v60  ;;  %v768_v39 = vrot.slane %v767_v31, 4  ;;  %v790_v40 = vrot.slane %v788_v32, 4  ;;  %v778_v41 = vshll.u32 %v408_v23, 16  ;;  %v299_v5 = vld [vmem:[%s4641_s22 + $0x4] sm:$0xf] }
  0x4e   : > { %852 = vrot.lane.b32.xlu1 %v749_v29, %s4584_s23  ;;  %v758_v42 = vrot.slane %v757_v33, 4  ;;  %v796_v43 = vrot.slane %v794_v35, 5  ;;  %v777_v44 = vrot.slane %v775_v36, 4  ;;  %v1028_v49 = vrot.slane %v928_v37, 5  ;;  %334 = vst.msk [vmem:[#allocation2 + $0xc] sm:$0xf] %vm330_vm3, %v301_v4 }
  0x4f   : > { %850 = vrot.lane.b32.xlu0 %v739_v38, %s4584_s23  ;;  %v773_v45 = vsel %vm4652_vm2, %v768_v39, %v772_v24  ;;  %v791_v46 = vor.u32 %v790_v40, %v786_v34  ;;  %v780_v47 = vrot.slane %v778_v41, 5  ;;  %v1031_v55 = vrot.slane %v929_v48, 5  ;;  %332 = vst.msk [vmem:[#allocation2 + $0x4] sm:$0xf] %vm330_vm3, %v299_v5  ;;  %v935_v12 = vld [vmem:[%s4641_s22 + $0x20] sm:$0x1] }
  0x50   : > { %v763_v50 = vsel %vm4652_vm2, %v758_v42, %v762_v14  ;;  %v1030_v59 = vrot.slane %v1028_v49, 4  ;;  %v1035_v60 = vrot.slane %v931_v51, 5  ;;  %v4098_v63 = vrot.slane %v927_v54, 9  ;;  %v937_v13 = vld [vmem:[%s4641_s22 + $0x28] sm:$0xf] }
  0x51   : > { %v792_v52 = vrot.slane %v791_v46, 4  ;;  %v781_v53 = vor.u32 %v780_v47, %v777_v44  ;;  %v1038_v8 = vrot.slane %v932_v0, 5  ;;  %v1042_v9 = vrot.slane %v934_v1, 5  ;;  %v933_v14 = vld [vmem:[%s4641_s22 + $0x18] sm:$0xe] }
  0x52   : > { %856 = vrot.lane.b32.xlu1 %v773_v45, %s4584_s23  ;;  %v1032_v6 = vsel %vm4796_vm6, %v1030_v59, %v1031_v55  ;;  %v1037_v7 = vrot.slane %v1035_v60, 4  ;;  %v1029_v10 = vsel %vm4796_vm6, %v4098_v63, %v1028_v49  ;;  %v4099_v11 = vrot.slane %v930_v3, 9  ;;  %v303_v15 = vld [vmem:[%s4641_s22 + $0x1c] sm:$0xf]  ;;  %v302_v16 = vld [vmem:[%s4641_s22 + $0x18] sm:$0xf] }
  0x53   : > { %854 = vrot.lane.b32.xlu0 %v763_v50, %s4584_s23  ;;  %v797_v57 = vsel %vm4652_vm2, %v792_v52, %v796_v43  ;;  %v782_v58 = vrot.slane %v781_v53, 4  ;;  %336 = vst.msk [vmem:[#allocation2 + $0x14] sm:$0xf] %vm330_vm3, %v303_v15  ;;  %v1044_v18 = vrot.slane %v1042_v9, 4  ;;  %v1045_v19 = vrot.slane %v935_v12, 5 }
  0x54   : > { %v1039_v17 = vsel %vm4796_vm6, %v1037_v7, %v1038_v8  ;;  %v1049_v20 = vrot.slane %v937_v13, 5  ;;  %335 = vst.msk [vmem:[#allocation2 + $0x10] sm:$0xf] %vm330_vm3, %v302_v16  ;;  %v1036_v21 = vsel %vm4796_vm6, %v4099_v11, %v1035_v60  ;;  %v4100_v22 = vrot.slane %v933_v14, 9  ;;  %v938_v23 = vld [vmem:[%s4641_s22 + $0x2c] sm:$0x1] }
  0x55   : > { %v787_v2 = vsel %vm4652_vm2, %v782_v58, %v786_v34  ;;  %v940_v24 = vld [vmem:[%s4641_s22 + $0x34] sm:$0xf]  ;;  %v936_v25 = vld [vmem:[%s4641_s22 + $0x24] sm:$0xe]  ;;  %v305_v26 = vld [vmem:[%s4641_s22 + $0x28] sm:$0xf]  ;;  %v1046_v29 = vsel %vm4796_vm6, %v1044_v18, %v1045_v19 }
  0x56   : > { %860 = vrot.lane.b32.xlu1 %v797_v57, %s4584_s23  ;;  %338 = vst.msk [vmem:[#allocation2 + $0x1c] sm:$0xf] %vm330_vm3, %v305_v26  ;;  %v304_v28 = vld [vmem:[%s4641_s22 + $0x24] sm:$0xf]  ;;  %v1051_v30 = vrot.slane %v1049_v20, 4  ;;  %v1052_v31 = vrot.slane %v938_v23, 5  ;;  %v1043_v34 = vsel %vm4796_vm6, %v4100_v22, %v1042_v9 }
  0x57   : > { %858 = vrot.lane.b32.xlu0 %v787_v2, %s4584_s23  ;;  %v941_v32 = vld [vmem:[%s4641_s22 + $0x38] sm:$0x1]  ;;  %v1056_v33 = vrot.slane %v940_v24, 5  ;;  %337 = vst.msk [vmem:[#allocation2 + $0x18] sm:$0xf] %vm330_vm3, %v304_v28  ;;  %v4101_v35 = vrot.slane %v936_v25, 9 }
  0x58   : > { %v943_v36 = vld [vmem:[%s4641_s22 + $0x40] sm:$0xf]  ;;  %v307_v37 = vld [vmem:[%s4641_s22 + $0x34] sm:$0xf]  ;;  %v939_v38 = vld [vmem:[%s4641_s22 + $0x30] sm:$0xe]  ;;  %v1053_v41 = vsel %vm4796_vm6, %v1051_v30, %v1052_v31 }
  0x59   : > { %340 = vst.msk [vmem:[#allocation2 + $0x24] sm:$0xf] %vm330_vm3, %v307_v37  ;;  %v306_v39 = vld [vmem:[%s4641_s22 + $0x30] sm:$0xf]  ;;  %v944_v40 = vld [vmem:[%s4641_s22 + $0x44] sm:$0x1]  ;;  %v1050_v46 = vsel %vm4796_vm6, %v4101_v35, %v1049_v20 }
  0x5a   : > { %1140 = vrot.lane.b32.xlu1 %v1032_v6, %s4585_s24  ;;  %339 = vst.msk [vmem:[#allocation2 + $0x20] sm:$0xf] %vm330_vm3, %v306_v39  ;;  %v1058_v42 = vrot.slane %v1056_v33, 4  ;;  %v1059_v43 = vrot.slane %v941_v32, 5  ;;  %v1063_v44 = vrot.slane %v943_v36, 5  ;;  %v4102_v47 = vrot.slane %v939_v38, 9 }
  0x5b   : > { %1138 = vrot.lane.b32.xlu0 %v1029_v10, %s4585_s24  ;;  %v309_v45 = vld [vmem:[%s4641_s22 + $0x40] sm:$0xf]  ;;  %v946_v48 = vld [vmem:[%s4641_s22 + $0x4c] sm:$0xf]  ;;  %v308_v49 = vld [vmem:[%s4641_s22 + $0x3c] sm:$0xf] }
  0x5c   : > { %342 = vst.msk [vmem:[#allocation2 + $0x2c] sm:$0xf] %vm330_vm3, %v309_v45  ;;  %v942_v50 = vld [vmem:[%s4641_s22 + $0x3c] sm:$0xe]  ;;  %341 = vst.msk [vmem:[#allocation2 + $0x28] sm:$0xf] %vm330_vm3, %v308_v49  ;;  %v1060_v53 = vsel %vm4796_vm6, %v1058_v42, %v1059_v43  ;;  %v1057_v58 = vsel %vm4796_vm6, %v4102_v47, %v1056_v33 }
  0x5d   : > { %v947_v51 = vld [vmem:[%s4641_s22 + $0x50] sm:$0x1]  ;;  %v311_v52 = vld [vmem:[%s4641_s22 + $0x4c] sm:$0xf]  ;;  %v1065_v54 = vrot.slane %v1063_v44, 4  ;;  %v1066_v55 = vrot.slane %v944_v40, 5 }
  0x5e   : > { %1144 = vrot.lane.b32.xlu1 %v1039_v17, %s4585_s24  ;;  %v1070_v56 = vrot.slane %v946_v48, 5  ;;  %344 = vst.msk [vmem:[#allocation2 + $0x34] sm:$0xf] %vm330_vm3, %v311_v52  ;;  %v310_v57 = vld [vmem:[%s4641_s22 + $0x48] sm:$0xf]  ;;  %v4103_v59 = vrot.slane %v942_v50, 9 }
  0x5f   : > { %1142 = vrot.lane.b32.xlu0 %v1036_v21, %s4585_s24  ;;  %v4873_v60 = vld [vmem:[%s4641_s22 + $0x58] sm:$0xf]  ;;  %343 = vst.msk [vmem:[#allocation2 + $0x30] sm:$0xf] %vm330_vm3, %v310_v57  ;;  %v945_v63 = vld [vmem:[%s4641_s22 + $0x48] sm:$0xe]  ;;  %v1067_v5 = vsel %vm4796_vm6, %v1065_v54, %v1066_v55 }
  0x60   : > { %v313_v61 = vld [vmem:[%s4641_s22 + $0x58] sm:$0xf]  ;;  %v950_v0 = vld [vmem:[%s4641_s22 + $0x5c] sm:$0x1]  ;;  %v312_v1 = vld [vmem:[%s4641_s22 + $0x54] sm:$0xf]  ;;  %v1064_v10 = vsel %vm4796_vm6, %v4103_v59, %v1063_v44 }
  0x61   : > { %346 = vst.msk [vmem:[#allocation2 + $0x3c] sm:$0xf] %vm330_vm3, %v313_v61  ;;  %v1073_v2 = vrot.slane %v947_v51, 5  ;;  %345 = vst.msk [vmem:[#allocation2 + $0x38] sm:$0xf] %vm330_vm3, %v312_v1  ;;  %v1072_v6 = vrot.slane %v1070_v56, 4 }
  0x62   : > { %1148 = vrot.lane.b32.xlu1 %v1046_v29, %s4585_s24  ;;  %v315_v3 = vld [vmem:[%s4641_s22 + $0x64] sm:$0xf]  ;;  %v314_v4 = vld [vmem:[%s4641_s22 + $0x60] sm:$0xf]  ;;  %v1077_v7 = vrot.slane %v4873_v60, 5  ;;  %v4104_v11 = vrot.slane %v945_v63, 9 }
  0x63   : > { %1146 = vrot.lane.b32.xlu0 %v1043_v34, %s4585_s24  ;;  %348 = vst.msk [vmem:[#allocation2 + $0x44] sm:$0xf] %vm330_vm3, %v315_v3  ;;  %347 = vst.msk [vmem:[#allocation2 + $0x40] sm:$0xf] %vm330_vm3, %v314_v4  ;;  %v317_v8 = vld [vmem:[%s4641_s22 + $0x70] sm:$0xf]  ;;  %v1074_v20 = vsel %vm4796_vm6, %v1072_v6, %v1073_v2 }
  0x64   : > { %v316_v9 = vld [vmem:[%s4641_s22 + $0x6c] sm:$0xf]  ;;  %v952_v12 = vld [vmem:[%s4641_s22 + $0x64] sm:$0xf]  ;;  %350 = vst.msk [vmem:[#allocation2 + $0x4c] sm:$0xf] %vm330_vm3, %v317_v8  ;;  %v1071_v25 = vsel %vm4796_vm6, %v4104_v11, %v1070_v56 }
  0x65   : > { %349 = vst.msk [vmem:[#allocation2 + $0x48] sm:$0xf] %vm330_vm3, %v316_v9  ;;  %v319_v13 = vld [vmem:[%s4641_s22 + $0x7c] sm:$0xf]  ;;  %v948_v14 = vld [vmem:[%s4641_s22 + $0x54] sm:$0xe] }
  0x66   : > { %1152 = vrot.lane.b32.xlu1 %v1053_v41, %s4585_s24  ;;  %v953_v15 = vld [vmem:[%s4641_s22 + $0x68] sm:$0x1]  ;;  %352 = vst.msk [vmem:[#allocation2 + $0x54] sm:$0xf] %vm330_vm3, %v319_v13  ;;  %v318_v16 = vld [vmem:[%s4641_s22 + $0x78] sm:$0xf] }
  0x67   : > { %1150 = vrot.lane.b32.xlu0 %v1050_v46, %s4585_s24  ;;  %v1080_v17 = vrot.slane %v950_v0, 5  ;;  %351 = vst.msk [vmem:[#allocation2 + $0x50] sm:$0xf] %vm330_vm3, %v318_v16  ;;  %v321_v18 = vld [vmem:[%s4641_s22 + $0x88] sm:$0xf]  ;;  %v1079_v21 = vrot.slane %v1077_v7, 4 }
  0x68   : > { %v320_v19 = vld [vmem:[%s4641_s22 + $0x84] sm:$0xf]  ;;  %v1084_v22 = vrot.slane %v952_v12, 5  ;;  %354 = vst.msk [vmem:[#allocation2 + $0x5c] sm:$0xf] %vm330_vm3, %v321_v18  ;;  %v4105_v26 = vrot.slane %v948_v14, 9 }
  0x69   : > { %353 = vst.msk [vmem:[#allocation2 + $0x58] sm:$0xf] %vm330_vm3, %v320_v19  ;;  %v323_v23 = vld [vmem:[%s4641_s22 + $0x94] sm:$0xf]  ;;  %v322_v24 = vld [vmem:[%s4641_s22 + $0x90] sm:$0xf]  ;;  %v1081_v35 = vsel %vm4796_vm6, %v1079_v21, %v1080_v17 }
  0x6a   : > { %1156 = vrot.lane.b32.xlu1 %v1060_v53, %s4585_s24  ;;  %v955_v28 = vld [vmem:[%s4641_s22 + $0x70] sm:$0xf]  ;;  %356 = vst.msk [vmem:[#allocation2 + $0x64] sm:$0xf] %vm330_vm3, %v323_v23  ;;  %355 = vst.msk [vmem:[#allocation2 + $0x60] sm:$0xf] %vm330_vm3, %v322_v24  ;;  %v1078_v40 = vsel %vm4796_vm6, %v4105_v26, %v1077_v7 }
  0x6b   : > { %1154 = vrot.lane.b32.xlu0 %v1057_v58, %s4585_s24  ;;  %v325_v29 = vld [vmem:[%s4641_s22 + $0xa0] sm:$0xf]  ;;  %v324_v31 = vld [vmem:[%s4641_s22 + $0x9c] sm:$0xf]  ;;  %v1087_v32 = vrot.slane %v953_v15, 5  ;;  %v1086_v36 = vrot.slane %v1084_v22, 4 }
  0x6c   : > { %v951_v30 = vld [vmem:[%s4641_s22 + $0x60] sm:$0xe]  ;;  %358 = vst.msk [vmem:[#allocation2 + $0x6c] sm:$0xf] %vm330_vm3, %v325_v29  ;;  %357 = vst.msk [vmem:[#allocation2 + $0x68] sm:$0xf] %vm330_vm3, %v324_v31 }
  0x6d   : > { %v327_v33 = vld [vmem:[%s4641_s22 + $0xac] sm:$0xf]  ;;  %v326_v34 = vld [vmem:[%s4641_s22 + $0xa8] sm:$0xf]  ;;  %v1091_v37 = vrot.slane %v955_v28, 5  ;;  %v4106_v41 = vrot.slane %v951_v30, 9  ;;  %v1088_v45 = vsel %vm4796_vm6, %v1086_v36, %v1087_v32 }
  0x6e   : > { %1160 = vrot.lane.b32.xlu1 %v1067_v5, %s4585_s24  ;;  %360 = vst.msk [vmem:[#allocation2 + $0x74] sm:$0xf] %vm330_vm3, %v327_v33  ;;  %359 = vst.msk [vmem:[#allocation2 + $0x70] sm:$0xf] %vm330_vm3, %v326_v34  ;;  %v329_v38 = vld [vmem:[%s4641_s22 + $0xb8] sm:$0xf] }
  0x6f   : > { %1158 = vrot.lane.b32.xlu0 %v1064_v10, %s4585_s24  ;;  %v328_v39 = vld [vmem:[%s4641_s22 + $0xb4] sm:$0xf]  ;;  %v958_v43 = vld [vmem:[%s4641_s22 + $0x7c] sm:$0xf]  ;;  %362 = vst.msk [vmem:[#allocation2 + $0x7c] sm:$0xf] %vm330_vm3, %v329_v38  ;;  %v1085_v49 = vsel %vm4796_vm6, %v4106_v41, %v1084_v22 }
  0x70   : > { %v956_v42 = vld [vmem:[%s4641_s22 + $0x74] sm:$0x1]  ;;  %361 = vst.msk [vmem:[#allocation2 + $0x78] sm:$0xf] %vm330_vm3, %v328_v39  ;;  %v954_v44 = vld [vmem:[%s4641_s22 + $0x6c] sm:$0xe] }
  0x71   : > { %v1093_v46 = vrot.slane %v1091_v37, 4  ;;  %v1094_v47 = vrot.slane %v956_v42, 5  ;;  %v1098_v48 = vrot.slane %v958_v43, 5  ;;  %v4107_v50 = vrot.slane %v954_v44, 9  ;;  %v959_v51 = vld [vmem:[%s4641_s22 + $0x80] sm:$0x1] }
  0x72   : > { %1164 = vrot.lane.b32.xlu1 %v1074_v20, %s4585_s24  ;;  %v961_v52 = vld [vmem:[%s4641_s22 + $0x88] sm:$0xf]  ;;  %v957_v53 = vld [vmem:[%s4641_s22 + $0x78] sm:$0xe]  ;;  %v1101_v56 = vrot.slane %v959_v51, 5 }
  0x73   : > { %1162 = vrot.lane.b32.xlu0 %v1071_v25, %s4585_s24  ;;  %v1095_v54 = vsel %vm4796_vm6, %v1093_v46, %v1094_v47  ;;  %v1100_v55 = vrot.slane %v1098_v48, 4  ;;  %v1105_v57 = vrot.slane %v961_v52, 5  ;;  %v1092_v58 = vsel %vm4796_vm6, %v4107_v50, %v1091_v37  ;;  %v962_v60 = vld [vmem:[%s4641_s22 + $0x8c] sm:$0x1]  ;;  %v964_v61 = vld [vmem:[%s4641_s22 + $0x94] sm:$0xf] }
  0x74   : > { %v4108_v59 = vrot.slane %v957_v53, 9  ;;  %v960_v63 = vld [vmem:[%s4641_s22 + $0x84] sm:$0xe]  ;;  %v1108_v2 = vrot.slane %v962_v60, 5  ;;  %v1112_v3 = vrot.slane %v964_v61, 5 }
  0x75   : > { %v1102_v0 = vsel %vm4796_vm6, %v1100_v55, %v1101_v56  ;;  %v1107_v1 = vrot.slane %v1105_v57, 4  ;;  %v4109_v5 = vrot.slane %v960_v63, 9  ;;  %v965_v6 = vld [vmem:[%s4641_s22 + $0x98] sm:$0x1]  ;;  %v967_v7 = vld [vmem:[%s4641_s22 + $0xa0] sm:$0xf] }
  0x76   : > { %1168 = vrot.lane.b32.xlu1 %v1081_v35, %s4585_s24  ;;  %v1099_v4 = vsel %vm4796_vm6, %v4108_v59, %v1098_v48  ;;  %v963_v8 = vld [vmem:[%s4641_s22 + $0x90] sm:$0xe]  ;;  %v1114_v10 = vrot.slane %v1112_v3, 4  ;;  %v1115_v11 = vrot.slane %v965_v6, 5  ;;  %v1119_v12 = vrot.slane %v967_v7, 5 }
  0x77   : > { %1166 = vrot.lane.b32.xlu0 %v1078_v40, %s4585_s24  ;;  %v1109_v9 = vsel %vm4796_vm6, %v1107_v1, %v1108_v2  ;;  %v1106_v13 = vsel %vm4796_vm6, %v4109_v5, %v1105_v57  ;;  %v4110_v14 = vrot.slane %v963_v8, 9  ;;  %v968_v15 = vld [vmem:[%s4641_s22 + $0xa4] sm:$0x1]  ;;  %v970_v16 = vld [vmem:[%s4641_s22 + $0xac] sm:$0xf] }
  0x78   : > { %v966_v17 = vld [vmem:[%s4641_s22 + $0x9c] sm:$0xe]  ;;  %v1116_v18 = vsel %vm4796_vm6, %v1114_v10, %v1115_v11  ;;  %v1121_v19 = vrot.slane %v1119_v12, 4  ;;  %v1122_v20 = vrot.slane %v968_v15, 5  ;;  %v1126_v21 = vrot.slane %v970_v16, 5 }
  0x79   : > { %v1113_v22 = vsel %vm4796_vm6, %v4110_v14, %v1112_v3  ;;  %v4111_v23 = vrot.slane %v966_v17, 9  ;;  %v971_v24 = vld [vmem:[%s4641_s22 + $0xb0] sm:$0x1]  ;;  %v973_v25 = vld [vmem:[%s4641_s22 + $0xb8] sm:$0xf] }
  0x7a   : > { %1172 = vrot.lane.b32.xlu1 %v1088_v45, %s4585_s24  ;;  %v969_v26 = vld [vmem:[%s4641_s22 + $0xa8] sm:$0xe]  ;;  %v1123_v28 = vsel %vm4796_vm6, %v1121_v19, %v1122_v20  ;;  %v1128_v29 = vrot.slane %v1126_v21, 4  ;;  %v1129_v30 = vrot.slane %v971_v24, 5  ;;  %v1133_v31 = vrot.slane %v973_v25, 5 }
  0x7b   : > { %1170 = vrot.lane.b32.xlu0 %v1085_v49, %s4585_s24  ;;  %v1120_v33 = vsel %vm4796_vm6, %v4111_v23, %v1119_v12  ;;  %v4112_v34 = vrot.slane %v969_v26, 9  ;;  %v974_v35 = vld [vmem:[%s4641_s22 + $0xbc] sm:$0x1]  ;;  %v972_v37 = vld [vmem:[%s4641_s22 + $0xb4] sm:$0xe] }
  0x7c   : > { %v1130_v38 = vsel %vm4796_vm6, %v1128_v29, %v1129_v30  ;;  %v1135_v39 = vrot.slane %v1133_v31, 4  ;;  %v1136_v40 = vrot.slane %v974_v35, 5  ;;  %v4113_v43 = vrot.slane %v972_v37, 9  ;;  %v4115_v49 = vld [vmem:[%s4641_s22 + $0x10] sm:$0xf] }
  0x7d   : > { %v1127_v42 = vsel %vm4796_vm6, %v4112_v34, %v1126_v21  ;;  %v4114_v51 = vld [vmem:[%s4641_s22 + $0xc] sm:$0xf]  ;;  %v4117_v53 = vld [vmem:[%s4641_s22 + $0x1c] sm:$0xf]  ;;  %v4116_v55 = vld [vmem:[%s4641_s22 + $0x18] sm:$0xf] }
  0x7e   : > { %1176 = vrot.lane.b32.xlu1 %v1095_v54, %s4585_s24  ;;  %v1137_v45 = vsel %vm4796_vm6, %v1135_v39, %v1136_v40  ;;  %v1134_v47 = vsel %vm4796_vm6, %v4113_v43, %v1133_v31  ;;  %v4119_v57 = vld [vmem:[%s4641_s22 + $0x28] sm:$0xf]  ;;  %v4118_v59 = vld [vmem:[%s4641_s22 + $0x24] sm:$0xf]  ;;  %v4121_v61 = vld [vmem:[%s4641_s22 + $0x34] sm:$0xf] }
  0x7f   : > { %1174 = vrot.lane.b32.xlu0 %v1092_v58, %s4585_s24  ;;  %v4123_v2 = vld [vmem:[%s4641_s22 + $0x40] sm:$0xf]  ;;  %v4125_v6 = vld [vmem:[%s4641_s22 + $0x4c] sm:$0xf]  ;;  %v4124_v8 = vld [vmem:[%s4641_s22 + $0x48] sm:$0xf] }
  0x80   : > { %v4127_v10 = vld [vmem:[%s4641_s22 + $0x58] sm:$0xf]  ;;  %v4126_v12 = vld [vmem:[%s4641_s22 + $0x54] sm:$0xf]  ;;  %v4129_v14 = vld [vmem:[%s4641_s22 + $0x64] sm:$0xf] }
  0x81   : > { %v4128_v16 = vld [vmem:[%s4641_s22 + $0x60] sm:$0xf]  ;;  %v4130_v20 = vld [vmem:[%s4641_s22 + $0x6c] sm:$0xf]  ;;  %v4132_v24 = vld [vmem:[%s4641_s22 + $0x78] sm:$0xf] }
  0x82   : > { %1180 = vrot.lane.b32.xlu1 %v1102_v0, %s4585_s24  ;;  %v4120_v0 = vld [vmem:[%s4641_s22 + $0x30] sm:$0xf]  ;;  %v4135_v26 = vld [vmem:[%s4641_s22 + $0x88] sm:$0xf]  ;;  %v4134_v29 = vld [vmem:[%s4641_s22 + $0x84] sm:$0xf] }
  0x83   : > { %1178 = vrot.lane.b32.xlu0 %v1099_v4, %s4585_s24  ;;  %v4122_v4 = vld [vmem:[%s4641_s22 + $0x3c] sm:$0xf]  ;;  %v4137_v31 = vld [vmem:[%s4641_s22 + $0x94] sm:$0xf]  ;;  %v4147_v34 = vld [vmem:[%s4641_s22 + $0x10] sm:$0xf] }
  0x84   : > { %v4146_v35 = vld [vmem:[%s4641_s22 + $0xc] sm:$0xf]  ;;  %v4150_v37 = vld [vmem:[%s4641_s22 + $0x1c] sm:$0xf]  ;;  %v1519_v39 = vshll.u32 %v4147_v34, 16  ;;  %v1523_v40 = vshrl.u32 %v4147_v34, 16 }
  0x86   : > { %1184 = vrot.lane.b32.xlu1 %v1109_v9, %s4585_s24 }
  0x87   : > { %1182 = vrot.lane.b32.xlu0 %v1106_v13, %s4585_s24 }
  0x8a   : > { %1188 = vrot.lane.b32.xlu1 %v1116_v18, %s4585_s24  ;;  %v4131_v18 = vld [vmem:[%s4641_s22 + $0x70] sm:$0xf] }
  0x8b   : > { %1186 = vrot.lane.b32.xlu0 %v1113_v22, %s4585_s24  ;;  %v4133_v22 = vld [vmem:[%s4641_s22 + $0x7c] sm:$0xf] }
  0x8c   : > { %v803_v32 = vpop.permute.xlu1 %802 }
  0x8d   : > { %897 = vst.msk [vmem:[#allocation2 + $0x8] sm:$0xf] %vm894_vm7, %v803_v32  ;;  %v799_v36 = vpop.permute.xlu0 %798 }
  0x8e   : > { %895 = vst.msk [vmem:[#allocation2] sm:$0xf] %vm894_vm7, %v799_v36  ;;  %1192 = vrot.lane.b32.xlu1 %v1123_v28, %s4585_s24 }
  0x8f   : > { %1190 = vrot.lane.b32.xlu0 %v1120_v33, %s4585_s24  ;;  %v4136_v33 = vld [vmem:[%s4641_s22 + $0x90] sm:$0xf] }
  0x90   : > { %v805_v41 = vpop.permute.xlu1 %804 }
  0x91   : > { %898 = vst.msk [vmem:[#allocation2 + $0xc] sm:$0xf] %vm894_vm7, %v805_v41  ;;  %v801_v44 = vpop.permute.xlu0 %800  ;;  %v1510_v41 = vshrl.u32 %v4146_v35, 16 }
  0x92   : > { %896 = vst.msk [vmem:[#allocation2 + $0x4] sm:$0xf] %vm894_vm7, %v801_v44  ;;  %1196 = vrot.lane.b32.xlu1 %v1130_v38, %s4585_s24  ;;  %v4139_v38 = vld [vmem:[%s4641_s22 + $0xa0] sm:$0xf]  ;;  %v4138_v44 = vld [vmem:[%s4641_s22 + $0x9c] sm:$0xf] }
  0x93   : > { %1194 = vrot.lane.b32.xlu0 %v1127_v42, %s4585_s24  ;;  %v1513_v42 = vshll.u32 %v4146_v35, 16 }
  0x94   : > { %v809_v46 = vpop.permute.xlu1 %808 }
  0x95   : > { %900 = vst.msk [vmem:[#allocation2 + $0x14] sm:$0xf] %vm894_vm7, %v809_v46  ;;  %v807_v48 = vpop.permute.xlu0 %806  ;;  %v1547_v46 = vshrl.u32 %v4150_v37, 16 }
  0x96   : > { %899 = vst.msk [vmem:[#allocation2 + $0x10] sm:$0xf] %vm894_vm7, %v807_v48  ;;  %1200 = vrot.lane.b32.xlu1 %v1137_v45, %s4585_s24  ;;  %v1543_v45 = vshll.u32 %v4150_v37, 16  ;;  %v4141_v48 = vld [vmem:[%s4641_s22 + $0xac] sm:$0xf] }
  0x97   : > { %1198 = vrot.lane.b32.xlu0 %v1134_v47, %s4585_s24  ;;  %v4170_v37 = vld [vmem:[%s4641_s22 + $0x6c] sm:$0xf] }
  0x98   : > { %v813_v50 = vpop.permute.xlu1 %812 }
  0x99   : > { %902 = vst.msk [vmem:[#allocation2 + $0x1c] sm:$0xf] %vm894_vm7, %v813_v50  ;;  %v811_v52 = vpop.permute.xlu0 %810  ;;  %v4140_v50 = vld [vmem:[%s4641_s22 + $0xa8] sm:$0xf] }
  0x9a   : > { %901 = vst.msk [vmem:[#allocation2 + $0x18] sm:$0xf] %vm894_vm7, %v811_v52  ;;  %1334 = vrot.lane.b32.xlu1 %v4115_v49, %s4586_s25  ;;  %v4149_v49 = vld [vmem:[%s4641_s22 + $0x18] sm:$0xf]  ;;  %v4152_v52 = vld [vmem:[%s4641_s22 + $0x24] sm:$0xf] }
  0x9b   : > { %1332 = vrot.lane.b32.xlu0 %v4114_v51, %s4586_s25  ;;  %v4153_v51 = vld [vmem:[%s4641_s22 + $0x28] sm:$0xf] }
  0x9c   : > { %v817_v54 = vpop.permute.xlu1 %816 }
  0x9d   : > { %904 = vst.msk [vmem:[#allocation2 + $0x24] sm:$0xf] %vm894_vm7, %v817_v54  ;;  %v815_v56 = vpop.permute.xlu0 %814  ;;  %v5101_v54 = vrot.slane %v1519_v39, 5 }
  0x9e   : > { %903 = vst.msk [vmem:[#allocation2 + $0x20] sm:$0xf] %vm894_vm7, %v815_v56  ;;  %1338 = vrot.lane.b32.xlu1 %v4117_v53, %s4586_s25  ;;  %v4148_v53 = vld [vmem:[%s4641_s22 + $0x14] sm:$0x1]  ;;  %v1512_v56 = vrot.slane %v1510_v41, 4 }
  0x9f   : > { %1336 = vrot.lane.b32.xlu0 %v4116_v55, %s4586_s25  ;;  %v1525_v55 = vrot.slane %v1523_v40, 4 }
  0xa0   : > { %v821_v58 = vpop.permute.xlu1 %820 }
  0xa1   : > { %906 = vst.msk [vmem:[#allocation2 + $0x2c] sm:$0xf] %vm894_vm7, %v821_v58  ;;  %v819_v60 = vpop.permute.xlu0 %818 }
  0xa2   : > { %905 = vst.msk [vmem:[#allocation2 + $0x28] sm:$0xf] %vm894_vm7, %v819_v60  ;;  %1342 = vrot.lane.b32.xlu1 %v4119_v57, %s4586_s25  ;;  %v1515_v57 = vrot.slane %v1513_v42, 5  ;;  %v5104_v60 = vrot.slane %v1543_v45, 5  ;;  %v4157_v45 = vld [vmem:[%s4641_s22 + $0x38] sm:$0x1] }
  0xa3   : > { %1340 = vrot.lane.b32.xlu0 %v4118_v59, %s4586_s25  ;;  %v4151_v59 = vld [vmem:[%s4641_s22 + $0x20] sm:$0x1] }
  0xa4   : > { %v825_v63 = vpop.permute.xlu1 %824 }
  0xa5   : > { %908 = vst.msk [vmem:[#allocation2 + $0x34] sm:$0xf] %vm894_vm7, %v825_v63  ;;  %v823_v1 = vpop.permute.xlu0 %822  ;;  %v1534_v63 = vshrl.u32 %v4149_v49, 16 }
  0xa6   : > { %907 = vst.msk [vmem:[#allocation2 + $0x30] sm:$0xf] %vm894_vm7, %v823_v1  ;;  %1346 = vrot.lane.b32.xlu1 %v4121_v61, %s4586_s25  ;;  %v1549_v61 = vrot.slane %v1547_v46, 4 }
  0xa7   : > { %1344 = vrot.lane.b32.xlu0 %v4120_v0, %s4586_s25  ;;  %v1537_v0 = vshll.u32 %v4149_v49, 16 }
  0xa8   : > { %v829_v3 = vpop.permute.xlu1 %828 }
  0xa9   : > { %910 = vst.msk [vmem:[#allocation2 + $0x3c] sm:$0xf] %vm894_vm7, %v829_v3  ;;  %v827_v5 = vpop.permute.xlu0 %826  ;;  %v1571_v3 = vshrl.u32 %v4153_v51, 16 }
  0xaa   : > { %909 = vst.msk [vmem:[#allocation2 + $0x38] sm:$0xf] %vm894_vm7, %v827_v5  ;;  %1350 = vrot.lane.b32.xlu1 %v4123_v2, %s4586_s25  ;;  %v1567_v2 = vshll.u32 %v4153_v51, 16  ;;  %v1561_v5 = vshll.u32 %v4152_v52, 16  ;;  %v1702_v51 = vshrl.u32 %v4170_v37, 16 }
  0xab   : > { %1348 = vrot.lane.b32.xlu0 %v4122_v4, %s4586_s25  ;;  %v1558_v4 = vshrl.u32 %v4152_v52, 16  ;;  %v1705_v52 = vshll.u32 %v4170_v37, 16 }
  0xac   : > { %v833_v7 = vpop.permute.xlu1 %832 }
  0xad   : > { %912 = vst.msk [vmem:[#allocation2 + $0x44] sm:$0xf] %vm894_vm7, %v833_v7  ;;  %v831_v9 = vpop.permute.xlu0 %830  ;;  %v4143_v7 = vld [vmem:[%s4641_s22 + $0xb8] sm:$0xf] }
  0xae   : > { %911 = vst.msk [vmem:[#allocation2 + $0x40] sm:$0xf] %vm894_vm7, %v831_v9  ;;  %1354 = vrot.lane.b32.xlu1 %v4125_v6, %s4586_s25  ;;  %v4156_v6 = vld [vmem:[%s4641_s22 + $0x34] sm:$0xf]  ;;  %v1529_v9 = vshll.u32 %v4148_v53, 16 }
  0xaf   : > { %1352 = vrot.lane.b32.xlu0 %v4124_v8, %s4586_s25  ;;  %v1526_v8 = vor.u32 %v1525_v55, %v5101_v54 }
  0xb0   : > { %v837_v11 = vpop.permute.xlu1 %836 }
  0xb1   : > { %914 = vst.msk [vmem:[#allocation2 + $0x4c] sm:$0xf] %vm894_vm7, %v837_v11  ;;  %v835_v13 = vpop.permute.xlu0 %834  ;;  %v4155_v11 = vld [vmem:[%s4641_s22 + $0x30] sm:$0xf] }
  0xb2   : > { %913 = vst.msk [vmem:[#allocation2 + $0x48] sm:$0xf] %vm894_vm7, %v835_v13  ;;  %1358 = vrot.lane.b32.xlu1 %v4127_v10, %s4586_s25  ;;  %v1553_v10 = vshll.u32 %v4151_v59, 16  ;;  %v4142_v13 = vld [vmem:[%s4641_s22 + $0xb4] sm:$0xf] }
  0xb3   : > { %1356 = vrot.lane.b32.xlu0 %v4126_v12, %s4586_s25  ;;  %v4173_v59 = vld [vmem:[%s4641_s22 + $0x78] sm:$0xf] }
  0xb4   : > { %v841_v15 = vpop.permute.xlu1 %840  ;;  %v1555_v35 = vrot.slane %v1553_v10, 5 }
  0xb5   : > { %916 = vst.msk [vmem:[#allocation2 + $0x54] sm:$0xf] %vm894_vm7, %v841_v15  ;;  %v839_v17 = vpop.permute.xlu0 %838  ;;  %v1550_v15 = vor.u32 %v1549_v61, %v5104_v60 }
  0xb6   : > { %915 = vst.msk [vmem:[#allocation2 + $0x50] sm:$0xf] %vm894_vm7, %v839_v17  ;;  %1362 = vrot.lane.b32.xlu1 %v4129_v14, %s4586_s25  ;;  %v1516_v14 = vor.u32 %v1515_v57, %v1512_v56  ;;  %v1539_v17 = vrot.slane %v1537_v0, 5 }
  0xb7   : > { %1360 = vrot.lane.b32.xlu0 %v4128_v16, %s4586_s25  ;;  %v1536_v16 = vrot.slane %v1534_v63, 4  ;;  %v1551_v39 = vrot.slane %v1550_v15, 4 }
  0xb8   : > { %v845_v19 = vpop.permute.xlu1 %844  ;;  %v1517_v34 = vrot.slane %v1516_v14, 4 }
  0xb9   : > { %918 = vst.msk [vmem:[#allocation2 + $0x5c] sm:$0xf] %vm894_vm7, %v845_v19  ;;  %v843_v21 = vpop.permute.xlu0 %842  ;;  %v5117_v19 = vrot.slane %v1567_v2, 5  ;;  %v1556_v63 = vsel %vm4652_vm2, %v1551_v39, %v1555_v35  ;;  %v1601_v2 = vshll.u32 %v4157_v45, 16 }
  0xba   : > { %917 = vst.msk [vmem:[#allocation2 + $0x58] sm:$0xf] %vm894_vm7, %v843_v21  ;;  %1366 = vrot.lane.b32.xlu1 %v4131_v18, %s4586_s25  ;;  %v1560_v21 = vrot.slane %v1558_v4, 4  ;;  %v1522_v55 = vsel %vm4652_vm2, %v1517_v34, %v5101_v54 }
  0xbb   : > { %1364 = vrot.lane.b32.xlu0 %v4130_v20, %s4586_s25  ;;  %v1573_v20 = vrot.slane %v1571_v3, 4 }
  0xbc   : > { %v849_v23 = vpop.permute.xlu1 %848 }
  0xbd   : > { %920 = vst.msk [vmem:[#allocation2 + $0x64] sm:$0xf] %vm894_vm7, %v849_v23  ;;  %v847_v25 = vpop.permute.xlu0 %846  ;;  %v4154_v23 = vld [vmem:[%s4641_s22 + $0x2c] sm:$0x1]  ;;  %v1574_v40 = vor.u32 %v1573_v20, %v5117_v19  ;;  %v4174_v20 = vld [vmem:[%s4641_s22 + $0x7c] sm:$0xf] }
  0xbe   : > { %919 = vst.msk [vmem:[#allocation2 + $0x60] sm:$0xf] %vm894_vm7, %v847_v25  ;;  %1370 = vrot.lane.b32.xlu1 %v4133_v22, %s4586_s25  ;;  %v1591_v22 = vshll.u32 %v4156_v6, 16  ;;  %v1595_v25 = vshrl.u32 %v4156_v6, 16  ;;  %v1577_v41 = vshll.u32 %v4154_v23, 16  ;;  %v1704_v6 = vrot.slane %v1702_v51, 4 }
  0xbf   : > { %1368 = vrot.lane.b32.xlu0 %v4132_v24, %s4586_s25  ;;  %v1563_v24 = vrot.slane %v1561_v5, 5  ;;  %v1575_v0 = vrot.slane %v1574_v40, 4 }
  0xc0   : > { %v853_v28 = vpop.permute.xlu1 %852  ;;  %v5128_v42 = vrot.slane %v1591_v22, 5  ;;  %v1597_v46 = vrot.slane %v1595_v25, 4 }
  0xc1   : > { %922 = vst.msk [vmem:[#allocation2 + $0x6c] sm:$0xf] %vm894_vm7, %v853_v28  ;;  %v851_v30 = vpop.permute.xlu0 %850  ;;  %v1585_v28 = vshll.u32 %v4155_v11, 16 }
  0xc2   : > { %921 = vst.msk [vmem:[#allocation2 + $0x68] sm:$0xf] %vm894_vm7, %v851_v30  ;;  %1374 = vrot.lane.b32.xlu1 %v4135_v26, %s4586_s25  ;;  %v1582_v26 = vshrl.u32 %v4155_v11, 16  ;;  %v1527_v30 = vrot.slane %v1526_v8, 4  ;;  %v1598_v3 = vor.u32 %v1597_v46, %v5128_v42  ;;  %v1726_v8 = vshrl.u32 %v4173_v59, 16 }
  0xc3   : > { %1372 = vrot.lane.b32.xlu0 %v4134_v29, %s4586_s25  ;;  %v4145_v29 = vld [vmem:[%s4641_s22 + $0xc4] sm:$0xf] }
  0xc4   : > { %v857_v32 = vpop.permute.xlu1 %856 }
  0xc5   : > { %924 = vst.msk [vmem:[#allocation2 + $0x74] sm:$0xf] %vm894_vm7, %v857_v32  ;;  %v855_v36 = vpop.permute.xlu0 %854 }
  0xc6   : > { %923 = vst.msk [vmem:[#allocation2 + $0x70] sm:$0xf] %vm894_vm7, %v855_v36  ;;  %1378 = vrot.lane.b32.xlu1 %v4137_v31, %s4586_s25  ;;  %v1531_v31 = vrot.slane %v1529_v9, 5  ;;  %v1540_v36 = vor.u32 %v1539_v17, %v1536_v16  ;;  %v1729_v9 = vshll.u32 %v4173_v59, 16 }
  0xc7   : > { %1376 = vrot.lane.b32.xlu0 %v4136_v33, %s4586_s25  ;;  %v4144_v33 = vld [vmem:[%s4641_s22 + $0xc0] sm:$0xf] }
  0xc8   : > { %v861_v43 = vpop.permute.xlu1 %860  ;;  %v1532_v49 = vsel %vm4652_vm2, %v1527_v30, %v1531_v31  ;;  %v1541_v56 = vrot.slane %v1540_v36, 4  ;;  %v1735_v31 = vshll.u32 %v4174_v20, 16 }
  0xc9   : > { %926 = vst.msk [vmem:[#allocation2 + $0x7c] sm:$0xf] %vm894_vm7, %v861_v43  ;;  %v859_v47 = vpop.permute.xlu0 %858  ;;  %v4158_v43 = vld [vmem:[%s4641_s22 + $0x3c] sm:$0xf] }
  0xca   : > { %925 = vst.msk [vmem:[#allocation2 + $0x78] sm:$0xf] %vm894_vm7, %v859_v47  ;;  %1382 = vrot.lane.b32.xlu1 %v4139_v38, %s4586_s25  ;;  %v1584_v47 = vrot.slane %v1582_v26, 4  ;;  %v1606_v57 = vshrl.u32 %v4158_v43, 16  ;;  %v1546_v11 = vsel %vm4652_vm2, %v1541_v56, %v5104_v60  ;;  %v1728_v26 = vrot.slane %v1726_v8, 4 }
  0xcb   : > { %1380 = vrot.lane.b32.xlu0 %v4138_v44, %s4586_s25  ;;  %v1564_v44 = vor.u32 %v1563_v24, %v1560_v21  ;;  %v1599_v21 = vrot.slane %v1598_v3, 4  ;;  %v4195_v56 = vld [vmem:[%s4641_s22 + $0x10] sm:$0xf] }
  0xcc   : > { %v1141_v58 = vpop.permute.xlu1 %1140  ;;  %v1608_v14 = vrot.slane %v1606_v57, 4 }
  0xcd   : > { %1236 = vst.msk [vmem:[#allocation2 + $0x4] sm:$0xf] %vm1234_vm8, %v1141_v58  ;;  %v1139_v1 = vpop.permute.xlu0 %1138  ;;  %v1609_v58 = vshll.u32 %v4158_v43, 16  ;;  %v1565_v54 = vrot.slane %v1564_v44, 4  ;;  %v1737_v44 = vrot.slane %v1735_v31, 5 }
  0xce   : > { %1235 = vst.msk [vmem:[#allocation2] sm:$0xf] %vm1234_vm8, %v1139_v1  ;;  %1386 = vrot.lane.b32.xlu1 %v4141_v48, %s4586_s25  ;;  %v1587_v48 = vrot.slane %v1585_v28, 5  ;;  %v1579_v1 = vrot.slane %v1577_v41, 5  ;;  %v1731_v28 = vrot.slane %v1729_v9, 5 }
  0xcf   : > { %1384 = vrot.lane.b32.xlu0 %v4140_v50, %s4586_s25  ;;  %v4171_v50 = vld [vmem:[%s4641_s22 + $0x70] sm:$0xf]  ;;  %v1611_v15 = vrot.slane %v1609_v58, 5  ;;  %v1570_v60 = vsel %vm4652_vm2, %v1565_v54, %v5117_v19 }
  0xd0   : > { %v1145_v12 = vpop.permute.xlu1 %1144  ;;  %v1588_v4 = vor.u32 %v1587_v48, %v1584_v47  ;;  %v1711_v5 = vshll.u32 %v4171_v50, 16  ;;  %v1580_v17 = vsel %vm4652_vm2, %v1575_v0, %v1579_v1  ;;  %v1732_v39 = vor.u32 %v1731_v28, %v1728_v26  ;;  %v4175_v48 = vld [vmem:[%s4641_s22 + $0x80] sm:$0x1]  ;;  %v4221_v26 = vld [vmem:[%s4641_s22 + $0x78] sm:$0xe] }
  0xd1   : > { %1238 = vst.msk [vmem:[#allocation2 + $0xc] sm:$0xf] %vm1234_vm8, %v1145_v12  ;;  %v1143_v18 = vpop.permute.xlu0 %1142  ;;  %v1715_v12 = vshrl.u32 %v4171_v50, 16  ;;  %v1612_v30 = vor.u32 %v1611_v15, %v1608_v14  ;;  %v1745_v58 = vshll.u32 %v4175_v48, 16  ;;  %v2120_v0 = vrot.slane %v4195_v56, 5 }
  0xd2   : > { %1237 = vst.msk [vmem:[#allocation2 + $0x8] sm:$0xf] %vm1234_vm8, %v1143_v18  ;;  %1390 = vrot.lane.b32.xlu1 %v4143_v7, %s4586_s25  ;;  %v1707_v7 = vrot.slane %v1705_v52, 5  ;;  %v1603_v18 = vrot.slane %v1601_v2, 5  ;;  %v1589_v22 = vrot.slane %v1588_v4, 4  ;;  %v1713_v23 = vrot.slane %v1711_v5, 5 }
  0xd3   : > { %1388 = vrot.lane.b32.xlu0 %v4142_v13, %s4586_s25  ;;  %v4159_v13 = vld [vmem:[%s4641_s22 + $0x40] sm:$0xf]  ;;  %v1717_v34 = vrot.slane %v1715_v12, 4  ;;  %v1613_v43 = vrot.slane %v1612_v30, 4  ;;  %v1747_v3 = vrot.slane %v1745_v58, 5 }
  0xd4   : > { %v1149_v32 = vpop.permute.xlu1 %1148  ;;  %v1708_v24 = vor.u32 %v1707_v7, %v1704_v6  ;;  %v1615_v25 = vshll.u32 %v4159_v13, 16  ;;  %v1604_v19 = vsel %vm4652_vm2, %v1599_v21, %v1603_v18  ;;  %v1594_v36 = vsel %vm4652_vm2, %v1589_v22, %v5128_v42  ;;  %v4218_v4 = vld [vmem:[%s4641_s22 + $0x6c] sm:$0xe]  ;;  %v4219_v5 = vld [vmem:[%s4641_s22 + $0x70] sm:$0xf] }
  0xd5   : > { %1240 = vst.msk [vmem:[#allocation2 + $0x14] sm:$0xf] %vm1234_vm8, %v1149_v32  ;;  %v1147_v38 = vpop.permute.xlu0 %1146  ;;  %v1739_v32 = vshrl.u32 %v4174_v20, 16  ;;  %v1718_v45 = vor.u32 %v1717_v34, %v1713_v23  ;;  %v4196_v7 = vld [vmem:[%s4641_s22 + $0x14] sm:$0x1]  ;;  %v4250_v9 = vrot.slane %v4218_v4, 9 }
  0xd6   : > { %1239 = vst.msk [vmem:[#allocation2 + $0x10] sm:$0xf] %vm1234_vm8, %v1147_v38  ;;  %1394 = vrot.lane.b32.xlu1 %v4145_v29, %s4586_s25  ;;  %v1709_v37 = vrot.slane %v1708_v24, 4  ;;  %v5173_v38 = vrot.slane %v1615_v25, 5  ;;  %v2122_v13 = vrot.slane %v2120_v0, 4  ;;  %v2123_v14 = vrot.slane %v4196_v7, 5 }
  0xd7   : > { %1392 = vrot.lane.b32.xlu0 %v4144_v33, %s4586_s25  ;;  %v4172_v33 = vld [vmem:[%s4641_s22 + $0x74] sm:$0x1]  ;;  %v1741_v46 = vrot.slane %v1739_v32, 4  ;;  %v4197_v15 = vld [vmem:[%s4641_s22 + $0x18] sm:$0xe]  ;;  %v4251_v32 = vrot.slane %v4221_v26, 9 }
  0xd8   : > { %v1153_v53 = vpop.permute.xlu1 %1152  ;;  %v1721_v40 = vshll.u32 %v4172_v33, 16  ;;  %v1714_v42 = vsel %vm4652_vm2, %v1709_v37, %v1713_v23  ;;  %v1618_v52 = vsel %vm4652_vm2, %v1613_v43, %v5173_v38  ;;  %v4220_v18 = vld [vmem:[%s4641_s22 + $0x74] sm:$0x1]  ;;  %v2124_v23 = vsel %vm4796_vm6, %v2122_v13, %v2123_v14  ;;  %v4222_v28 = vld [vmem:[%s4641_s22 + $0x7c] sm:$0xf] }
  0xd9   : > { %1242 = vst.msk [vmem:[#allocation2 + $0x1c] sm:$0xf] %vm1234_vm8, %v1153_v53  ;;  %v1151_v61 = vpop.permute.xlu0 %1150  ;;  %v1719_v53 = vrot.slane %v1718_v45, 4  ;;  %v1742_v57 = vor.u32 %v1741_v46, %v1737_v44  ;;  %v2179_v25 = vrot.slane %v4220_v18, 5  ;;  %v4199_v30 = vld [vmem:[%s4641_s22 + $0x20] sm:$0x1] }
  0xda   : > { %1241 = vst.msk [vmem:[#allocation2 + $0x18] sm:$0xf] %vm1234_vm8, %v1151_v61  ;;  %1895 = vrot.lane.b32.xlu1 %v1532_v49, %s4587_s26  ;;  %v1733_v49 = vrot.slane %v1732_v39, 4  ;;  %v1723_v50 = vrot.slane %v1721_v40, 5  ;;  %v2183_v33 = vrot.slane %v4222_v28, 5 }
  0xdb   : > { %1893 = vrot.lane.b32.xlu0 %v1522_v55, %s4587_s26  ;;  %v4194_v55 = vld [vmem:[%s4641_s22 + $0xc] sm:$0xe]  ;;  %v1743_v54 = vrot.slane %v1742_v57, 4  ;;  %v4223_v39 = vld [vmem:[%s4641_s22 + $0x80] sm:$0x1] }
  0xdc   : > { %v1157_v10 = vpop.permute.xlu1 %1156  ;;  %v1738_v61 = vsel %vm4652_vm2, %v1733_v49, %v1737_v44  ;;  %v1724_v2 = vsel %vm4652_vm2, %v1719_v53, %v1723_v50  ;;  %v2184_v40 = vsel %vm4796_vm6, %v4251_v32, %v2183_v33  ;;  %v2185_v45 = vrot.slane %v2183_v33, 4  ;;  %v4291_v48 = vld [vmem:[%s4641_s22 + $0x1c] sm:$0xf]  ;;  %v4314_v50 = vld [vmem:[%s4641_s22 + $0x78] sm:$0xf] }
  0xdd   : > { %1244 = vst.msk [vmem:[#allocation2 + $0x24] sm:$0xf] %vm1234_vm8, %v1157_v10  ;;  %v1155_v16 = vpop.permute.xlu0 %1154  ;;  %v2176_v10 = vrot.slane %v4219_v5, 5  ;;  %v1748_v12 = vsel %vm4652_vm2, %v1743_v54, %v1747_v3  ;;  %v2186_v46 = vrot.slane %v4223_v39, 5  ;;  %v2611_v56 = vshll.u32 %v4291_v48, 16 }
  0xde   : > { %1243 = vst.msk [vmem:[#allocation2 + $0x20] sm:$0xf] %vm1234_vm8, %v1155_v16  ;;  %1899 = vrot.lane.b32.xlu1 %v1556_v63, %s4587_s26  ;;  %v4242_v63 = vrot.slane %v4194_v55, 9  ;;  %v4198_v16 = vld [vmem:[%s4641_s22 + $0x1c] sm:$0xf]  ;;  %v2794_v57 = vshrl.u32 %v4314_v50, 16 }
  0xdf   : > { %1897 = vrot.lane.b32.xlu0 %v1546_v11, %s4587_s26  ;;  %v2177_v20 = vsel %vm4796_vm6, %v4250_v9, %v2176_v10  ;;  %v2127_v21 = vrot.slane %v4198_v16, 5  ;;  %v2178_v24 = vrot.slane %v2176_v10, 4  ;;  %v2187_v53 = vsel %vm4796_vm6, %v2185_v45, %v2186_v46  ;;  %v4259_v3 = vld [vmem:[%s4641_s22 + $0x1c] sm:$0xf]  ;;  %v4292_v10 = vld [vmem:[%s4641_s22 + $0x20] sm:$0x1] }
  0xe0   : > { %v1161_v29 = vpop.permute.xlu1 %1160  ;;  %v2121_v8 = vsel %vm4796_vm6, %v4242_v63, %v2120_v0  ;;  %v4315_v63 = vld [vmem:[%s4641_s22 + $0x7c] sm:$0xf]  ;;  %v2797_v0 = vshll.u32 %v4314_v50, 16  ;;  %v5256_v5 = vrot.slane %v2611_v56, 5  ;;  %v4260_v13 = vld [vmem:[%s4641_s22 + $0x24] sm:$0xf] }
  0xe1   : > { %1246 = vst.msk [vmem:[#allocation2 + $0x2c] sm:$0xf] %vm1234_vm8, %v1161_v29  ;;  %v1159_v35 = vpop.permute.xlu0 %1158  ;;  %v2803_v7 = vshll.u32 %v4315_v63, 16  ;;  %v2807_v14 = vshrl.u32 %v4315_v63, 16  ;;  %v4317_v18 = vld [vmem:[%s4641_s22 + $0x84] sm:$0xf] }
  0xe2   : > { %1245 = vst.msk [vmem:[#allocation2 + $0x28] sm:$0xf] %vm1234_vm8, %v1159_v35  ;;  %1903 = vrot.lane.b32.xlu1 %v1580_v17, %s4587_s26  ;;  %v2180_v35 = vsel %vm4796_vm6, %v2178_v24, %v2179_v25  ;;  %v2799_v9 = vrot.slane %v2797_v0, 5  ;;  %v2818_v32 = vshrl.u32 %v4317_v18, 16  ;;  %v2821_v33 = vshll.u32 %v4317_v18, 16 }
  0xe3   : > { %1901 = vrot.lane.b32.xlu0 %v1570_v60, %s4587_s26  ;;  %v4243_v60 = vrot.slane %v4197_v15, 9  ;;  %v4277_v50 = vld [vmem:[%s4641_s22 + $0x88] sm:$0xf] }
  0xe4   : > { %v1165_v41 = vpop.permute.xlu1 %1164 }
  0xe5   : > { %1248 = vst.msk [vmem:[#allocation2 + $0x34] sm:$0xf] %vm1234_vm8, %v1165_v41  ;;  %v1163_v47 = vpop.permute.xlu0 %1162  ;;  %v2128_v31 = vsel %vm4796_vm6, %v4243_v60, %v2127_v21  ;;  %v4290_v41 = vld [vmem:[%s4641_s22 + $0x18] sm:$0xf]  ;;  %v5266_v60 = vrot.slane %v2803_v7, 5 }
  0xe6   : > { %1247 = vst.msk [vmem:[#allocation2 + $0x30] sm:$0xf] %vm1234_vm8, %v1163_v47  ;;  %1907 = vrot.lane.b32.xlu1 %v1604_v19, %s4587_s26  ;;  %v2129_v19 = vrot.slane %v2127_v21, 4  ;;  %v2605_v49 = vshll.u32 %v4290_v41, 16  ;;  %v2621_v21 = vshll.u32 %v4292_v10, 16 }
  0xe7   : > { %1905 = vrot.lane.b32.xlu0 %v1594_v36, %s4587_s26  ;;  %v2130_v36 = vrot.slane %v4199_v30, 5  ;;  %v4316_v30 = vld [vmem:[%s4641_s22 + $0x80] sm:$0x1]  ;;  %v4319_v7 = vld [vmem:[%s4641_s22 + $0x8c] sm:$0x1] }
  0xe8   : > { %v1169_v51 = vpop.permute.xlu1 %1168  ;;  %v2623_v39 = vrot.slane %v2621_v21, 5  ;;  %v2813_v45 = vshll.u32 %v4316_v30, 16 }
  0xe9   : > { %1250 = vst.msk [vmem:[#allocation2 + $0x3c] sm:$0xf] %vm1234_vm8, %v1169_v51  ;;  %v1167_v59 = vpop.permute.xlu0 %1166  ;;  %v2131_v44 = vsel %vm4796_vm6, %v2129_v19, %v2130_v36  ;;  %v4258_v51 = vld [vmem:[%s4641_s22 + $0x18] sm:$0xf] }
  0xea   : > { %1249 = vst.msk [vmem:[#allocation2 + $0x38] sm:$0xf] %vm1234_vm8, %v1167_v59  ;;  %1925 = vrot.lane.b32.xlu1 %v1714_v42, %s4587_s26  ;;  %v2602_v42 = vshrl.u32 %v4290_v41, 16  ;;  %v2607_v59 = vrot.slane %v2605_v49, 5  ;;  %v2815_v0 = vrot.slane %v2813_v45, 5 }
  0xeb   : > { %1909 = vrot.lane.b32.xlu0 %v1618_v52, %s4587_s26 }
  0xec   : > { %v1173_v1 = vpop.permute.xlu1 %1172  ;;  %v2604_v58 = vrot.slane %v2602_v42, 4  ;;  %v2823_v42 = vrot.slane %v2821_v33, 5  ;;  %v4540_v33 = vld [vmem:[%s6205_s1 + $0x10] ss:$0 sps:$4 sm:$0x33]  }
  0xed   : > { %1252 = vst.msk [vmem:[#allocation2 + $0x44] sm:$0xf] %vm1234_vm8, %v1173_v1  ;;  %v1171_v6 = vpop.permute.xlu0 %1170  ;;  %v4274_v1 = vld [vmem:[%s4641_s22 + $0x78] sm:$0xf]  ;;  %4505 = vmatprep.subr.msk.bf16.mxu0 %vm3632_vm10, %v4540_v33  ;;  %4506 = vmatprep.subr.msk.bf16.mxu1 %vm3632_vm10, %v4540_v33 }
  0xee   : > { %1251 = vst.msk [vmem:[#allocation2 + $0x40] sm:$0xf] %vm1234_vm8, %v1171_v6  ;;  %1929 = vrot.lane.b32.xlu1 %v1738_v61, %s4587_s26  ;;  %v2615_v61 = vshrl.u32 %v4291_v48, 16  ;;  %v2796_v6 = vrot.slane %v2794_v57, 4  ;;  %v2820_v48 = vrot.slane %v2818_v32, 4 }
  0xef   : > { %1927 = vrot.lane.b32.xlu0 %v1724_v2, %s4587_s26  ;;  %v4293_v2 = vld [vmem:[%s4641_s22 + $0x24] sm:$0xf]  ;;  %v4295_v57 = vld [vmem:[%s4641_s22 + $0x2c] sm:$0x1]  ;;  %v4340_v32 = vld [vmem:[%s4641_s22 + $0x20] sm:$0x1] }
  0xf0   : > { %v1177_v11 = vpop.permute.xlu1 %1176  ;;  %v2629_v15 = vshll.u32 %v4293_v2, 16  ;;  %v2800_v25 = vor.u32 %v2799_v9, %v2796_v6 }
  0xf1   : > { %1254 = vst.msk [vmem:[#allocation2 + $0x4c] sm:$0xf] %vm1234_vm8, %v1177_v11  ;;  %v1175_v17 = vpop.permute.xlu0 %1174  ;;  %v2617_v11 = vrot.slane %v2615_v61, 4 }
  0xf2   : > { %1253 = vst.msk [vmem:[#allocation2 + $0x48] sm:$0xf] %vm1234_vm8, %v1175_v17  ;;  %2230 = vrot.lane.b32.xlu1 %v2121_v8, %s4588_s27  ;;  %v2608_v8 = vor.u32 %v2607_v59, %v2604_v58  ;;  %v4275_v17 = vld [vmem:[%s4641_s22 + $0x7c] sm:$0xf] }
  0xf3   : > { %1931 = vrot.lane.b32.xlu0 %v1748_v12, %s4587_s26  ;;  %v2626_v12 = vshrl.u32 %v4293_v2, 16  ;;  %v2618_v26 = vor.u32 %v2617_v11, %v5256_v5  ;;  %v4338_v11 = vld [vmem:[%s4641_s22 + $0x18] sm:$0xe] }
  0xf4   : > { %v1181_v22 = vpop.permute.xlu1 %1180  ;;  %v2609_v24 = vrot.slane %v2608_v8, 4  ;;  %v4386_v21 = vrot.slane %v4338_v11, 9 }
  0xf5   : > { %1256 = vst.msk [vmem:[#allocation2 + $0x54] sm:$0xf] %vm1234_vm8, %v1181_v22  ;;  %v1179_v29 = vpop.permute.xlu0 %1178  ;;  %v4294_v22 = vld [vmem:[%s4641_s22 + $0x28] sm:$0xf]  ;;  %v2628_v28 = vrot.slane %v2626_v12, 4 }
  0xf6   : > { %1255 = vst.msk [vmem:[#allocation2 + $0x50] sm:$0xf] %vm1234_vm8, %v1179_v29  ;;  %2262 = vrot.lane.b32.xlu1 %v2177_v20, %s4588_s27  ;;  %v2631_v29 = vrot.slane %v2629_v15, 5  ;;  %v2635_v19 = vshll.u32 %v4294_v22, 16  ;;  %v2639_v36 = vshrl.u32 %v4294_v22, 16  ;;  %v2614_v41 = vsel %vm4652_vm2, %v2609_v24, %v5256_v5 }
  0xf7   : > { %2232 = vrot.lane.b32.xlu0 %v2124_v23, %s4588_s27  ;;  %v4276_v23 = vld [vmem:[%s4641_s22 + $0x84] sm:$0xf]  ;;  %v4339_v15 = vld [vmem:[%s4641_s22 + $0x1c] sm:$0xf] }
  0xf8   : > { %v1185_v34 = vpop.permute.xlu1 %1184  ;;  %v2632_v46 = vor.u32 %v2631_v29, %v2628_v28  ;;  %v3212_v22 = vrot.slane %v4339_v15, 5  ;;  %v4176_v29 = vld [vmem:[%s4641_s22 + $0x84] sm:$0xf] }
  0xf9   : > { %1258 = vst.msk [vmem:[#allocation2 + $0x5c] sm:$0xf] %vm1234_vm8, %v1185_v34  ;;  %v1183_v37 = vpop.permute.xlu0 %1182 }
  0xfa   : > { %1257 = vst.msk [vmem:[#allocation2 + $0x58] sm:$0xf] %vm1234_vm8, %v1183_v37  ;;  %2234 = vrot.lane.b32.xlu1 %v2128_v31, %s4588_s27  ;;  %v2809_v31 = vrot.slane %v2807_v14, 4  ;;  %v2633_v61 = vrot.slane %v2632_v46, 4  ;;  %v3214_v45 = vrot.slane %v3212_v22, 4  ;;  %v3215_v46 = vrot.slane %v4340_v32, 5 }
  0xfb   : > { %2264 = vrot.lane.b32.xlu0 %v2180_v35, %s4588_s27  ;;  %v4261_v35 = vld [vmem:[%s4641_s22 + $0x28] sm:$0xf] }
  0xfc   : > { %v1189_v43 = vpop.permute.xlu1 %1188 }
  0xfd   : > { %1260 = vst.msk [vmem:[#allocation2 + $0x64] sm:$0xf] %vm1234_vm8, %v1189_v43  ;;  %v1187_v47 = vpop.permute.xlu0 %1186  ;;  %v2801_v43 = vrot.slane %v2800_v25, 4 }
  0xfe   : > { %1259 = vst.msk [vmem:[#allocation2 + $0x60] sm:$0xf] %vm1234_vm8, %v1187_v47  ;;  %2266 = vrot.lane.b32.xlu1 %v2184_v40, %s4588_s27  ;;  %v4318_v40 = vld [vmem:[%s4641_s22 + $0x88] sm:$0xf]  ;;  %v2810_v47 = vor.u32 %v2809_v31, %v5266_v60 }
  0xff   : > { %2236 = vrot.lane.b32.xlu0 %v2131_v44, %s4588_s27  ;;  %v2619_v44 = vrot.slane %v2618_v26, 4  ;;  %v2806_v58 = vsel %vm4652_vm2, %v2801_v43, %v5266_v60 }
 0x100   : > { %v1193_v52 = vpop.permute.xlu1 %1192  ;;  %v2811_v63 = vrot.slane %v2810_v47, 4  ;;  %v4179_v47 = vld [vmem:[%s4641_s22 + $0x90] sm:$0xf] }
 0x101   : > { %1262 = vst.msk [vmem:[#allocation2 + $0x6c] sm:$0xf] %vm1234_vm8, %v1193_v52  ;;  %v1191_v55 = vpop.permute.xlu0 %1190  ;;  %v2827_v52 = vshll.u32 %v4318_v40, 16  ;;  %v2624_v59 = vsel %vm4652_vm2, %v2619_v44, %v2623_v39  ;;  %v1750_v39 = vshrl.u32 %v4176_v29, 16 }
 0x102   : > { %1261 = vst.msk [vmem:[#allocation2 + $0x68] sm:$0xf] %vm1234_vm8, %v1191_v55  ;;  %2424 = vrot.lane.b32.xlu1 %v4258_v51, %s4589_s28  ;;  %v2637_v51 = vrot.slane %v2635_v19, 5  ;;  %v2641_v55 = vrot.slane %v2639_v36, 4  ;;  %v2816_v9 = vsel %vm4652_vm2, %v2811_v63, %v2815_v0  ;;  %v4342_v19 = vld [vmem:[%s4641_s22 + $0x28] sm:$0xf]  ;;  %v3213_v36 = vsel %vm4796_vm6, %v4386_v21, %v3212_v22 }
 0x103   : > { %2268 = vrot.lane.b32.xlu0 %v2187_v53, %s4588_s27  ;;  %v2831_v53 = vshrl.u32 %v4318_v40, 16  ;;  %v1753_v40 = vshll.u32 %v4176_v29, 16  ;;  %v1774_v63 = vshrl.u32 %v4179_v47, 16  ;;  %v1777_v0 = vshll.u32 %v4179_v47, 16 }
 0x104   : > { %v1197_v54 = vpop.permute.xlu1 %1196  ;;  %v2638_v8 = vsel %vm4652_vm2, %v2633_v61, %v2637_v51 }
 0x105   : > { %1264 = vst.msk [vmem:[#allocation2 + $0x74] sm:$0xf] %vm1234_vm8, %v1197_v54  ;;  %v1195_v4 = vpop.permute.xlu0 %1194  ;;  %v2829_v54 = vrot.slane %v2827_v52, 5  ;;  %v2833_v5 = vrot.slane %v2831_v53, 4  ;;  %v1755_v61 = vrot.slane %v1753_v40, 5  ;;  %v1779_v15 = vrot.slane %v1777_v0, 5 }
 0x106   : > { %1263 = vst.msk [vmem:[#allocation2 + $0x70] sm:$0xf] %vm1234_vm8, %v1195_v4  ;;  %2456 = vrot.lane.b32.xlu1 %v4274_v1, %s4589_s28  ;;  %v2824_v1 = vor.u32 %v2823_v42, %v2820_v48  ;;  %v2645_v4 = vshll.u32 %v4295_v57, 16  ;;  %v4366_v57 = vld [vmem:[%s4641_s22 + $0x88] sm:$0xf] }
 0x107   : > { %2426 = vrot.lane.b32.xlu0 %v4259_v3, %s4589_s28  ;;  %v2642_v3 = vor.u32 %v2641_v55, %v2637_v51  ;;  %v4541_v51 = vld [vmem:[%s6205_s1 + $0x8] sm:$0xff]  }
 0x108   : > { %v1201_v16 = vpop.permute.xlu1 %1200  ;;  %v2825_v10 = vrot.slane %v2824_v1, 4  ;;  %v2647_v14 = vrot.slane %v2645_v4, 5 }
 0x109   : > { %1266 = vst.msk [vmem:[#allocation2 + $0x7c] sm:$0xf] %vm1234_vm8, %v1201_v16  ;;  %v1199_v20 = vpop.permute.xlu0 %1198  ;;  %v2834_v16 = vor.u32 %v2833_v5, %v2829_v54 }
 0x10a   : > { %1265 = vst.msk [vmem:[#allocation2 + $0x78] sm:$0xf] %vm1234_vm8, %v1199_v20  ;;  %2428 = vrot.lane.b32.xlu1 %v4260_v13, %s4589_s28  ;;  %v2643_v13 = vrot.slane %v2642_v3, 4  ;;  %v4362_v20 = vld [vmem:[%s4641_s22 + $0x78] sm:$0xe]  ;;  %v2830_v60 = vsel %vm4652_vm2, %v2825_v10, %v2829_v54 }
 0x10b   : > { %2458 = vrot.lane.b32.xlu0 %v4275_v17, %s4589_s28  ;;  %v2837_v17 = vshll.u32 %v4319_v7, 16  ;;  %v2835_v26 = vrot.slane %v2834_v16, 4  ;;  %v4394_v31 = vrot.slane %v4362_v20, 9  ;;  %v4543_v7 = vld [vmem:[%s6205_s1] sm:$0xff]  }
 0x10c   : > { %v1335_v34 = vpop.permute.xlu1 %1334  ;;  %v2648_v25 = vsel %vm4652_vm2, %v2643_v13, %v2647_v14  ;;  %v1776_v14 = vrot.slane %v1774_v63, 4 }
 0x10d   : > { %1430 = vst.msk [vmem:[#allocation2 + $0x4] sm:$0xf] %vm1428_vm9, %v1335_v34  ;;  %v1333_v37 = vpop.permute.xlu0 %1332  ;;  %v2839_v28 = vrot.slane %v2837_v17, 5 }
 0x10e   : > { %1429 = vst.msk [vmem:[#allocation2] sm:$0xf] %vm1428_vm9, %v1333_v37  ;;  %2460 = vrot.lane.b32.xlu1 %v4276_v23, %s4589_s28  ;;  %v4363_v23 = vld [vmem:[%s4641_s22 + $0x7c] sm:$0xf]  ;;  %v4364_v37 = vld [vmem:[%s4641_s22 + $0x80] sm:$0x1]  ;;  %v1780_v29 = vor.u32 %v1779_v15, %v1776_v14 }
 0x10f   : > { %2430 = vrot.lane.b32.xlu0 %v4261_v35, %s4589_s28  ;;  %v3268_v34 = vrot.slane %v4363_v23, 5  ;;  %v4341_v35 = vld [vmem:[%s4641_s22 + $0x24] sm:$0xe]  ;;  %v2840_v44 = vsel %vm4652_vm2, %v2835_v26, %v2839_v28  ;;  %v3271_v55 = vrot.slane %v4364_v37, 5  ;;  %v4367_v23 = vld [vmem:[%s4641_s22 + $0x8c] sm:$0x1] }
 0x110   : > { %v1339_v49 = vpop.permute.xlu1 %1338  ;;  %v4387_v42 = vrot.slane %v4341_v35, 9  ;;  %v3278_v32 = vrot.slane %v4367_v23, 5 }
 0x111   : > { %1432 = vst.msk [vmem:[#allocation2 + $0xc] sm:$0xf] %vm1428_vm9, %v1339_v49  ;;  %v1337_v56 = vpop.permute.xlu0 %1336  ;;  %v3219_v49 = vrot.slane %v4342_v19, 5  ;;  %v3269_v52 = vsel %vm4796_vm6, %v4394_v31, %v3268_v34  ;;  %v3270_v53 = vrot.slane %v3268_v34, 4 }
 0x112   : > { %1431 = vst.msk [vmem:[#allocation2 + $0x8] sm:$0xf] %vm1428_vm9, %v1337_v56  ;;  %2985 = vrot.lane.b32.xlu1 %v2614_v41, %s4590_s29  ;;  %v3634_v41 = vsel %vm3632_vm10, %v4540_v33, 0  ;;  %v4365_v56 = vld [vmem:[%s4641_s22 + $0x84] sm:$0xe] }
 0x113   : > { %2462 = vrot.lane.b32.xlu0 %v4277_v50, %s4589_s28  ;;  %4462 = vmatpush3.bf16.msra.mxu0 %v3634_v41  ;;  %v4177_v50 = vld [vmem:[%s4641_s22 + $0x88] sm:$0xf]  ;;  %v3220_v5 = vsel %vm4796_vm6, %v4387_v42, %v3219_v49  ;;  %v3221_v10 = vrot.slane %v3219_v49, 4 }
 0x114   : > { %v1343_v2 = vpop.permute.xlu1 %1342  ;;  %4502 = vmatpush3.bf16.msra.mxu1 %v3634_v41  ;;  %4463 = vmatprep.subr.bf16.mxu0 %v4541_v51  ;;  %v1759_v54 = vshll.u32 %v4177_v50, 16  ;;  %v1763_v3 = vshrl.u32 %v4177_v50, 16 }
 0x115   : > { %1434 = vst.msk [vmem:[#allocation2 + $0x14] sm:$0xf] %vm1428_vm9, %v1343_v2  ;;  %v1341_v6 = vpop.permute.xlu0 %1340  ;;  %v3216_v2 = vsel %vm4796_vm6, %v3214_v45, %v3215_v46  ;;  %4500 = vmatprep.subr.bf16.mxu1 %v4541_v51  ;;  %v4200_v45 = vld [vmem:[%s4641_s22 + $0x24] sm:$0xe]  ;;  %v4201_v46 = vld [vmem:[%s4641_s22 + $0x28] sm:$0xf] }
 0x116   : > { %1433 = vst.msk [vmem:[#allocation2 + $0x10] sm:$0xf] %vm1428_vm9, %v1341_v6  ;;  %3017 = vrot.lane.b32.xlu1 %v2806_v58, %s4590_s29  ;;  %v4343_v58 = vld [vmem:[%s4641_s22 + $0x2c] sm:$0x1]  ;;  %v4180_v6 = vld [vmem:[%s4641_s22 + $0x94] sm:$0xf] }
 0x117   : > { %2987 = vrot.lane.b32.xlu0 %v2624_v59, %s4590_s29  ;;  %v1752_v59 = vrot.slane %v1750_v39, 4  ;;  %4464 = vmatpush3.bf16.msra.mxu0 %v4541_v51  ;;  %v3222_v11 = vrot.slane %v4343_v58, 5  ;;  %v1761_v17 = vrot.slane %v1759_v54, 5  ;;  %v1787_v20 = vshrl.u32 %v4180_v6, 16  ;;  %v4225_v58 = vld [vmem:[%s4641_s22 + $0x88] sm:$0xf] }
 0x118   : > { %v1347_v12 = vpop.permute.xlu1 %1346  ;;  %4503 = vmatpush3.bf16.msra.mxu1 %v4541_v51  ;;  %4465 = vmatprep.subr.bf16.mxu0 %v4543_v7  ;;  %v1765_v21 = vrot.slane %v1763_v3, 4  ;;  %v1781_v39 = vrot.slane %v1780_v29, 4  ;;  %v4244_v50 = vrot.slane %v4200_v45, 9  ;;  %v2134_v51 = vrot.slane %v4201_v46, 5  ;;  %v4229_v29 = vld [vmem:[%s4641_s22 + $0x98] sm:$0x1] }
 0x119   : > { %1436 = vst.msk [vmem:[#allocation2 + $0x1c] sm:$0xf] %vm1428_vm9, %v1347_v12  ;;  %v1345_v18 = vpop.permute.xlu0 %1344  ;;  %v3272_v12 = vsel %vm4796_vm6, %v3270_v53, %v3271_v55  ;;  %v1756_v13 = vor.u32 %v1755_v61, %v1752_v59  ;;  %4501 = vmatprep.subr.bf16.mxu1 %v4543_v7  ;;  %v1789_v35 = vrot.slane %v1787_v20, 4  ;;  %v4202_v61 = vld [vmem:[%s4641_s22 + $0x2c] sm:$0x1] }
 0x11a   : > { %1435 = vst.msk [vmem:[#allocation2 + $0x18] sm:$0xf] %vm1428_vm9, %v1345_v18  ;;  %2989 = vrot.lane.b32.xlu1 %v2638_v8, %s4590_s29  ;;  %v4395_v8 = vrot.slane %v4365_v56, 9  ;;  %v1783_v18 = vshll.u32 %v4180_v6, 16  ;;  %v1766_v34 = vor.u32 %v1765_v21, %v1761_v17  ;;  %v2135_v63 = vsel %vm4796_vm6, %v4244_v50, %v2134_v51  ;;  %v4204_v6 = vld [vmem:[%s4641_s22 + $0x34] sm:$0xf] }
 0x11b   : > { %3019 = vrot.lane.b32.xlu0 %v2816_v9, %s4590_s29  ;;  %v3275_v9 = vrot.slane %v4366_v57, 5  ;;  %4466 = vmatpush3.bf16.msra.mxu0 %v4543_v7  ;;  %v1757_v26 = vrot.slane %v1756_v13, 4  ;;  %v4224_v57 = vld [vmem:[%s4641_s22 + $0x84] sm:$0xe]  ;;  %v2136_v3 = vrot.slane %v2134_v51, 4 }
 0x11c   : > { %v1351_v24 = vpop.permute.xlu1 %1350  ;;  %4504 = vmatpush3.bf16.msra.mxu1 %v4543_v7  ;;  %v1785_v33 = vrot.slane %v1783_v18, 5  ;;  %v4252_v0 = vrot.slane %v4224_v57, 9  ;;  %v4205_v20 = vld [vmem:[%s4641_s22 + $0x38] sm:$0x1]  ;;  %v4278_v51 = vld [vmem:[%s4641_s22 + $0x90] sm:$0xf] }
 0x11d   : > { %1438 = vst.msk [vmem:[#allocation2 + $0x24] sm:$0xf] %vm1428_vm9, %v1351_v24  ;;  %v1349_v30 = vpop.permute.xlu0 %1348  ;;  %v3276_v24 = vsel %vm4796_vm6, %v4395_v8, %v3275_v9  ;;  %v3277_v28 = vrot.slane %v3275_v9, 4  ;;  %v1762_v37 = vsel %vm4652_vm2, %v1757_v26, %v1761_v17  ;;  %v4226_v8 = vld [vmem:[%s4641_s22 + $0x8c] sm:$0x1]  ;;  %v2144_v26 = vrot.slane %v4205_v20, 5 }
 0x11e   : > { %1437 = vst.msk [vmem:[#allocation2 + $0x20] sm:$0xf] %vm1428_vm9, %v1349_v30  ;;  %3021 = vrot.lane.b32.xlu1 %v2830_v60, %s4590_s29  ;;  %v4178_v60 = vld [vmem:[%s4641_s22 + $0x8c] sm:$0x1]  ;;  %v1790_v47 = vor.u32 %v1789_v35, %v1785_v33  ;;  %v1786_v49 = vsel %vm4652_vm2, %v1781_v39, %v1785_v33  ;;  %v2193_v15 = vrot.slane %v4226_v8, 5  ;;  %v2200_v35 = vrot.slane %v4229_v29, 5 }
 0x11f   : > { %2991 = vrot.lane.b32.xlu0 %v2648_v25, %s4590_s29  ;;  %v3223_v25 = vsel %vm4796_vm6, %v3221_v10, %v3222_v11  ;;  %v1769_v30 = vshll.u32 %v4178_v60, 16  ;;  %v2141_v11 = vrot.slane %v4204_v6, 5  ;;  %v4228_v17 = vld [vmem:[%s4641_s22 + $0x94] sm:$0xf]  ;;  %v4323_v8 = vld [vmem:[%s4641_s22 + $0x9c] sm:$0xf] }
 0x120   : > { %v1355_v43 = vpop.permute.xlu1 %1354  ;;  %v1791_v55 = vrot.slane %v1790_v47, 4  ;;  %v4297_v39 = vld [vmem:[%s4641_s22 + $0x34] sm:$0xf] }
 0x121   : > { %1440 = vst.msk [vmem:[#allocation2 + $0x2c] sm:$0xf] %vm1428_vm9, %v1355_v43  ;;  %v1353_v48 = vpop.permute.xlu0 %1352  ;;  %v1771_v40 = vrot.slane %v1769_v30, 5  ;;  %v3279_v43 = vsel %vm4796_vm6, %v3277_v28, %v3278_v32  ;;  %v4296_v30 = vld [vmem:[%s4641_s22 + $0x30] sm:$0xf] }
 0x122   : > { %1439 = vst.msk [vmem:[#allocation2 + $0x28] sm:$0xf] %vm1428_vm9, %v1353_v48  ;;  %3322 = vrot.lane.b32.xlu1 %v3213_v36, %s4591_s8  ;;  %v4181_v36 = vld [vmem:[%s4641_s22 + $0x98] sm:$0x1] }
 0x123   : > { %3023 = vrot.lane.b32.xlu0 %v2840_v44, %s4590_s29  ;;  %v1767_v44 = vrot.slane %v1766_v34, 4  ;;  %v1793_v48 = vshll.u32 %v4181_v36, 16  ;;  %v2650_v36 = vshrl.u32 %v4296_v30, 16 }
 0x124   : > { %v1359_v1 = vpop.permute.xlu1 %1358 }
 0x125   : > { %1442 = vst.msk [vmem:[#allocation2 + $0x34] sm:$0xf] %vm1428_vm9, %v1359_v1  ;;  %v1357_v4 = vpop.permute.xlu0 %1356  ;;  %v1772_v53 = vsel %vm4652_vm2, %v1767_v44, %v1771_v40  ;;  %v1795_v56 = vrot.slane %v1793_v48, 5  ;;  %v2190_v1 = vrot.slane %v4225_v58, 5  ;;  %v4262_v40 = vld [vmem:[%s4641_s22 + $0x30] sm:$0xf] }
 0x126   : > { %1441 = vst.msk [vmem:[#allocation2 + $0x30] sm:$0xf] %vm1428_vm9, %v1357_v4  ;;  %3354 = vrot.lane.b32.xlu1 %v3269_v52, %s4591_s8  ;;  %v2137_v4 = vrot.slane %v4202_v61, 5  ;;  %v2652_v46 = vrot.slane %v2650_v36, 4  ;;  %v2659_v48 = vshll.u32 %v4297_v39, 16 }
 0x127   : > { %3324 = vrot.lane.b32.xlu0 %v3216_v2, %s4591_s8  ;;  %v1796_v54 = vsel %vm4652_vm2, %v1791_v55, %v1795_v56  ;;  %v2191_v9 = vsel %vm4796_vm6, %v4252_v0, %v2190_v1  ;;  %v2192_v14 = vrot.slane %v2190_v1, 4  ;;  %v4263_v55 = vld [vmem:[%s4641_s22 + $0x34] sm:$0xf]  ;;  %v4299_v56 = vld [vmem:[%s4641_s22 + $0x3c] sm:$0xf] }
 0x128   : > { %v1363_v16 = vpop.permute.xlu1 %1362  ;;  %v2138_v13 = vsel %vm4796_vm6, %v2136_v3, %v2137_v4  ;;  %v4298_v3 = vld [vmem:[%s4641_s22 + $0x38] sm:$0x1]  ;;  %v2674_v4 = vshrl.u32 %v4299_v56, 16 }
 0x129   : > { %1444 = vst.msk [vmem:[#allocation2 + $0x3c] sm:$0xf] %vm1428_vm9, %v1363_v16  ;;  %v1361_v22 = vpop.permute.xlu0 %1360  ;;  %v4227_v16 = vld [vmem:[%s4641_s22 + $0x90] sm:$0xe] }
 0x12a   : > { %1443 = vst.msk [vmem:[#allocation2 + $0x38] sm:$0xf] %vm1428_vm9, %v1361_v22  ;;  %3326 = vrot.lane.b32.xlu1 %v3220_v5, %s4591_s8  ;;  %v4203_v5 = vld [vmem:[%s4641_s22 + $0x30] sm:$0xe]  ;;  %v4253_v21 = vrot.slane %v4227_v16, 9  ;;  %v2197_v22 = vrot.slane %v4228_v17, 5 }
 0x12b   : > { %3356 = vrot.lane.b32.xlu0 %v3272_v12, %s4591_s8  ;;  %v4245_v10 = vrot.slane %v4203_v5, 9  ;;  %v2677_v5 = vshll.u32 %v4299_v56, 16  ;;  %v4280_v17 = vld [vmem:[%s4641_s22 + $0x9c] sm:$0xf] }
 0x12c   : > { %v1367_v31 = vpop.permute.xlu1 %1366  ;;  %v2199_v34 = vrot.slane %v2197_v22, 4 }
 0x12d   : > { %1446 = vst.msk [vmem:[#allocation2 + $0x44] sm:$0xf] %vm1428_vm9, %v1367_v31  ;;  %v1365_v19 = vpop.permute.xlu0 %1364  ;;  %v2142_v60 = vsel %vm4796_vm6, %v4245_v10, %v2141_v11  ;;  %v2198_v31 = vsel %vm4796_vm6, %v4253_v21, %v2197_v22  ;;  %v2679_v20 = vrot.slane %v2677_v5, 5  ;;  %v2869_v21 = vshll.u32 %v4323_v8, 16  ;;  %v4345_v5 = vld [vmem:[%s4641_s22 + $0x34] sm:$0xf] }
 0x12e   : > { %1445 = vst.msk [vmem:[#allocation2 + $0x40] sm:$0xf] %vm1428_vm9, %v1365_v19  ;;  %3358 = vrot.lane.b32.xlu1 %v3276_v24, %s4591_s8  ;;  %v2194_v24 = vsel %vm4796_vm6, %v2192_v14, %v2193_v15  ;;  %v2201_v44 = vsel %vm4796_vm6, %v2199_v34, %v2200_v35  ;;  %v2669_v15 = vshll.u32 %v4298_v3, 16  ;;  %v4281_v35 = vld [vmem:[%s4641_s22 + $0xa0] sm:$0xf] }
 0x12f   : > { %3328 = vrot.lane.b32.xlu0 %v3223_v25, %s4591_s8  ;;  %v2143_v25 = vrot.slane %v2141_v11, 4 }
 0x130   : > { %v1371_v41 = vpop.permute.xlu1 %1370 }
 0x131   : > { %1448 = vst.msk [vmem:[#allocation2 + $0x4c] sm:$0xf] %vm1428_vm9, %v1371_v41  ;;  %v1369_v42 = vpop.permute.xlu0 %1368  ;;  %v2145_v33 = vsel %vm4796_vm6, %v2143_v25, %v2144_v26  ;;  %v4320_v41 = vld [vmem:[%s4641_s22 + $0x90] sm:$0xf]  ;;  %v4322_v26 = vld [vmem:[%s4641_s22 + $0x98] sm:$0x1] }
 0x132   : > { %1447 = vst.msk [vmem:[#allocation2 + $0x48] sm:$0xf] %vm1428_vm9, %v1369_v42  ;;  %1933 = vrot.lane.b32.xlu1 %v1762_v37, %s4587_s26  ;;  %v2653_v37 = vshll.u32 %v4296_v30, 16  ;;  %v2663_v42 = vshrl.u32 %v4297_v39, 16  ;;  %v2845_v50 = vshll.u32 %v4320_v41, 16  ;;  %v2861_v36 = vshll.u32 %v4322_v26, 16 }
 0x133   : > { %3360 = vrot.lane.b32.xlu0 %v3279_v43, %s4591_s8  ;;  %v4324_v30 = vld [vmem:[%s4641_s22 + $0xa0] sm:$0xf]  ;;  %v2871_v39 = vrot.slane %v2869_v21, 5 }
 0x134   : > { %v1375_v52 = vpop.permute.xlu1 %1374  ;;  %v2655_v47 = vrot.slane %v2653_v37, 5  ;;  %v2665_v61 = vrot.slane %v2663_v42, 4  ;;  %v2847_v0 = vrot.slane %v2845_v50, 5 }
 0x135   : > { %1450 = vst.msk [vmem:[#allocation2 + $0x54] sm:$0xf] %vm1428_vm9, %v1375_v52  ;;  %v1373_v59 = vpop.permute.xlu0 %1372  ;;  %v4321_v52 = vld [vmem:[%s4641_s22 + $0x94] sm:$0xf] }
 0x136   : > { %1449 = vst.msk [vmem:[#allocation2 + $0x50] sm:$0xf] %vm1428_vm9, %v1373_v59  ;;  %1937 = vrot.lane.b32.xlu1 %v1786_v49, %s4587_s26  ;;  %v2842_v49 = vshrl.u32 %v4320_v41, 16  ;;  %v2656_v58 = vor.u32 %v2655_v47, %v2652_v46  ;;  %v5451_v59 = vrot.slane %v2659_v48, 5  ;;  %v2851_v1 = vshll.u32 %v4321_v52, 16 }
 0x137   : > { %1935 = vrot.lane.b32.xlu0 %v1772_v53, %s4587_s26 }
 0x138   : > { %v1379_v2 = vpop.permute.xlu1 %1378  ;;  %v2657_v10 = vrot.slane %v2656_v58, 4  ;;  %v2666_v11 = vor.u32 %v2665_v61, %v5451_v59  ;;  %v2853_v14 = vrot.slane %v2851_v1, 5  ;;  %v4325_v61 = vld [vmem:[%s4641_s22 + $0xa4] sm:$0x1] }
 0x139   : > { %1452 = vst.msk [vmem:[#allocation2 + $0x5c] sm:$0xf] %vm1428_vm9, %v1379_v2  ;;  %v1377_v7 = vpop.permute.xlu0 %1376  ;;  %v2855_v2 = vshrl.u32 %v4321_v52, 16 }
 0x13a   : > { %1451 = vst.msk [vmem:[#allocation2 + $0x58] sm:$0xf] %vm1428_vm9, %v1377_v7  ;;  %2238 = vrot.lane.b32.xlu1 %v2135_v63, %s4588_s27  ;;  %v2844_v63 = vrot.slane %v2842_v49, 4  ;;  %v4279_v7 = vld [vmem:[%s4641_s22 + $0x94] sm:$0xf]  ;;  %v2662_v29 = vsel %vm4652_vm2, %v2657_v10, %v5451_v59 }
 0x13b   : > { %1939 = vrot.lane.b32.xlu0 %v1796_v54, %s4587_s26  ;;  %v4264_v54 = vld [vmem:[%s4641_s22 + $0x3c] sm:$0xf]  ;;  %v2857_v16 = vrot.slane %v2855_v2, 4  ;;  %v4369_v10 = vld [vmem:[%s4641_s22 + $0x94] sm:$0xf] }
 0x13c   : > { %v1383_v12 = vpop.permute.xlu1 %1382 }
 0x13d   : > { %1454 = vst.msk [vmem:[#allocation2 + $0x64] sm:$0xf] %vm1428_vm9, %v1383_v12  ;;  %v1381_v18 = vpop.permute.xlu0 %1380  ;;  %v4300_v12 = vld [vmem:[%s4641_s22 + $0x40] sm:$0xf]  ;;  %v2858_v34 = vor.u32 %v2857_v16, %v2853_v14 }
 0x13e   : > { %1453 = vst.msk [vmem:[#allocation2 + $0x60] sm:$0xf] %vm1428_vm9, %v1381_v18  ;;  %2270 = vrot.lane.b32.xlu1 %v2191_v9, %s4588_s27  ;;  %v2676_v18 = vrot.slane %v2674_v4, 4  ;;  %v2687_v25 = vshrl.u32 %v4300_v12, 16  ;;  %v4344_v4 = vld [vmem:[%s4641_s22 + $0x30] sm:$0xe] }
 0x13f   : > { %2240 = vrot.lane.b32.xlu0 %v2138_v13, %s4588_s27  ;;  %v2848_v13 = vor.u32 %v2847_v0, %v2844_v63  ;;  %v2859_v50 = vrot.slane %v2858_v34, 4  ;;  %v4370_v34 = vld [vmem:[%s4641_s22 + $0x98] sm:$0x1] }
 0x140   : > { %v1387_v23 = vpop.permute.xlu1 %1386  ;;  %v2689_v46 = vrot.slane %v2687_v25, 4 }
 0x141   : > { %1456 = vst.msk [vmem:[#allocation2 + $0x6c] sm:$0xf] %vm1428_vm9, %v1387_v23  ;;  %v1385_v28 = vpop.permute.xlu0 %1384  ;;  %v4265_v23 = vld [vmem:[%s4641_s22 + $0x40] sm:$0xf] }
 0x142   : > { %1455 = vst.msk [vmem:[#allocation2 + $0x68] sm:$0xf] %vm1428_vm9, %v1385_v28  ;;  %2242 = vrot.lane.b32.xlu1 %v2142_v60, %s4588_s27  ;;  %v2866_v60 = vshrl.u32 %v4323_v8, 16 }
 0x143   : > { %2272 = vrot.lane.b32.xlu0 %v2194_v24, %s4588_s27  ;;  %v2683_v24 = vshll.u32 %v4300_v12, 16  ;;  %v4388_v12 = vrot.slane %v4344_v4, 9  ;;  %v4373_v4 = vld [vmem:[%s4641_s22 + $0xa4] sm:$0x1] }
 0x144   : > { %v1391_v32 = vpop.permute.xlu1 %1390  ;;  %v2868_v37 = vrot.slane %v2866_v60, 4 }
 0x145   : > { %1458 = vst.msk [vmem:[#allocation2 + $0x74] sm:$0xf] %vm1428_vm9, %v1391_v32  ;;  %v1389_v19 = vpop.permute.xlu0 %1388  ;;  %v2667_v32 = vrot.slane %v2666_v11, 4  ;;  %v2685_v41 = vrot.slane %v2683_v24, 5 }
 0x146   : > { %1457 = vst.msk [vmem:[#allocation2 + $0x70] sm:$0xf] %vm1428_vm9, %v1389_v19  ;;  %2274 = vrot.lane.b32.xlu1 %v2198_v31, %s4588_s27  ;;  %v2849_v31 = vrot.slane %v2848_v13, 4  ;;  %v2680_v19 = vor.u32 %v2679_v20, %v2676_v18  ;;  %v3226_v13 = vrot.slane %v4345_v5, 5  ;;  %v4559_v20 = vld [vmem:[%s4641_s22 + $0x40] sm:$0xf] }
 0x147   : > { %2244 = vrot.lane.b32.xlu0 %v2145_v33, %s4588_s27  ;;  %v2671_v33 = vrot.slane %v2669_v15, 5  ;;  %v1619_v60 = vshrl.u32 %v4559_v20, 16  ;;  %v4184_v5 = vld [vmem:[%s4641_s22 + $0xa4] sm:$0x1]  ;;  %v3292_v20 = vrot.slane %v4373_v4, 5 }
 0x148   : > { %v1395_v43 = vpop.permute.xlu1 %1394  ;;  %v2854_v48 = vsel %vm4652_vm2, %v2849_v31, %v2853_v14  ;;  %v2681_v49 = vrot.slane %v2680_v19, 4  ;;  %v4346_v14 = vld [vmem:[%s4641_s22 + $0x38] sm:$0x1]  ;;  %v3228_v24 = vrot.slane %v3226_v13, 4  ;;  %v3227_v26 = vsel %vm4796_vm6, %v4388_v12, %v3226_v13  ;;  %v4186_v12 = vld [vmem:[%s4641_s22 + $0xac] sm:$0xf] }
 0x149   : > { %1460 = vst.msk [vmem:[#allocation2 + $0x7c] sm:$0xf] %vm1428_vm9, %v1395_v43  ;;  %v1393_v45 = vpop.permute.xlu0 %1392  ;;  %v2875_v43 = vshll.u32 %v4324_v30, 16  ;;  %v2672_v42 = vsel %vm4652_vm2, %v2667_v32, %v2671_v33  ;;  %v3229_v25 = vrot.slane %v4346_v14, 5  ;;  %v4348_v33 = vld [vmem:[%s4641_s22 + $0x40] sm:$0xf] }
 0x14a   : > { %1459 = vst.msk [vmem:[#allocation2 + $0x78] sm:$0xf] %vm1428_vm9, %v1393_v45  ;;  %2432 = vrot.lane.b32.xlu1 %v4262_v40, %s4589_s28  ;;  %v4301_v45 = vld [vmem:[%s4641_s22 + $0x44] sm:$0x1]  ;;  %v2686_v63 = vsel %vm4652_vm2, %v2681_v49, %v2685_v41  ;;  %v3285_v49 = vrot.slane %v4370_v34, 5 }
 0x14b   : > { %2276 = vrot.lane.b32.xlu0 %v2201_v44, %s4588_s27  ;;  %v2879_v44 = vshrl.u32 %v4324_v30, 16  ;;  %v2693_v52 = vshll.u32 %v4301_v45, 16  ;;  %v2877_v56 = vrot.slane %v2875_v43, 5  ;;  %v4182_v30 = vld [vmem:[%s4641_s22 + $0x9c] sm:$0xf] }
 0x14c   : > { %v1896_v53 = vpop.permute.xlu1 %1895  ;;  %v1798_v45 = vshrl.u32 %v4182_v30, 16 }
 0x14d   : > { %1991 = vst.msk [vmem:[#allocation2 + $0x4] sm:$0xf] %vm1989_vm11, %v1896_v53  ;;  %v1894_v57 = vpop.permute.xlu0 %1893  ;;  %v2881_v58 = vrot.slane %v2879_v44, 4  ;;  %v2695_v1 = vrot.slane %v2693_v52, 5 }
 0x14e   : > { %1990 = vst.msk [vmem:[#allocation2] sm:$0xf] %vm1989_vm11, %v1894_v57  ;;  %2464 = vrot.lane.b32.xlu1 %v4278_v51, %s4589_s28  ;;  %v2872_v51 = vor.u32 %v2871_v39, %v2868_v37  ;;  %v2690_v57 = vor.u32 %v2689_v46, %v2685_v41  ;;  %v4372_v37 = vld [vmem:[%s4641_s22 + $0xa0] sm:$0xf]  ;;  %v4349_v39 = vld [vmem:[%s4641_s22 + $0x44] sm:$0x1] }
 0x14f   : > { %2434 = vrot.lane.b32.xlu0 %v4263_v55, %s4589_s28  ;;  %v2863_v55 = vrot.slane %v2861_v36, 5  ;;  %v4160_v41 = vld [vmem:[%s4641_s22 + $0x44] sm:$0x1]  ;;  %v1801_v46 = vshll.u32 %v4182_v30, 16 }
 0x150   : > { %v1900_v6 = vpop.permute.xlu1 %1899  ;;  %v2873_v0 = vrot.slane %v2872_v51, 4  ;;  %v2691_v3 = vrot.slane %v2690_v57, 4  ;;  %v3230_v51 = vsel %vm4796_vm6, %v3228_v24, %v3229_v25  ;;  %v1831_v25 = vshll.u32 %v4186_v12, 16 }
 0x151   : > { %1993 = vst.msk [vmem:[#allocation2 + $0xc] sm:$0xf] %vm1989_vm11, %v1900_v6  ;;  %v1898_v9 = vpop.permute.xlu0 %1897  ;;  %v2882_v6 = vor.u32 %v2881_v58, %v2877_v56  ;;  %v3236_v58 = vrot.slane %v4349_v39, 5 }
 0x152   : > { %1992 = vst.msk [vmem:[#allocation2 + $0x8] sm:$0xf] %vm1989_vm11, %v1898_v9  ;;  %2436 = vrot.lane.b32.xlu1 %v4264_v54, %s4589_s28  ;;  %v2864_v54 = vsel %vm4652_vm2, %v2859_v50, %v2863_v55  ;;  %v4368_v9 = vld [vmem:[%s4641_s22 + $0x90] sm:$0xe]  ;;  %v2878_v11 = vsel %vm4652_vm2, %v2873_v0, %v2877_v56  ;;  %v2696_v16 = vsel %vm4652_vm2, %v2691_v3, %v2695_v1  ;;  %v4162_v55 = vld [vmem:[%s4641_s22 + $0x4c] sm:$0xf] }
 0x153   : > { %2466 = vrot.lane.b32.xlu0 %v4279_v7, %s4589_s28  ;;  %v2885_v7 = vshll.u32 %v4325_v61, 16  ;;  %v1625_v61 = vshll.u32 %v4160_v41, 16  ;;  %v1833_v41 = vrot.slane %v1831_v25, 5 }
 0x154   : > { %v1904_v22 = vpop.permute.xlu1 %1903 }
 0x155   : > { %1995 = vst.msk [vmem:[#allocation2 + $0x14] sm:$0xf] %vm1989_vm11, %v1904_v22  ;;  %v1902_v28 = vpop.permute.xlu0 %1901  ;;  %v2887_v18 = vrot.slane %v2885_v7, 5  ;;  %v4396_v22 = vrot.slane %v4368_v9, 9  ;;  %v1643_v7 = vshrl.u32 %v4162_v55, 16 }
 0x156   : > { %1994 = vst.msk [vmem:[#allocation2 + $0x10] sm:$0xf] %vm1989_vm11, %v1902_v28  ;;  %2468 = vrot.lane.b32.xlu1 %v4280_v17, %s4589_s28  ;;  %v2883_v17 = vrot.slane %v2882_v6, 4  ;;  %v4347_v28 = vld [vmem:[%s4641_s22 + $0x3c] sm:$0xe]  ;;  %v1639_v6 = vshll.u32 %v4162_v55, 16 }
 0x157   : > { %2438 = vrot.lane.b32.xlu0 %v4265_v23, %s4589_s28  ;;  %v3282_v23 = vrot.slane %v4369_v10, 5  ;;  %v1645_v24 = vrot.slane %v1643_v7, 4 }
 0x158   : > { %v1908_v40 = vpop.permute.xlu1 %1907  ;;  %v2888_v32 = vsel %vm4652_vm2, %v2883_v17, %v2887_v18  ;;  %v4185_v18 = vld [vmem:[%s4641_s22 + $0xa8] sm:$0xf] }
 0x159   : > { %1997 = vst.msk [vmem:[#allocation2 + $0x1c] sm:$0xf] %vm1989_vm11, %v1908_v40  ;;  %v1906_v47 = vpop.permute.xlu0 %1905  ;;  %v3283_v36 = vsel %vm4796_vm6, %v4396_v22, %v3282_v23  ;;  %v1621_v40 = vrot.slane %v1619_v60, 4 }
 0x15a   : > { %1996 = vst.msk [vmem:[#allocation2 + $0x18] sm:$0xf] %vm1989_vm11, %v1906_v47  ;;  %2993 = vrot.lane.b32.xlu1 %v2662_v29, %s4590_s29  ;;  %v4183_v29 = vld [vmem:[%s4641_s22 + $0xa0] sm:$0xf]  ;;  %v4389_v47 = vrot.slane %v4347_v28, 9 }
 0x15b   : > { %2470 = vrot.lane.b32.xlu0 %v4281_v35, %s4589_s28  ;;  %v4371_v35 = vld [vmem:[%s4641_s22 + $0x9c] sm:$0xe]  ;;  %v1807_v43 = vshll.u32 %v4183_v29, 16  ;;  %v1811_v44 = vshrl.u32 %v4183_v29, 16  ;;  %v4163_v29 = vld [vmem:[%s4641_s22 + $0x50] sm:$0x1] }
 0x15c   : > { %v1926_v53 = vpop.permute.xlu1 %1925  ;;  %v4397_v52 = vrot.slane %v4371_v35, 9 }
 0x15d   : > { %2006 = vst.msk [vmem:[#allocation2 + $0x40] sm:$0xf] %vm1989_vm11, %v1926_v53  ;;  %v1910_v59 = vpop.permute.xlu0 %1909  ;;  %v3289_v53 = vrot.slane %v4372_v37, 5  ;;  %v5541_v0 = vrot.slane %v1807_v43, 5  ;;  %v1813_v1 = vrot.slane %v1811_v44, 4 }
 0x15e   : > { %1998 = vst.msk [vmem:[#allocation2 + $0x20] sm:$0xf] %vm1989_vm11, %v1910_v59  ;;  %3025 = vrot.lane.b32.xlu1 %v2854_v48, %s4590_s29  ;;  %v3233_v48 = vrot.slane %v4348_v33, 5  ;;  %v1622_v59 = vor.u32 %v1621_v40, %v5173_v38  ;;  %v1825_v33 = vshll.u32 %v4185_v18, 16  ;;  %v1649_v40 = vshll.u32 %v4163_v29, 16 }
 0x15f   : > { %2995 = vrot.lane.b32.xlu0 %v2672_v42, %s4590_s29  ;;  %v3284_v42 = vrot.slane %v3282_v23, 4  ;;  %v3290_v9 = vsel %vm4796_vm6, %v4397_v52, %v3289_v53  ;;  %v3291_v17 = vrot.slane %v3289_v53, 4  ;;  %v1814_v60 = vor.u32 %v1813_v1, %v5541_v0  ;;  %v4234_v29 = vld [vmem:[%s4641_s22 + $0xac] sm:$0xf] }
 0x160   : > { %v1930_v2 = vpop.permute.xlu1 %1929  ;;  %v3235_v57 = vrot.slane %v3233_v48, 4  ;;  %v3234_v3 = vsel %vm4796_vm6, %v4389_v47, %v3233_v48  ;;  %v5561_v23 = vrot.slane %v1639_v6, 5  ;;  %v4187_v47 = vld [vmem:[%s4641_s22 + $0xb0] sm:$0x1]  ;;  %v1651_v52 = vrot.slane %v1649_v40, 5 }
 0x161   : > { %2008 = vst.msk [vmem:[#allocation2 + $0x48] sm:$0xf] %vm1989_vm11, %v1930_v2  ;;  %v1928_v8 = vpop.permute.xlu0 %1927  ;;  %v1800_v2 = vrot.slane %v1798_v45, 4  ;;  %v3286_v38 = vsel %vm4796_vm6, %v3284_v42, %v3285_v49  ;;  %v1827_v42 = vrot.slane %v1825_v33, 5  ;;  %v1841_v55 = vshll.u32 %v4187_v47, 16 }
 0x162   : > { %2007 = vst.msk [vmem:[#allocation2 + $0x44] sm:$0xf] %vm1989_vm11, %v1928_v8  ;;  %2997 = vrot.lane.b32.xlu1 %v2686_v63, %s4590_s29  ;;  %v4161_v63 = vld [vmem:[%s4641_s22 + $0x48] sm:$0xf]  ;;  %v3237_v14 = vsel %vm4796_vm6, %v3235_v57, %v3236_v58  ;;  %v1646_v39 = vor.u32 %v1645_v24, %v5561_v23  ;;  %v4231_v6 = vld [vmem:[%s4641_s22 + $0xa0] sm:$0xf] }
 0x163   : > { %3027 = vrot.lane.b32.xlu0 %v2864_v54, %s4590_s29  ;;  %v1803_v54 = vrot.slane %v1801_v46, 5  ;;  %v1630_v10 = vshrl.u32 %v4161_v63, 16 }
 0x164   : > { %v2231_v15 = vpop.permute.xlu1 %2230 }
 0x165   : > { %2327 = vst.msk [vmem:[#allocation2] sm:$0xf] %vm2326_vm12, %v2231_v15  ;;  %v1932_v21 = vpop.permute.xlu0 %1931  ;;  %v1623_v15 = vrot.slane %v1622_v59, 4  ;;  %v1804_v22 = vor.u32 %v1803_v54, %v1800_v2  ;;  %v1632_v30 = vrot.slane %v1630_v10, 4 }
 0x166   : > { %2009 = vst.msk [vmem:[#allocation2 + $0x4c] sm:$0xf] %vm1989_vm11, %v1932_v21  ;;  %3029 = vrot.lane.b32.xlu1 %v2878_v11, %s4590_s29  ;;  %v1633_v11 = vshll.u32 %v4161_v63, 16  ;;  %v1817_v21 = vshll.u32 %v4184_v5, 16  ;;  %v4208_v5 = vld [vmem:[%s4641_s22 + $0x44] sm:$0x1] }
 0x167   : > { %2999 = vrot.lane.b32.xlu0 %v2696_v16, %s4590_s29  ;;  %v1627_v16 = vrot.slane %v1625_v61, 5  ;;  %v1805_v45 = vrot.slane %v1804_v22, 4  ;;  %v4207_v61 = vld [vmem:[%s4641_s22 + $0x40] sm:$0xf] }
 0x168   : > { %v2263_v31 = vpop.permute.xlu1 %2262  ;;  %v1819_v37 = vrot.slane %v1817_v21, 5  ;;  %v2148_v54 = vrot.slane %v4207_v61, 5  ;;  %v4267_v61 = vld [vmem:[%s4641_s22 + $0x4c] sm:$0xf] }
 0x169   : > { %2343 = vst.msk [vmem:[#allocation2 + $0x40] sm:$0xf] %vm2326_vm12, %v2263_v31  ;;  %v2233_v19 = vpop.permute.xlu0 %2232  ;;  %v1635_v31 = vrot.slane %v1633_v11, 5  ;;  %v1628_v35 = vsel %vm4652_vm2, %v1623_v15, %v1627_v16  ;;  %v1810_v57 = vsel %vm4652_vm2, %v1805_v45, %v5541_v0  ;;  %v1843_v0 = vrot.slane %v1841_v55, 5  ;;  %v4232_v16 = vld [vmem:[%s4641_s22 + $0xa4] sm:$0x1] }
 0x16a   : > { %2328 = vst.msk [vmem:[#allocation2 + $0x4] sm:$0xf] %vm2326_vm12, %v2233_v19  ;;  %3330 = vrot.lane.b32.xlu1 %v3227_v26, %s4591_s8  ;;  %v1835_v26 = vshrl.u32 %v4186_v12, 16  ;;  %v3293_v19 = vsel %vm4796_vm6, %v3291_v17, %v3292_v20  ;;  %v2150_v10 = vrot.slane %v2148_v54, 4  ;;  %v2151_v11 = vrot.slane %v4208_v5, 5 }
 0x16b   : > { %3031 = vrot.lane.b32.xlu0 %v2888_v32, %s4590_s29  ;;  %v1822_v32 = vshrl.u32 %v4185_v18, 16  ;;  %v1636_v46 = vor.u32 %v1635_v31, %v1632_v30  ;;  %v2204_v12 = vrot.slane %v4231_v6, 5  ;;  %v4210_v17 = vld [vmem:[%s4641_s22 + $0x4c] sm:$0xf]  ;;  %v4230_v20 = vld [vmem:[%s4641_s22 + $0x9c] sm:$0xe] }
 0x16c   : > { %v2235_v50 = vpop.permute.xlu1 %2234  ;;  %v1837_v43 = vrot.slane %v1835_v26, 4  ;;  %v2207_v22 = vrot.slane %v4232_v16, 5  ;;  %v4254_v26 = vrot.slane %v4230_v20, 9  ;;  %v4209_v31 = vld [vmem:[%s4641_s22 + $0x48] sm:$0xe] }
 0x16d   : > { %2329 = vst.msk [vmem:[#allocation2 + $0x8] sm:$0xf] %vm2326_vm12, %v2235_v50  ;;  %v2265_v56 = vpop.permute.xlu0 %2264  ;;  %v1824_v48 = vrot.slane %v1822_v32, 4  ;;  %v1637_v58 = vrot.slane %v1636_v46, 4  ;;  %v2206_v21 = vrot.slane %v2204_v12, 4 }
 0x16e   : > { %2344 = vst.msk [vmem:[#allocation2 + $0x44] sm:$0xf] %vm2326_vm12, %v2265_v56  ;;  %3362 = vrot.lane.b32.xlu1 %v3283_v36, %s4591_s8  ;;  %v1815_v36 = vrot.slane %v1814_v60, 4  ;;  %v1838_v53 = vor.u32 %v1837_v43, %v1833_v41  ;;  %v2152_v60 = vsel %vm4796_vm6, %v2150_v10, %v2151_v11  ;;  %v4283_v11 = vld [vmem:[%s4641_s22 + $0xac] sm:$0xf] }
 0x16f   : > { %3332 = vrot.lane.b32.xlu0 %v3230_v51, %s4591_s8  ;;  %v1647_v51 = vrot.slane %v1646_v39, 4  ;;  %v1828_v59 = vor.u32 %v1827_v42, %v1824_v48  ;;  %v2208_v32 = vsel %vm4796_vm6, %v2206_v21, %v2207_v22  ;;  %v4235_v39 = vld [vmem:[%s4641_s22 + $0xb0] sm:$0x1]  ;;  %v4268_v21 = vld [vmem:[%s4641_s22 + $0x54] sm:$0xf] }
 0x170   : > { %v2267_v8 = vpop.permute.xlu1 %2266  ;;  %v1820_v50 = vsel %vm4652_vm2, %v1815_v36, %v1819_v37  ;;  %v1839_v2 = vrot.slane %v1838_v53, 4  ;;  %v2205_v36 = vsel %vm4796_vm6, %v4254_v26, %v2204_v12  ;;  %v4247_v37 = vrot.slane %v4209_v31, 9 }
 0x171   : > { %2345 = vst.msk [vmem:[#allocation2 + $0x48] sm:$0xf] %vm2326_vm12, %v2267_v8  ;;  %v2237_v13 = vpop.permute.xlu0 %2236  ;;  %v1652_v1 = vsel %vm4652_vm2, %v1647_v51, %v1651_v52  ;;  %v1829_v4 = vrot.slane %v1828_v59, 4  ;;  %v4206_v8 = vld [vmem:[%s4641_s22 + $0x3c] sm:$0xe]  ;;  %v2214_v45 = vrot.slane %v4235_v39, 5 }
 0x172   : > { %2330 = vst.msk [vmem:[#allocation2 + $0xc] sm:$0xf] %vm2326_vm12, %v2237_v13  ;;  %3334 = vrot.lane.b32.xlu1 %v3234_v3, %s4591_s8  ;;  %v4246_v15 = vrot.slane %v4206_v8, 9  ;;  %v4285_v39 = vld [vmem:[%s4641_s22 + $0xb8] sm:$0xf] }
 0x173   : > { %3364 = vrot.lane.b32.xlu0 %v3286_v38, %s4591_s8  ;;  %v1642_v38 = vsel %vm4652_vm2, %v1637_v58, %v5561_v23  ;;  %v2155_v23 = vrot.slane %v4210_v17, 5  ;;  %v4269_v17 = vld [vmem:[%s4641_s22 + $0x58] sm:$0xf] }
 0x174   : > { %v2425_v28 = vpop.permute.xlu1 %2424  ;;  %v2149_v25 = vsel %vm4796_vm6, %v4246_v15, %v2148_v54  ;;  %v4304_v54 = vld [vmem:[%s4641_s22 + $0x50] sm:$0x1]  ;;  %v4306_v15 = vld [vmem:[%s4641_s22 + $0x58] sm:$0xf] }
 0x175   : > { %2521 = vst.msk [vmem:[#allocation2] sm:$0xf] %vm2520_vm13, %v2425_v28  ;;  %v2269_v34 = vpop.permute.xlu0 %2268  ;;  %v4211_v28 = vld [vmem:[%s4641_s22 + $0x50] sm:$0x1]  ;;  %v2157_v33 = vrot.slane %v2155_v23, 4  ;;  %v2156_v47 = vsel %vm4796_vm6, %v4247_v37, %v2155_v23  ;;  %v2717_v12 = vshll.u32 %v4304_v54, 16 }
 0x176   : > { %2346 = vst.msk [vmem:[#allocation2 + $0x4c] sm:$0xf] %vm2326_vm12, %v2269_v34  ;;  %3366 = vrot.lane.b32.xlu1 %v3290_v9, %s4591_s8  ;;  %v1844_v9 = vsel %vm4652_vm2, %v1839_v2, %v1843_v0  ;;  %v2158_v34 = vrot.slane %v4211_v28, 5  ;;  %v4266_v0 = vld [vmem:[%s4641_s22 + $0x48] sm:$0xf] }
 0x177   : > { %3336 = vrot.lane.b32.xlu0 %v3237_v14, %s4591_s8  ;;  %v1834_v14 = vsel %vm4652_vm2, %v1829_v4, %v1833_v41  ;;  %v4233_v41 = vld [vmem:[%s4641_s22 + $0xa8] sm:$0xe]  ;;  %v2719_v26 = vrot.slane %v2717_v12, 5  ;;  %v4328_v28 = vld [vmem:[%s4641_s22 + $0xb0] sm:$0x1] }
 0x178   : > { %v2457_v44 = vpop.permute.xlu1 %2456  ;;  %v2159_v43 = vsel %vm4796_vm6, %v2157_v33, %v2158_v34  ;;  %v4255_v48 = vrot.slane %v4233_v41, 9  ;;  %v4330_v34 = vld [vmem:[%s4641_s22 + $0xb8] sm:$0xf]  ;;  %v4329_v37 = vld [vmem:[%s4641_s22 + $0xb4] sm:$0xf] }
 0x179   : > { %2537 = vst.msk [vmem:[#allocation2 + $0x40] sm:$0xf] %vm2520_vm13, %v2457_v44  ;;  %v2427_v49 = vpop.permute.xlu0 %2426 }
 0x17a   : > { %2522 = vst.msk [vmem:[#allocation2 + $0x4] sm:$0xf] %vm2520_vm13, %v2427_v49  ;;  %1911 = vrot.lane.b32.xlu1 %v1628_v35, %s4587_s26  ;;  %v2211_v35 = vrot.slane %v4234_v29, 5  ;;  %v4303_v49 = vld [vmem:[%s4641_s22 + $0x4c] sm:$0xf]  ;;  %v2731_v29 = vshll.u32 %v4306_v15, 16 }
 0x17b   : > { %3368 = vrot.lane.b32.xlu0 %v3293_v19, %s4591_s8 }
 0x17c   : > { %v2429_v56 = vpop.permute.xlu1 %2428  ;;  %v2213_v44 = vrot.slane %v2211_v35, 4  ;;  %v2212_v53 = vsel %vm4796_vm6, %v4255_v48, %v2211_v35 }
 0x17d   : > { %2523 = vst.msk [vmem:[#allocation2 + $0x8] sm:$0xf] %vm2520_vm13, %v2429_v56  ;;  %v2459_v63 = vpop.permute.xlu0 %2458  ;;  %v2707_v56 = vshll.u32 %v4303_v49, 16 }
 0x17e   : > { %2538 = vst.msk [vmem:[#allocation2 + $0x44] sm:$0xf] %vm2520_vm13, %v2459_v63  ;;  %1943 = vrot.lane.b32.xlu1 %v1820_v50, %s4587_s26  ;;  %v4302_v50 = vld [vmem:[%s4641_s22 + $0x48] sm:$0xf]  ;;  %v2215_v51 = vsel %vm4796_vm6, %v2213_v44, %v2214_v45  ;;  %v4327_v63 = vld [vmem:[%s4641_s22 + $0xac] sm:$0xf] }
 0x17f   : > { %1941 = vrot.lane.b32.xlu0 %v1810_v57, %s4587_s26  ;;  %v2711_v57 = vshrl.u32 %v4303_v49, 16  ;;  %v2698_v58 = vshrl.u32 %v4302_v50, 16  ;;  %v2701_v59 = vshll.u32 %v4302_v50, 16  ;;  %v2903_v8 = vshrl.u32 %v4327_v63, 16 }
 0x180   : > { %v2461_v3 = vpop.permute.xlu1 %2460  ;;  %v2909_v44 = vshll.u32 %v4328_v28, 16  ;;  %v2927_v49 = vshrl.u32 %v4330_v34, 16 }
 0x181   : > { %2539 = vst.msk [vmem:[#allocation2 + $0x48] sm:$0xf] %vm2520_vm13, %v2461_v3  ;;  %v2431_v7 = vpop.permute.xlu0 %2430  ;;  %v2713_v4 = vrot.slane %v2711_v57, 4  ;;  %v2700_v5 = vrot.slane %v2698_v58, 4  ;;  %v2703_v6 = vrot.slane %v2701_v59, 5  ;;  %v2905_v23 = vrot.slane %v2903_v8, 4 }
 0x182   : > { %2524 = vst.msk [vmem:[#allocation2 + $0xc] sm:$0xf] %vm2520_vm13, %v2431_v7  ;;  %1915 = vrot.lane.b32.xlu1 %v1652_v1, %s4587_s26  ;;  %v4326_v1 = vld [vmem:[%s4641_s22 + $0xa8] sm:$0xf]  ;;  %v2899_v7 = vshll.u32 %v4327_v63, 16  ;;  %v2929_v54 = vrot.slane %v2927_v49, 4 }
 0x183   : > { %1913 = vrot.lane.b32.xlu0 %v1642_v38, %s4587_s26  ;;  %v5656_v38 = vrot.slane %v2707_v56, 5  ;;  %v2893_v10 = vshll.u32 %v4326_v1, 16  ;;  %v2704_v20 = vor.u32 %v2703_v6, %v2700_v5  ;;  %v4331_v6 = vld [vmem:[%s4641_s22 + $0xbc] sm:$0x1] }
 0x184   : > { %v2986_v13 = vpop.permute.xlu1 %2985  ;;  %v5671_v22 = vrot.slane %v2899_v7, 5 }
 0x185   : > { %3082 = vst.msk [vmem:[#allocation2] sm:$0xf] %vm3081_vm14, %v2986_v13  ;;  %v2463_v18 = vpop.permute.xlu0 %2462  ;;  %v2705_v41 = vrot.slane %v2704_v20, 4  ;;  %v4351_v20 = vld [vmem:[%s4641_s22 + $0x4c] sm:$0xf] }
 0x186   : > { %2540 = vst.msk [vmem:[#allocation2 + $0x4c] sm:$0xf] %vm2520_vm13, %v2463_v18  ;;  %1947 = vrot.lane.b32.xlu1 %v1844_v9, %s4587_s26  ;;  %v2890_v9 = vshrl.u32 %v4326_v1, 16  ;;  %v2714_v18 = vor.u32 %v2713_v4, %v5656_v38 }
 0x187   : > { %1945 = vrot.lane.b32.xlu0 %v1834_v14, %s4587_s26  ;;  %v4282_v14 = vld [vmem:[%s4641_s22 + $0xa8] sm:$0xf]  ;;  %v2710_v4 = vsel %vm4652_vm2, %v2705_v41, %v5656_v38  ;;  %v5740_v41 = vld [vmem:[%s4641_s22 + $0x58] sm:$0xf] }
 0x188   : > { %v3018_v24 = vpop.permute.xlu1 %3017 }
 0x189   : > { %3098 = vst.msk [vmem:[#allocation2 + $0x40] sm:$0xf] %vm3081_vm14, %v3018_v24  ;;  %v2988_v30 = vpop.permute.xlu0 %2987  ;;  %v2892_v24 = vrot.slane %v2890_v9, 4 }
 0x18a   : > { %3083 = vst.msk [vmem:[#allocation2 + $0x4] sm:$0xf] %vm3081_vm14, %v2988_v30  ;;  %2248 = vrot.lane.b32.xlu1 %v2152_v60, %s4588_s27  ;;  %v4305_v60 = vld [vmem:[%s4641_s22 + $0x54] sm:$0xf]  ;;  %v2735_v30 = vshrl.u32 %v4306_v15, 16 }
 0x18b   : > { %2246 = vrot.lane.b32.xlu0 %v2149_v25, %s4588_s27  ;;  %v2895_v25 = vrot.slane %v2893_v10, 5  ;;  %v2725_v33 = vshll.u32 %v4305_v60, 16 }
 0x18c   : > { %v2990_v19 = vpop.permute.xlu1 %2989  ;;  %v2737_v48 = vrot.slane %v2735_v30, 4 }
 0x18d   : > { %3084 = vst.msk [vmem:[#allocation2 + $0x8] sm:$0xf] %vm3081_vm14, %v2990_v19  ;;  %v3020_v40 = vpop.permute.xlu0 %3019  ;;  %v2896_v45 = vor.u32 %v2895_v25, %v2892_v24  ;;  %v3240_v25 = vrot.slane %v4351_v20, 5 }
 0x18e   : > { %3099 = vst.msk [vmem:[#allocation2 + $0x44] sm:$0xf] %vm3081_vm14, %v3020_v40  ;;  %2280 = vrot.lane.b32.xlu1 %v2208_v32, %s4588_s27  ;;  %v2722_v32 = vshrl.u32 %v4305_v60, 16  ;;  %v4284_v40 = vld [vmem:[%s4641_s22 + $0xb4] sm:$0xf] }
 0x18f   : > { %2278 = vrot.lane.b32.xlu0 %v2205_v36, %s4588_s27  ;;  %v2715_v36 = vrot.slane %v2714_v18, 4  ;;  %v2897_v1 = vrot.slane %v2896_v45, 4 }
 0x190   : > { %v3022_v46 = vpop.permute.xlu1 %3021 }
 0x191   : > { %3100 = vst.msk [vmem:[#allocation2 + $0x48] sm:$0xf] %vm3081_vm14, %v3022_v46  ;;  %v2992_v42 = vpop.permute.xlu0 %2991  ;;  %v4307_v46 = vld [vmem:[%s4641_s22 + $0x5c] sm:$0x1]  ;;  %v2720_v58 = vsel %vm4652_vm2, %v2715_v36, %v2719_v26  ;;  %v5722_v26 = vld [vmem:[%s4641_s22 + $0xac] sm:$0xf] }
 0x192   : > { %3085 = vst.msk [vmem:[#allocation2 + $0xc] sm:$0xf] %vm3081_vm14, %v2992_v42  ;;  %2252 = vrot.lane.b32.xlu1 %v2159_v43, %s4588_s27  ;;  %v2906_v43 = vor.u32 %v2905_v23, %v5671_v22  ;;  %v2923_v42 = vshll.u32 %v4330_v34, 16  ;;  %v2741_v63 = vshll.u32 %v4307_v46, 16  ;;  %v3296_v34 = vrot.slane %v5722_v26, 5 }
 0x193   : > { %2250 = vrot.lane.b32.xlu0 %v2156_v47, %s4588_s27  ;;  %v5686_v47 = vrot.slane %v2731_v29, 5  ;;  %v4374_v46 = vld [vmem:[%s4641_s22 + $0xa8] sm:$0xe] }
 0x194   : > { %v3323_v52 = vpop.permute.xlu1 %3322  ;;  %v2907_v59 = vrot.slane %v2906_v43, 4  ;;  %v2743_v12 = vrot.slane %v2741_v63, 5 }
 0x195   : > { %3419 = vst.msk [vmem:[#allocation2] sm:$0xf] %vm3418_vm15, %v3323_v52  ;;  %v3024_v55 = vpop.permute.xlu0 %3023  ;;  %v2727_v52 = vrot.slane %v2725_v33, 5  ;;  %v4350_v33 = vld [vmem:[%s4641_s22 + $0x48] sm:$0xe] }
 0x196   : > { %3101 = vst.msk [vmem:[#allocation2 + $0x4c] sm:$0xf] %vm3081_vm14, %v3024_v55  ;;  %2284 = vrot.lane.b32.xlu1 %v2215_v51, %s4588_s27  ;;  %v2724_v51 = vrot.slane %v2722_v32, 4  ;;  %v2917_v55 = vshll.u32 %v4329_v37, 16  ;;  %v4390_v45 = vrot.slane %v4350_v33, 9 }
 0x197   : > { %2282 = vrot.lane.b32.xlu0 %v2212_v53, %s4588_s27  ;;  %v2914_v53 = vshrl.u32 %v4329_v37, 16  ;;  %v3242_v37 = vrot.slane %v3240_v25, 4 }
 0x198   : > { %v3355_v2 = vpop.permute.xlu1 %3354  ;;  %v2728_v5 = vor.u32 %v2727_v52, %v2724_v51  ;;  %v2919_v8 = vrot.slane %v2917_v55, 5  ;;  %v3298_v52 = vrot.slane %v3296_v34, 4  ;;  %v3247_v55 = vrot.slane %v5740_v41, 5  ;;  %v4192_v41 = vld [vmem:[%s4641_s22 + $0xc4] sm:$0xf] }
 0x199   : > { %3435 = vst.msk [vmem:[#allocation2 + $0x40] sm:$0xf] %vm3418_vm15, %v3355_v2  ;;  %v3325_v3 = vpop.permute.xlu0 %3324  ;;  %v2738_v2 = vor.u32 %v2737_v48, %v5686_v47  ;;  %v2916_v7 = vrot.slane %v2914_v53, 4  ;;  %v5748_v48 = vld [vmem:[%s4641_s22 + $0xb8] sm:$0xf]  ;;  %v3241_v63 = vsel %vm4796_vm6, %v4390_v45, %v3240_v25 }
 0x19a   : > { %3420 = vst.msk [vmem:[#allocation2 + $0x4] sm:$0xf] %vm3418_vm15, %v3325_v3  ;;  %2442 = vrot.lane.b32.xlu1 %v4267_v61, %s4589_s28  ;;  %v2911_v61 = vrot.slane %v2909_v44, 5 }
 0x19b   : > { %2440 = vrot.lane.b32.xlu0 %v4266_v0, %s4589_s28  ;;  %v5696_v0 = vrot.slane %v2923_v42, 5  ;;  %v2739_v38 = vrot.slane %v2738_v2, 4  ;;  %v2920_v18 = vor.u32 %v2919_v8, %v2916_v7  ;;  %v4353_v2 = vld [vmem:[%s4641_s22 + $0x54] sm:$0xe] }
 0x19c   : > { %v3327_v13 = vpop.permute.xlu1 %3326 }
 0x19d   : > { %3421 = vst.msk [vmem:[#allocation2 + $0x8] sm:$0xf] %vm3418_vm15, %v3327_v13  ;;  %v3357_v16 = vpop.permute.xlu0 %3356  ;;  %v2930_v13 = vor.u32 %v2929_v54, %v5696_v0  ;;  %v2921_v30 = vrot.slane %v2920_v18, 4  ;;  %v3303_v54 = vrot.slane %v5748_v48, 5  ;;  %v4391_v18 = vrot.slane %v4353_v2, 9 }
 0x19e   : > { %3436 = vst.msk [vmem:[#allocation2 + $0x44] sm:$0xf] %vm3418_vm15, %v3357_v16  ;;  %2474 = vrot.lane.b32.xlu1 %v4283_v11, %s4589_s28  ;;  %v2912_v11 = vsel %vm4652_vm2, %v2907_v59, %v2911_v61  ;;  %v2902_v16 = vsel %vm4652_vm2, %v2897_v1, %v5671_v22  ;;  %v2744_v22 = vsel %vm4652_vm2, %v2739_v38, %v2743_v12  ;;  %v4188_v59 = vld [vmem:[%s4641_s22 + $0xb4] sm:$0xf]  ;;  %v4398_v1 = vrot.slane %v4374_v46, 9 }
 0x19f   : > { %2472 = vrot.lane.b32.xlu0 %v4282_v14, %s4589_s28  ;;  %v2933_v14 = vshll.u32 %v4331_v6, 16  ;;  %v2931_v23 = vrot.slane %v2930_v13, 4  ;;  %v2926_v44 = vsel %vm4652_vm2, %v2921_v30, %v5696_v0  ;;  %v4379_v0 = vld [vmem:[%s4641_s22 + $0xbc] sm:$0x1]  ;;  %v1846_v38 = vshrl.u32 %v4188_v59, 16 }
 0x1a0   : > { %v3359_v31 = vpop.permute.xlu1 %3358  ;;  %v1849_v12 = vshll.u32 %v4188_v59, 16  ;;  %v3305_v20 = vrot.slane %v3303_v54, 4  ;;  %v4191_v48 = vld [vmem:[%s4641_s22 + $0xc0] sm:$0xf] }
 0x1a1   : > { %3437 = vst.msk [vmem:[#allocation2 + $0x48] sm:$0xf] %vm3418_vm15, %v3359_v31  ;;  %v3329_v35 = vpop.permute.xlu0 %3328  ;;  %v4542_v19 = vld [vmem:[#allocation2] sm:$0xff]   ;;  %v2935_v24 = vrot.slane %v2933_v14, 5  ;;  %v4352_v31 = vld [vmem:[%s4641_s22 + $0x50] sm:$0x1] }
 0x1a2   : > { %3422 = vst.msk [vmem:[#allocation2 + $0xc] sm:$0xf] %vm3418_vm15, %v3329_v35  ;;  %2446 = vrot.lane.b32.xlu1 %v4269_v17, %s4589_s28  ;;  %4467 = vmatprep.mubr.msk.bf16.mxu0 %vm3583_vm0, %v4542_v19  ;;  %v2729_v17 = vrot.slane %v2728_v5, 4  ;;  %v4165_v35 = vld [vmem:[%s4641_s22 + $0x58] sm:$0xf]  ;;  %v3249_v14 = vrot.slane %v3247_v55, 4 }
 0x1a3   : > { %2444 = vrot.lane.b32.xlu0 %v4268_v21, %s4589_s28  ;;  %v4164_v19 = vld [vmem:[%s4641_s22 + $0x54] sm:$0xf]  ;;  %v2936_v36 = vsel %vm4652_vm2, %v2931_v23, %v2935_v24  ;;  %v1663_v42 = vshll.u32 %v4165_v35, 16  ;;  %v1667_v49 = vshrl.u32 %v4165_v35, 16 }
 0x1a4   : > { %v1934_v50 = vpop.permute.xlu1 %1933  ;;  %v2734_v29 = vsel %vm4652_vm2, %v2729_v17, %v5686_v47  ;;  %v1657_v51 = vshll.u32 %v4164_v19, 16  ;;  %v3297_v17 = vsel %vm4796_vm6, %v4398_v1, %v3296_v34  ;;  %v4190_v34 = vld [vmem:[%s4641_s22 + $0xbc] sm:$0x1]  ;;  %v1873_v1 = vshll.u32 %v4191_v48, 16 }
 0x1a5   : > { %2010 = vst.msk [vmem:[#allocation2 + $0x50] sm:$0xf] %vm1989_vm11, %v1934_v50  ;;  %v3361_v56 = vpop.permute.xlu0 %3360  ;;  %v4544_v57 = vld [vmem:[#allocation2 + $0x40] sm:$0xff]   ;;  %v1654_v50 = vshrl.u32 %v4164_v19, 16  ;;  %v5766_v5 = vrot.slane %v1663_v42, 5  ;;  %v1669_v6 = vrot.slane %v1667_v49, 4 }
 0x1a6   : > { %3438 = vst.msk [vmem:[#allocation2 + $0x4c] sm:$0xf] %vm3418_vm15, %v3361_v56  ;;  %2478 = vrot.lane.b32.xlu1 %v4285_v39, %s4589_s28  ;;  %4483 = vmatprep.mubr.msk.bf16.mxu1 %vm3583_vm0, %v4544_v57  ;;  %v3243_v39 = vrot.slane %v4352_v31, 5  ;;  %v4355_v57 = vld [vmem:[%s4641_s22 + $0x5c] sm:$0x1]  ;;  %v1659_v8 = vrot.slane %v1657_v51, 5 }
 0x1a7   : > { %2476 = vrot.lane.b32.xlu0 %v4284_v40, %s4589_s28  ;;  %v4376_v40 = vld [vmem:[%s4641_s22 + $0xb0] sm:$0x1]  ;;  %v1656_v7 = vrot.slane %v1654_v50, 4  ;;  %v1670_v24 = vor.u32 %v1669_v6, %v5766_v5  ;;  %v1848_v31 = vrot.slane %v1846_v38, 4  ;;  %v1865_v50 = vshll.u32 %v4190_v34, 16 }
 0x1a8   : > { %v1938_v3 = vpop.permute.xlu1 %1937  ;;  %v3299_v53 = vrot.slane %v4376_v40, 5  ;;  %v3244_v56 = vsel %vm4796_vm6, %v3242_v37, %v3243_v39  ;;  %v3248_v37 = vsel %vm4796_vm6, %v4391_v18, %v3247_v55  ;;  %v1879_v55 = vshll.u32 %v4192_v41, 16  ;;  %v4214_v34 = vld [vmem:[%s4641_s22 + $0x5c] sm:$0x1] }
 0x1a9   : > { %2012 = vst.msk [vmem:[#allocation2 + $0x58] sm:$0xf] %vm1989_vm11, %v1938_v3  ;;  %v1936_v9 = vpop.permute.xlu0 %1935  ;;  %v4545_v10 = vld [vmem:[#allocation2 + $0x8] sm:$0xff]   ;;  %v1660_v26 = vor.u32 %v1659_v8, %v1656_v7  ;;  %v1671_v46 = vrot.slane %v1670_v24, 4  ;;  %v4213_v24 = vld [vmem:[%s4641_s22 + $0x58] sm:$0xf] }
 0x1aa   : > { %2011 = vst.msk [vmem:[#allocation2 + $0x54] sm:$0xf] %vm1989_vm11, %v1936_v9  ;;  %3003 = vrot.lane.b32.xlu1 %v2720_v58, %s4590_s29  ;;  %4468 = vmatmul.mubr.msk.bf16.vlgmr.msra.gmra.mxu0 %vm3583_vm0, %v4545_v10  ;;  %v4189_v58 = vld [vmem:[%s4641_s22 + $0xb8] sm:$0xf]  ;;  %v4166_v9 = vld [vmem:[%s4641_s22 + $0x5c] sm:$0x1]  ;;  %v3300_v13 = vsel %vm4796_vm6, %v3298_v52, %v3299_v53 }
 0x1ab   : > { %3001 = vrot.lane.b32.xlu0 %v2710_v4, %s4590_s29  ;;  %v4377_v4 = vld [vmem:[%s4641_s22 + $0xb4] sm:$0xe]  ;;  %v1855_v10 = vshll.u32 %v4189_v58, 16  ;;  %v1673_v25 = vshll.u32 %v4166_v9, 16  ;;  %v1661_v42 = vrot.slane %v1660_v26, 4  ;;  %v1881_v8 = vrot.slane %v1879_v55, 5 }
 0x1ac   : > { %v2239_v15 = vpop.permute.xlu1 %2238  ;;  %v4399_v23 = vrot.slane %v4377_v4, 9  ;;  %v1867_v4 = vrot.slane %v1865_v50, 5 }
 0x1ad   : > { %2331 = vst.msk [vmem:[#allocation2 + $0x10] sm:$0xf] %vm2326_vm12, %v2239_v15  ;;  %v1940_v60 = vpop.permute.xlu0 %1939  ;;  %v4546_v21 = vld [vmem:[#allocation2 + $0x48] sm:$0xff]   ;;  %v3250_v15 = vrot.slane %v4355_v57, 5 }
 0x1ae   : > { %2013 = vst.msk [vmem:[#allocation2 + $0x5c] sm:$0xf] %vm1989_vm11, %v1940_v60  ;;  %3035 = vrot.lane.b32.xlu1 %v2912_v11, %s4590_s29  ;;  %4484 = vmatmul.mubr.msk.bf16.vlgmr.msra.gmra.mxu1 %vm3583_vm0, %v4546_v21  ;;  %v1859_v11 = vshrl.u32 %v4189_v58, 16  ;;  %v3306_v60 = vrot.slane %v4379_v0, 5  ;;  %v4168_v21 = vld [vmem:[%s4641_s22 + $0x64] sm:$0xf]  ;;  %v3304_v45 = vsel %vm4796_vm6, %v4399_v23, %v3303_v54  ;;  %v1666_v54 = vsel %vm4652_vm2, %v1661_v42, %v5766_v5 }
 0x1af   : > { %3033 = vrot.lane.b32.xlu0 %v2902_v16, %s4590_s29  ;;  %v3251_v33 = vsel %vm4796_vm6, %v3249_v14, %v3250_v15  ;;  %v1687_v35 = vshll.u32 %v4168_v21, 16  ;;  %v1691_v19 = vshrl.u32 %v4168_v21, 16  ;;  %v4169_v58 = vld [vmem:[%s4641_s22 + $0x68] sm:$0x1]  ;;  %v1875_v14 = vrot.slane %v1873_v1, 5 }
 0x1b0   : > { %v2271_v28 = vpop.permute.xlu1 %2270  ;;  %v1861_v30 = vrot.slane %v1859_v11, 4  ;;  %v1697_v7 = vshll.u32 %v4169_v58, 16  ;;  %v4236_v42 = vld [vmem:[%s4641_s22 + $0xb4] sm:$0xe]  ;;  %v4240_v58 = vld [vmem:[%s4641_s22 + $0xc4] sm:$0xf] }
 0x1b1   : > { %2347 = vst.msk [vmem:[#allocation2 + $0x50] sm:$0xf] %vm2326_vm12, %v2271_v28  ;;  %v2241_v32 = vpop.permute.xlu0 %2240  ;;  %v4167_v28 = vld [vmem:[%s4641_s22 + $0x60] sm:$0xf]  ;;  %v5801_v52 = vrot.slane %v1687_v35, 5  ;;  %v1693_v53 = vrot.slane %v1691_v19, 4 }
 0x1b2   : > { %2332 = vst.msk [vmem:[#allocation2 + $0x14] sm:$0xf] %vm2326_vm12, %v2241_v32  ;;  %3007 = vrot.lane.b32.xlu1 %v2744_v22, %s4590_s29  ;;  %v1851_v32 = vrot.slane %v1849_v12, 5  ;;  %v1678_v39 = vshrl.u32 %v4167_v28, 16  ;;  %v1681_v40 = vshll.u32 %v4167_v28, 16 }
 0x1b3   : > { %3005 = vrot.lane.b32.xlu0 %v2734_v29, %s4590_s29  ;;  %v5782_v29 = vrot.slane %v1855_v10, 5  ;;  %v1694_v6 = vor.u32 %v1693_v53, %v5801_v52  ;;  %v4193_v12 = vld [vmem:[%s4641_s22 + $0xc8] sm:$0x1]  ;;  %v4237_v35 = vld [vmem:[%s4641_s22 + $0xb8] sm:$0xf] }
 0x1b4   : > { %v2243_v43 = vpop.permute.xlu1 %2242  ;;  %v1852_v51 = vor.u32 %v1851_v32, %v1848_v31  ;;  %v1680_v59 = vrot.slane %v1678_v39, 4 }
 0x1b5   : > { %2333 = vst.msk [vmem:[#allocation2 + $0x18] sm:$0xf] %vm2326_vm12, %v2243_v43  ;;  %v2273_v47 = vpop.permute.xlu0 %2272  ;;  %v1862_v49 = vor.u32 %v1861_v30, %v5782_v29  ;;  %v2162_v30 = vrot.slane %v4213_v24, 5  ;;  %v4271_v24 = vld [vmem:[%s4641_s22 + $0x64] sm:$0xf] }
 0x1b6   : > { %2348 = vst.msk [vmem:[#allocation2 + $0x54] sm:$0xf] %vm2326_vm12, %v2273_v47  ;;  %3039 = vrot.lane.b32.xlu1 %v2936_v36, %s4590_s29  ;;  %v1675_v47 = vrot.slane %v1673_v25, 5  ;;  %v1853_v11 = vrot.slane %v1852_v51, 4 }
 0x1b7   : > { %3037 = vrot.lane.b32.xlu0 %v2926_v44, %s4590_s29  ;;  %v3307_v44 = vsel %vm4796_vm6, %v3305_v20, %v3306_v60  ;;  %v1889_v20 = vshll.u32 %v4193_v12, 16  ;;  %v2164_v39 = vrot.slane %v2162_v30, 4 }
 0x1b8   : > { %v2275_v61 = vpop.permute.xlu1 %2274  ;;  %v1676_v0 = vsel %vm4652_vm2, %v1671_v46, %v1675_v47  ;;  %v1858_v21 = vsel %vm4652_vm2, %v1853_v11, %v5782_v29  ;;  %v4238_v46 = vld [vmem:[%s4641_s22 + $0xbc] sm:$0x1]  ;;  %v4216_v47 = vld [vmem:[%s4641_s22 + $0x64] sm:$0xf] }
 0x1b9   : > { %2349 = vst.msk [vmem:[#allocation2 + $0x58] sm:$0xf] %vm2326_vm12, %v2275_v61  ;;  %v2245_v3 = vpop.permute.xlu0 %2244  ;;  %v1683_v61 = vrot.slane %v1681_v40, 5  ;;  %v1891_v29 = vrot.slane %v1889_v20, 5  ;;  %v2165_v40 = vrot.slane %v4214_v34, 5  ;;  %v2221_v51 = vrot.slane %v4238_v46, 5 }
 0x1ba   : > { %2334 = vst.msk [vmem:[#allocation2 + $0x1c] sm:$0xf] %vm2326_vm12, %v2245_v3  ;;  %3340 = vrot.lane.b32.xlu1 %v3244_v56, %s4591_s8  ;;  %v1883_v56 = vshrl.u32 %v4192_v41, 16  ;;  %v1863_v3 = vrot.slane %v1862_v49, 4  ;;  %v2218_v41 = vrot.slane %v4237_v35, 5 }
 0x1bb   : > { %3338 = vrot.lane.b32.xlu0 %v3241_v63, %s4591_s8  ;;  %v1870_v63 = vshrl.u32 %v4191_v48, 16  ;;  %v1684_v38 = vor.u32 %v1683_v61, %v1680_v59  ;;  %v2166_v49 = vsel %vm4796_vm6, %v2164_v39, %v2165_v40  ;;  %v4215_v61 = vld [vmem:[%s4641_s22 + $0x60] sm:$0xe]  ;;  %v4312_v46 = vld [vmem:[%s4641_s22 + $0x70] sm:$0xf] }
 0x1bc   : > { %v2433_v16 = vpop.permute.xlu1 %2432  ;;  %v1885_v9 = vrot.slane %v1883_v56, 4  ;;  %v1868_v5 = vsel %vm4652_vm2, %v1863_v3, %v1867_v4  ;;  %v2220_v50 = vrot.slane %v2218_v41, 4  ;;  %v4256_v56 = vrot.slane %v4236_v42, 9  ;;  %v4273_v42 = vld [vmem:[%s4641_s22 + $0x70] sm:$0xf] }
 0x1bd   : > { %2525 = vst.msk [vmem:[#allocation2 + $0x10] sm:$0xf] %vm2520_vm13, %v2433_v16  ;;  %v2277_v22 = vpop.permute.xlu0 %2276  ;;  %v1695_v16 = vrot.slane %v1694_v6, 4  ;;  %v4249_v4 = vrot.slane %v4215_v61, 9  ;;  %v4241_v6 = vld [vmem:[%s4641_s22 + $0xc8] sm:$0x1] }
 0x1be   : > { %2350 = vst.msk [vmem:[#allocation2 + $0x5c] sm:$0xf] %vm2326_vm12, %v2277_v22  ;;  %3372 = vrot.lane.b32.xlu1 %v3300_v13, %s4591_s8  ;;  %v1872_v13 = vrot.slane %v1870_v63, 4  ;;  %v1886_v18 = vor.u32 %v1885_v9, %v1881_v8  ;;  %v1685_v22 = vrot.slane %v1684_v38, 4  ;;  %v2222_v63 = vsel %vm4796_vm6, %v2220_v50, %v2221_v51  ;;  %v4311_v51 = vld [vmem:[%s4641_s22 + $0x6c] sm:$0xf] }
 0x1bf   : > { %3370 = vrot.lane.b32.xlu0 %v3297_v17, %s4591_s8  ;;  %v1699_v17 = vrot.slane %v1697_v7, 5  ;;  %v2219_v3 = vsel %vm4796_vm6, %v4256_v56, %v2218_v41  ;;  %v2228_v11 = vrot.slane %v4241_v6, 5  ;;  %v4287_v41 = vld [vmem:[%s4641_s22 + $0xc4] sm:$0xf]  ;;  %v2779_v61 = vshll.u32 %v4312_v46, 16 }
 0x1c0   : > { %v2465_v36 = vpop.permute.xlu1 %2464  ;;  %v1876_v23 = vor.u32 %v1875_v14, %v1872_v13  ;;  %v1887_v28 = vrot.slane %v1886_v18, 4  ;;  %v1690_v32 = vsel %vm4652_vm2, %v1685_v22, %v5801_v52  ;;  %v2169_v52 = vrot.slane %v4216_v47, 5  ;;  %v4309_v14 = vld [vmem:[%s4641_s22 + $0x64] sm:$0xf] }
 0x1c1   : > { %2541 = vst.msk [vmem:[#allocation2 + $0x50] sm:$0xf] %vm2520_vm13, %v2465_v36  ;;  %v2435_v43 = vpop.permute.xlu0 %2434  ;;  %v1700_v26 = vsel %vm4652_vm2, %v1695_v16, %v1699_v17  ;;  %v4212_v36 = vld [vmem:[%s4641_s22 + $0x54] sm:$0xe]  ;;  %v2755_v17 = vshll.u32 %v4309_v14, 16  ;;  %v2759_v18 = vshrl.u32 %v4309_v14, 16 }
 0x1c2   : > { %2526 = vst.msk [vmem:[#allocation2 + $0x14] sm:$0xf] %vm2520_vm13, %v2435_v43  ;;  %3344 = vrot.lane.b32.xlu1 %v3251_v33, %s4591_s8  ;;  %v1877_v33 = vrot.slane %v1876_v23, 4  ;;  %v2171_v1 = vrot.slane %v2169_v52, 4  ;;  %v2170_v12 = vsel %vm4796_vm6, %v4249_v4, %v2169_v52  ;;  %v4272_v52 = vld [vmem:[%s4641_s22 + $0x6c] sm:$0xf] }
 0x1c3   : > { %3342 = vrot.lane.b32.xlu0 %v3248_v37, %s4591_s8  ;;  %v1892_v37 = vsel %vm4652_vm2, %v1887_v28, %v1891_v29  ;;  %v4333_v28 = vld [vmem:[%s4641_s22 + $0xc4] sm:$0xf]  ;;  %v4332_v29 = vld [vmem:[%s4641_s22 + $0xc0] sm:$0xf] }
 0x1c4   : > { %v2437_v57 = vpop.permute.xlu1 %2436  ;;  %v2938_v39 = vshrl.u32 %v4332_v29, 16  ;;  %v2941_v40 = vshll.u32 %v4332_v29, 16 }
 0x1c5   : > { %2527 = vst.msk [vmem:[#allocation2 + $0x18] sm:$0xf] %vm2520_vm13, %v2437_v57  ;;  %v2467_v2 = vpop.permute.xlu0 %2466  ;;  %v4217_v57 = vld [vmem:[%s4641_s22 + $0x68] sm:$0x1] }
 0x1c6   : > { %2542 = vst.msk [vmem:[#allocation2 + $0x54] sm:$0xf] %vm2520_vm13, %v2467_v2  ;;  %3376 = vrot.lane.b32.xlu1 %v3307_v44, %s4591_s8  ;;  %v1882_v44 = vsel %vm4652_vm2, %v1877_v33, %v1881_v8  ;;  %v2172_v2 = vrot.slane %v4217_v57, 5  ;;  %v4239_v8 = vld [vmem:[%s4641_s22 + $0xc0] sm:$0xe]  ;;  %v2940_v56 = vrot.slane %v2938_v39, 4 }
 0x1c7   : > { %3374 = vrot.lane.b32.xlu0 %v3304_v45, %s4591_s8  ;;  %v4248_v45 = vrot.slane %v4212_v36, 9  ;;  %v4257_v13 = vrot.slane %v4239_v8, 9  ;;  %v2947_v36 = vshll.u32 %v4333_v28, 16  ;;  %v2943_v57 = vrot.slane %v2941_v40, 5  ;;  %v4289_v8 = vld [vmem:[%s4641_s22 + $0xd0] sm:$0xf] }
 0x1c8   : > { %v2469_v10 = vpop.permute.xlu1 %2468  ;;  %v2173_v9 = vsel %vm4796_vm6, %v2171_v1, %v2172_v2  ;;  %v2770_v2 = vshrl.u32 %v4311_v51, 16 }
 0x1c9   : > { %2543 = vst.msk [vmem:[#allocation2 + $0x58] sm:$0xf] %vm2520_vm13, %v2469_v10  ;;  %v2439_v15 = vpop.permute.xlu0 %2438  ;;  %v2163_v55 = vsel %vm4796_vm6, %v4248_v45, %v2162_v30  ;;  %v4286_v45 = vld [vmem:[%s4641_s22 + $0xc0] sm:$0xf] }
 0x1ca   : > { %2528 = vst.msk [vmem:[#allocation2 + $0x1c] sm:$0xf] %vm2520_vm13, %v2439_v15  ;;  %1919 = vrot.lane.b32.xlu1 %v1676_v0, %s4587_s26  ;;  %v2225_v0 = vrot.slane %v4240_v58, 5 }
 0x1cb   : > { %1917 = vrot.lane.b32.xlu0 %v1666_v54, %s4587_s26 }
 0x1cc   : > { %v2994_v60 = vpop.permute.xlu1 %2993  ;;  %v2227_v10 = vrot.slane %v2225_v0, 4 }
 0x1cd   : > { %3086 = vst.msk [vmem:[#allocation2 + $0x10] sm:$0xf] %vm3081_vm14, %v2994_v60  ;;  %v2471_v25 = vpop.permute.xlu0 %2470  ;;  %v2226_v60 = vsel %vm4796_vm6, %v4257_v13, %v2225_v0  ;;  %v2773_v0 = vshll.u32 %v4311_v51, 16  ;;  %v5928_v13 = vrot.slane %v2779_v61, 5  ;;  %v4381_v61 = vld [vmem:[%s4641_s22 + $0xc4] sm:$0xf] }
 0x1ce   : > { %2544 = vst.msk [vmem:[#allocation2 + $0x5c] sm:$0xf] %vm2520_vm13, %v2471_v25  ;;  %1951 = vrot.lane.b32.xlu1 %v1868_v5, %s4587_s26  ;;  %v4308_v5 = vld [vmem:[%s4641_s22 + $0x60] sm:$0xf]  ;;  %v2229_v16 = vsel %vm4796_vm6, %v2227_v10, %v2228_v11  ;;  %v5892_v25 = vrot.slane %v2755_v17, 5 }
 0x1cf   : > { %1949 = vrot.lane.b32.xlu0 %v1858_v21, %s4587_s26  ;;  %v2746_v22 = vshrl.u32 %v4308_v5, 16  ;;  %v2749_v23 = vshll.u32 %v4308_v5, 16  ;;  %v4313_v17 = vld [vmem:[%s4641_s22 + $0x74] sm:$0x1] }
 0x1d0   : > { %v3026_v31 = vpop.permute.xlu1 %3025 }
 0x1d1   : > { %3102 = vst.msk [vmem:[#allocation2 + $0x50] sm:$0xf] %vm3081_vm14, %v3026_v31  ;;  %v2996_v19 = vpop.permute.xlu0 %2995  ;;  %v4270_v31 = vld [vmem:[%s4641_s22 + $0x60] sm:$0xf]  ;;  %v2748_v34 = vrot.slane %v2746_v22, 4  ;;  %v2751_v35 = vrot.slane %v2749_v23, 5 }
 0x1d2   : > { %3087 = vst.msk [vmem:[#allocation2 + $0x14] sm:$0xf] %vm3081_vm14, %v2996_v19  ;;  %1923 = vrot.lane.b32.xlu1 %v1700_v26, %s4587_s26  ;;  %v2761_v26 = vrot.slane %v2759_v18, 4  ;;  %v4310_v19 = vld [vmem:[%s4641_s22 + $0x68] sm:$0x1]  ;;  %v2772_v18 = vrot.slane %v2770_v2, 4 }
 0x1d3   : > { %1921 = vrot.lane.b32.xlu0 %v1690_v32, %s4587_s26  ;;  %v2752_v50 = vor.u32 %v2751_v35, %v2748_v34 }
 0x1d4   : > { %v2998_v43 = vpop.permute.xlu1 %2997 }
 0x1d5   : > { %3088 = vst.msk [vmem:[#allocation2 + $0x18] sm:$0xf] %vm3081_vm14, %v2998_v43  ;;  %v3028_v48 = vpop.permute.xlu0 %3027  ;;  %v2762_v43 = vor.u32 %v2761_v26, %v5892_v25 }
 0x1d6   : > { %3103 = vst.msk [vmem:[#allocation2 + $0x54] sm:$0xf] %vm3081_vm14, %v3028_v48  ;;  %1955 = vrot.lane.b32.xlu1 %v1892_v37, %s4587_s26  ;;  %v2951_v37 = vshrl.u32 %v4333_v28, 16 }
 0x1d7   : > { %1953 = vrot.lane.b32.xlu0 %v1882_v44, %s4587_s26  ;;  %v2763_v58 = vrot.slane %v2762_v43, 4 }
 0x1d8   : > { %v3030_v53 = vpop.permute.xlu1 %3029 }
 0x1d9   : > { %3104 = vst.msk [vmem:[#allocation2 + $0x58] sm:$0xf] %vm3081_vm14, %v3030_v53  ;;  %v3000_v59 = vpop.permute.xlu0 %2999  ;;  %v5913_v53 = vrot.slane %v2947_v36, 5  ;;  %v4337_v36 = vld [vmem:[%s4641_s22 + $0xd4] sm:$0x1] }
 0x1da   : > { %3089 = vst.msk [vmem:[#allocation2 + $0x1c] sm:$0xf] %vm3081_vm14, %v3000_v59  ;;  %2256 = vrot.lane.b32.xlu1 %v2166_v49, %s4588_s27  ;;  %v2765_v49 = vshll.u32 %v4310_v19, 16  ;;  %v4334_v59 = vld [vmem:[%s4641_s22 + $0xc8] sm:$0x1] }
 0x1db   : > { %2254 = vrot.lane.b32.xlu0 %v2163_v55, %s4588_s27  ;;  %v2953_v55 = vrot.slane %v2951_v37, 4  ;;  %v2957_v11 = vshll.u32 %v4334_v59, 16  ;;  %v4358_v59 = vld [vmem:[%s4641_s22 + $0x68] sm:$0x1] }
 0x1dc   : > { %v3331_v54 = vpop.permute.xlu1 %3330  ;;  %v2767_v6 = vrot.slane %v2765_v49, 5  ;;  %v4357_v49 = vld [vmem:[%s4641_s22 + $0x64] sm:$0xf] }
 0x1dd   : > { %3423 = vst.msk [vmem:[#allocation2 + $0x10] sm:$0xf] %vm3418_vm15, %v3331_v54  ;;  %v3032_v7 = vpop.permute.xlu0 %3031  ;;  %v4336_v54 = vld [vmem:[%s4641_s22 + $0xd0] sm:$0xf]  ;;  %v2954_v10 = vor.u32 %v2953_v55, %v5913_v53  ;;  %v2959_v29 = vrot.slane %v2957_v11, 5  ;;  %v3254_v55 = vrot.slane %v4357_v49, 5 }
 0x1de   : > { %3105 = vst.msk [vmem:[#allocation2 + $0x5c] sm:$0xf] %vm3081_vm14, %v3032_v7  ;;  %2288 = vrot.lane.b32.xlu1 %v2222_v63, %s4588_s27  ;;  %v2783_v63 = vshrl.u32 %v4312_v46, 16  ;;  %v4335_v7 = vld [vmem:[%s4641_s22 + $0xcc] sm:$0xf]  ;;  %v2975_v5 = vshrl.u32 %v4336_v54, 16 }
 0x1df   : > { %2286 = vrot.lane.b32.xlu0 %v2219_v3, %s4588_s27  ;;  %v2955_v28 = vrot.slane %v2954_v10, 4  ;;  %v4380_v11 = vld [vmem:[%s4641_s22 + $0xc0] sm:$0xe] }
 0x1e0   : > { %v3363_v38 = vpop.permute.xlu1 %3362  ;;  %v2785_v14 = vrot.slane %v2783_v63, 4 }
 0x1e1   : > { %3439 = vst.msk [vmem:[#allocation2 + $0x50] sm:$0xf] %vm3418_vm15, %v3363_v38  ;;  %v3333_v15 = vpop.permute.xlu0 %3332  ;;  %v2944_v38 = vor.u32 %v2943_v57, %v2940_v56  ;;  %v2960_v40 = vsel %vm4652_vm2, %v2955_v28, %v2959_v29  ;;  %v4385_v29 = vld [vmem:[%s4641_s22 + $0xd4] sm:$0x1] }
 0x1e2   : > { %3424 = vst.msk [vmem:[#allocation2 + $0x14] sm:$0xf] %vm3418_vm15, %v3333_v15  ;;  %2260 = vrot.lane.b32.xlu1 %v2173_v9, %s4588_s27  ;;  %v2753_v9 = vrot.slane %v2752_v50, 4  ;;  %v2971_v15 = vshll.u32 %v4336_v54, 16  ;;  %v3257_v54 = vrot.slane %v4358_v59, 5 }
 0x1e3   : > { %2258 = vrot.lane.b32.xlu0 %v2170_v12, %s4588_s27  ;;  %v4288_v12 = vld [vmem:[%s4641_s22 + $0xcc] sm:$0xf]  ;;  %v2945_v35 = vrot.slane %v2944_v38, 4 }
 0x1e4   : > { %v3335_v20 = vpop.permute.xlu1 %3334  ;;  %v2758_v26 = vsel %vm4652_vm2, %v2753_v9, %v5892_v25  ;;  %v4360_v9 = vld [vmem:[%s4641_s22 + $0x70] sm:$0xf] }
 0x1e5   : > { %3425 = vst.msk [vmem:[#allocation2 + $0x18] sm:$0xf] %vm3418_vm15, %v3335_v20  ;;  %v3365_v21 = vpop.permute.xlu0 %3364  ;;  %v2775_v20 = vrot.slane %v2773_v0, 5  ;;  %v3256_v0 = vrot.slane %v3254_v55, 4 }
 0x1e6   : > { %3440 = vst.msk [vmem:[#allocation2 + $0x54] sm:$0xf] %vm3418_vm15, %v3365_v21  ;;  %2292 = vrot.lane.b32.xlu1 %v2229_v16, %s4588_s27  ;;  %v2965_v21 = vshll.u32 %v4335_v7, 16 }
 0x1e7   : > { %2290 = vrot.lane.b32.xlu0 %v2226_v60, %s4588_s27  ;;  %v2962_v60 = vshrl.u32 %v4335_v7, 16  ;;  %v2776_v19 = vor.u32 %v2775_v20, %v2772_v18  ;;  %v3258_v27 = vsel %vm4796_vm6, %v3256_v0, %v3257_v54  ;;  %v4359_v20 = vld [vmem:[%s4641_s22 + $0x6c] sm:$0xe] }
 0x1e8   : > { %v3367_v30 = vpop.permute.xlu1 %3366  ;;  %v2967_v39 = vrot.slane %v2965_v21, 5  ;;  %v4393_v28 = vrot.slane %v4359_v20, 9 }
 0x1e9   : > { %3441 = vst.msk [vmem:[#allocation2 + $0x58] sm:$0xf] %vm3418_vm15, %v3367_v30  ;;  %v3337_v32 = vpop.permute.xlu0 %3336  ;;  %v4547_v33 = vld [vmem:[#allocation2 + $0x10] sm:$0xff]   ;;  %v2786_v30 = vor.u32 %v2785_v14, %v5928_v13  ;;  %v2964_v37 = vrot.slane %v2962_v60, 4 }
 0x1ea   : > { %3426 = vst.msk [vmem:[#allocation2 + $0x1c] sm:$0xf] %vm3418_vm15, %v3337_v32  ;;  %2450 = vrot.lane.b32.xlu1 %v4271_v24, %s4589_s28  ;;  %4471 = vmatprep.mubr.msk.bf16.mxu0 %vm3583_vm0, %v4547_v33  ;;  %v2768_v24 = vsel %vm4652_vm2, %v2763_v58, %v2767_v6  ;;  %v2973_v32 = vrot.slane %v2971_v15, 5  ;;  %v2977_v33 = vrot.slane %v2975_v5, 4  ;;  %v4400_v5 = vrot.slane %v4380_v11, 9 }
 0x1eb   : > { %2448 = vrot.lane.b32.xlu0 %v4270_v31, %s4589_s28  ;;  %v2789_v31 = vshll.u32 %v4313_v17, 16  ;;  %v4384_v17 = vld [vmem:[%s4641_s22 + $0xd0] sm:$0xf] }
 0x1ec   : > { %v1912_v44 = vpop.permute.xlu1 %1911 }
 0x1ed   : > { %1999 = vst.msk [vmem:[#allocation2 + $0x24] sm:$0xf] %vm1989_vm11, %v1912_v44  ;;  %v3369_v47 = vpop.permute.xlu0 %3368  ;;  %v4548_v48 = vld [vmem:[#allocation2 + $0x50] sm:$0xff]   ;;  %v2791_v43 = vrot.slane %v2789_v31, 5  ;;  %v2978_v44 = vor.u32 %v2977_v33, %v2973_v32  ;;  %v4383_v31 = vld [vmem:[%s4641_s22 + $0xcc] sm:$0xe] }
 0x1ee   : > { %3442 = vst.msk [vmem:[#allocation2 + $0x5c] sm:$0xf] %vm3418_vm15, %v3369_v47  ;;  %2482 = vrot.lane.b32.xlu1 %v4287_v41, %s4589_s28  ;;  %4487 = vmatprep.mubr.msk.bf16.mxu1 %vm3583_vm0, %v4548_v48  ;;  %v2787_v41 = vrot.slane %v2786_v30, 4  ;;  %v2950_v47 = vsel %vm4652_vm2, %v2945_v35, %v5913_v53  ;;  %v2777_v48 = vrot.slane %v2776_v19, 4 }
 0x1ef   : > { %2480 = vrot.lane.b32.xlu0 %v4286_v45, %s4589_s28  ;;  %v2981_v45 = vshll.u32 %v4337_v36, 16  ;;  %v4401_v36 = vrot.slane %v4383_v31, 9 }
 0x1f0   : > { %v1944_v1 = vpop.permute.xlu1 %1943  ;;  %v2792_v51 = vsel %vm4652_vm2, %v2787_v41, %v2791_v43  ;;  %v2782_v57 = vsel %vm4652_vm2, %v2777_v48, %v5928_v13  ;;  %v3261_v13 = vrot.slane %v4360_v9, 5 }
 0x1f1   : > { %2015 = vst.msk [vmem:[#allocation2 + $0x64] sm:$0xf] %vm1989_vm11, %v1944_v1  ;;  %v1942_v3 = vpop.permute.xlu0 %1941  ;;  %v4549_v4 = vld [vmem:[#allocation2 + $0x18] sm:$0xff]   ;;  %v2983_v53 = vrot.slane %v2981_v45, 5  ;;  %v4356_v1 = vld [vmem:[%s4641_s22 + $0x60] sm:$0xe] }
 0x1f2   : > { %2014 = vst.msk [vmem:[#allocation2 + $0x60] sm:$0xf] %vm1989_vm11, %v1942_v3  ;;  %2454 = vrot.lane.b32.xlu1 %v4273_v42, %s4589_s28  ;;  %4472 = vmatmul.mubr.msk.bf16.gmra.mxu0 %vm3583_vm0, %v4549_v4  ;;  %v2968_v42 = vor.u32 %v2967_v39, %v2964_v37  ;;  %v3310_v3 = vrot.slane %v4381_v61, 5  ;;  %v4392_v7 = vrot.slane %v4356_v1, 9  ;;  %v3263_v21 = vrot.slane %v3261_v13, 4 }
 0x1f3   : > { %2452 = vrot.lane.b32.xlu0 %v4272_v52, %s4589_s28  ;;  %v2979_v52 = vrot.slane %v2978_v44, 4  ;;  %v3262_v19 = vsel %vm4796_vm6, %v4393_v28, %v3261_v13 }
 0x1f4   : > { %v1916_v16 = vpop.permute.xlu1 %1915  ;;  %v2969_v58 = vrot.slane %v2968_v42, 4  ;;  %v3312_v38 = vrot.slane %v3310_v3, 4  ;;  %v3255_v15 = vsel %vm4796_vm6, %v4392_v7, %v3254_v55 }
 0x1f5   : > { %2001 = vst.msk [vmem:[#allocation2 + $0x2c] sm:$0xf] %vm1989_vm11, %v1916_v16  ;;  %v1914_v22 = vpop.permute.xlu0 %1913  ;;  %v4550_v23 = vld [vmem:[#allocation2 + $0x58] sm:$0xff]   ;;  %v2984_v2 = vsel %vm4652_vm2, %v2979_v52, %v2983_v53  ;;  %v4361_v16 = vld [vmem:[%s4641_s22 + $0x74] sm:$0x1] }
 0x1f6   : > { %2000 = vst.msk [vmem:[#allocation2 + $0x28] sm:$0xf] %vm1989_vm11, %v1914_v22  ;;  %2486 = vrot.lane.b32.xlu1 %v4289_v8, %s4589_s28  ;;  %4488 = vmatmul.mubr.msk.bf16.gmra.mxu1 %vm3583_vm0, %v4550_v23  ;;  %v2974_v6 = vsel %vm4652_vm2, %v2969_v58, %v2973_v32  ;;  %v4382_v8 = vld [vmem:[%s4641_s22 + $0xc8] sm:$0x1]  ;;  %v3264_v22 = vrot.slane %v4361_v16, 5  ;;  %v3317_v23 = vrot.slane %v4384_v17, 5  ;;  %s6082_s22 = scalar_lea.vmem %s6208_s4, %s4441_s19 }
 0x1f7   : > { %2484 = vrot.lane.b32.xlu0 %v4288_v12, %s4589_s28  ;;  %v3313_v12 = vrot.slane %v4382_v8, 5 }
 0x1f8   : > { %v1948_v34 = vpop.permute.xlu1 %1947  ;;  %v3265_v32 = vsel %vm4796_vm6, %v3263_v21, %v3264_v22  ;;  %v3319_v33 = vrot.slane %v3317_v23, 4 }
 0x1f9   : > { %2017 = vst.msk [vmem:[#allocation2 + $0x6c] sm:$0xf] %vm1989_vm11, %v1948_v34  ;;  %v1946_v25 = vpop.permute.xlu0 %1945  ;;  %v3314_v60 = vsel %vm4796_vm6, %v3312_v38, %v3313_v12  ;;  %v3320_v34 = vrot.slane %v4385_v29, 5 }
 0x1fa   : > { %2016 = vst.msk [vmem:[#allocation2 + $0x68] sm:$0xf] %vm1989_vm11, %v1946_v25  ;;  %3011 = vrot.lane.b32.xlu1 %v2768_v24, %s4590_s29 }
 0x1fb   : > { %3009 = vrot.lane.b32.xlu0 %v2758_v26, %s4590_s29  ;;  %v3311_v26 = vsel %vm4796_vm6, %v4400_v5, %v3310_v3  ;;  %v3321_v39 = vsel %vm4796_vm6, %v3319_v33, %v3320_v34 }
 0x1fc   : > { %v2249_v46 = vpop.permute.xlu1 %2248 }
 0x1fd   : > { %2336 = vst.msk [vmem:[#allocation2 + $0x24] sm:$0xf] %vm2326_vm12, %v2249_v46  ;;  %v2247_v50 = vpop.permute.xlu0 %2246 }
 0x1fe   : > { %2335 = vst.msk [vmem:[#allocation2 + $0x20] sm:$0xf] %vm2326_vm12, %v2247_v50  ;;  %3043 = vrot.lane.b32.xlu1 %v2960_v40, %s4590_s29  ;;  %v3318_v40 = vsel %vm4796_vm6, %v4401_v36, %v3317_v23  ;;  %v6065_v23 = vld [vmem:[%s6206_s2] ss:$0 sm:$0xff] }
 0x1ff   : > { %3041 = vrot.lane.b32.xlu0 %v2950_v47, %s4590_s29 }
 0x200   : > { %v2281_v56 = vpop.permute.xlu1 %2280 }
 0x201   : > { %2352 = vst.msk [vmem:[#allocation2 + $0x64] sm:$0xf] %vm2326_vm12, %v2281_v56  ;;  %v2279_v63 = vpop.permute.xlu0 %2278 }
 0x202   : > { %2351 = vst.msk [vmem:[#allocation2 + $0x60] sm:$0xf] %vm2326_vm12, %v2279_v63  ;;  %3015 = vrot.lane.b32.xlu1 %v2792_v51, %s4590_s29 }
 0x203   : > { %3013 = vrot.lane.b32.xlu0 %v2782_v57, %s4590_s29 }
 0x204   : > { %v2253_v4 = vpop.permute.xlu1 %2252 }
 0x205   : > { %2338 = vst.msk [vmem:[#allocation2 + $0x2c] sm:$0xf] %vm2326_vm12, %v2253_v4  ;;  %v2251_v10 = vpop.permute.xlu0 %2250 }
 0x206   : > { %2337 = vst.msk [vmem:[#allocation2 + $0x28] sm:$0xf] %vm2326_vm12, %v2251_v10  ;;  %3047 = vrot.lane.b32.xlu1 %v2984_v2, %s4590_s29 }
 0x207   : > { %3045 = vrot.lane.b32.xlu0 %v2974_v6, %s4590_s29 }
 0x208   : > { %v2285_v14 = vpop.permute.xlu1 %2284 }
 0x209   : > { %2354 = vst.msk [vmem:[#allocation2 + $0x6c] sm:$0xf] %vm2326_vm12, %v2285_v14  ;;  %v2283_v18 = vpop.permute.xlu0 %2282 }
 0x20a   : > { %2353 = vst.msk [vmem:[#allocation2 + $0x68] sm:$0xf] %vm2326_vm12, %v2283_v18  ;;  %3348 = vrot.lane.b32.xlu1 %v3258_v27, %s4591_s8 }
 0x20b   : > { %3346 = vrot.lane.b32.xlu0 %v3255_v15, %s4591_s8 }
 0x20c   : > { %v2443_v24 = vpop.permute.xlu1 %2442 }
 0x20d   : > { %2530 = vst.msk [vmem:[#allocation2 + $0x24] sm:$0xf] %vm2520_vm13, %v2443_v24  ;;  %v2441_v30 = vpop.permute.xlu0 %2440 }
 0x20e   : > { %2529 = vst.msk [vmem:[#allocation2 + $0x20] sm:$0xf] %vm2520_vm13, %v2441_v30  ;;  %3380 = vrot.lane.b32.xlu1 %v3314_v60, %s4591_s8 }
 0x20f   : > { %3378 = vrot.lane.b32.xlu0 %v3311_v26, %s4591_s8  ;;  %v6071_v26 = vld [vmem:[%s6207_s3] ss:$0 sm:$0xff] }
 0x210   : > { %v2475_v35 = vpop.permute.xlu1 %2474 }
 0x211   : > { %2546 = vst.msk [vmem:[#allocation2 + $0x64] sm:$0xf] %vm2520_vm13, %v2475_v35  ;;  %v2473_v37 = vpop.permute.xlu0 %2472 }
 0x212   : > { %2545 = vst.msk [vmem:[#allocation2 + $0x60] sm:$0xf] %vm2520_vm13, %v2473_v37  ;;  %3352 = vrot.lane.b32.xlu1 %v3265_v32, %s4591_s8 }
 0x213   : > { %3350 = vrot.lane.b32.xlu0 %v3262_v19, %s4591_s8 }
 0x214   : > { %v2447_v25 = vpop.permute.xlu1 %2446 }
 0x215   : > { %2532 = vst.msk [vmem:[#allocation2 + $0x2c] sm:$0xf] %vm2520_vm13, %v2447_v25  ;;  %v2445_v41 = vpop.permute.xlu0 %2444 }
 0x216   : > { %2531 = vst.msk [vmem:[#allocation2 + $0x28] sm:$0xf] %vm2520_vm13, %v2445_v41  ;;  %3384 = vrot.lane.b32.xlu1 %v3321_v39, %s4591_s8 }
 0x217   : > { %3382 = vrot.lane.b32.xlu0 %v3318_v40, %s4591_s8 }
 0x218   : > { %v2479_v43 = vpop.permute.xlu1 %2478 }
 0x219   : > { %2548 = vst.msk [vmem:[#allocation2 + $0x6c] sm:$0xf] %vm2520_vm13, %v2479_v43  ;;  %v2477_v44 = vpop.permute.xlu0 %2476 }
 0x21a   : > { %2547 = vst.msk [vmem:[#allocation2 + $0x68] sm:$0xf] %vm2520_vm13, %v2477_v44 }
 0x21c   : > { %v3004_v45 = vpop.permute.xlu1 %3003 }
 0x21d   : > { %3091 = vst.msk [vmem:[#allocation2 + $0x24] sm:$0xf] %vm3081_vm14, %v3004_v45  ;;  %v3002_v62 = vpop.permute.xlu0 %3001 }
 0x21e   : > { %3090 = vst.msk [vmem:[#allocation2 + $0x20] sm:$0xf] %vm3081_vm14, %v3002_v62 }
 0x220   : > { %v3036_v46 = vpop.permute.xlu1 %3035 }
 0x221   : > { %3107 = vst.msk [vmem:[#allocation2 + $0x64] sm:$0xf] %vm3081_vm14, %v3036_v46  ;;  %v3034_v47 = vpop.permute.xlu0 %3033 }
 0x222   : > { %3106 = vst.msk [vmem:[#allocation2 + $0x60] sm:$0xf] %vm3081_vm14, %v3034_v47 }
 0x224   : > { %v3008_v48 = vpop.permute.xlu1 %3007 }
 0x225   : > { %3093 = vst.msk [vmem:[#allocation2 + $0x2c] sm:$0xf] %vm3081_vm14, %v3008_v48  ;;  %v3006_v42 = vpop.permute.xlu0 %3005 }
 0x226   : > { %3092 = vst.msk [vmem:[#allocation2 + $0x28] sm:$0xf] %vm3081_vm14, %v3006_v42 }
 0x228   : > { %v3040_v49 = vpop.permute.xlu1 %3039 }
 0x229   : > { %3109 = vst.msk [vmem:[#allocation2 + $0x6c] sm:$0xf] %vm3081_vm14, %v3040_v49  ;;  %v3038_v50 = vpop.permute.xlu0 %3037 }
 0x22a   : > { %3108 = vst.msk [vmem:[#allocation2 + $0x68] sm:$0xf] %vm3081_vm14, %v3038_v50 }
 0x22c   : > { %v3341_v51 = vpop.permute.xlu1 %3340 }
 0x22d   : > { %3428 = vst.msk [vmem:[#allocation2 + $0x24] sm:$0xf] %vm3418_vm15, %v3341_v51  ;;  %v3339_v52 = vpop.permute.xlu0 %3338 }
 0x22e   : > { %3427 = vst.msk [vmem:[#allocation2 + $0x20] sm:$0xf] %vm3418_vm15, %v3339_v52 }
 0x230   : > { %v3373_v53 = vpop.permute.xlu1 %3372 }
 0x231   : > { %3444 = vst.msk [vmem:[#allocation2 + $0x64] sm:$0xf] %vm3418_vm15, %v3373_v53  ;;  %v3371_v55 = vpop.permute.xlu0 %3370 }
 0x232   : > { %3443 = vst.msk [vmem:[#allocation2 + $0x60] sm:$0xf] %vm3418_vm15, %v3371_v55 }
 0x234   : > { %v3345_v56 = vpop.permute.xlu1 %3344 }
 0x235   : > { %3430 = vst.msk [vmem:[#allocation2 + $0x2c] sm:$0xf] %vm3418_vm15, %v3345_v56  ;;  %v3343_v57 = vpop.permute.xlu0 %3342  ;;  %v4551_v58 = vld [vmem:[#allocation2 + $0x20] sm:$0xff]  }
 0x236   : > { %3429 = vst.msk [vmem:[#allocation2 + $0x28] sm:$0xf] %vm3418_vm15, %v3343_v57  ;;  %4475 = vmatprep.mubr.msk.bf16.mxu0 %vm3583_vm0, %v4551_v58 }
 0x238   : > { %v3377_v59 = vpop.permute.xlu1 %3376 }
 0x239   : > { %3446 = vst.msk [vmem:[#allocation2 + $0x6c] sm:$0xf] %vm3418_vm15, %v3377_v59  ;;  %v3375_v61 = vpop.permute.xlu0 %3374  ;;  %v4552_v63 = vld [vmem:[#allocation2 + $0x60] sm:$0xff]  }
 0x23a   : > { %3445 = vst.msk [vmem:[#allocation2 + $0x68] sm:$0xf] %vm3418_vm15, %v3375_v61  ;;  %4491 = vmatprep.mubr.msk.bf16.mxu1 %vm3583_vm0, %v4552_v63 }
 0x23c   : > { %v1920_v1 = vpop.permute.xlu1 %1919 }
 0x23d   : > { %2003 = vst.msk [vmem:[#allocation2 + $0x34] sm:$0xf] %vm1989_vm11, %v1920_v1  ;;  %v1918_v2 = vpop.permute.xlu0 %1917  ;;  %v4553_v0 = vld [vmem:[#allocation2 + $0x28] sm:$0xff]  }
 0x23e   : > { %2002 = vst.msk [vmem:[#allocation2 + $0x30] sm:$0xf] %vm1989_vm11, %v1918_v2  ;;  %4476 = vmatmul.mubr.msk.bf16.gmra.mxu0 %vm3583_vm0, %v4553_v0 }
 0x240   : > { %v1952_v54 = vpop.permute.xlu1 %1951 }
 0x241   : > { %2019 = vst.msk [vmem:[#allocation2 + $0x74] sm:$0xf] %vm1989_vm11, %v1952_v54  ;;  %v1950_v3 = vpop.permute.xlu0 %1949  ;;  %v4554_v4 = vld [vmem:[#allocation2 + $0x68] sm:$0xff]  }
 0x242   : > { %2018 = vst.msk [vmem:[#allocation2 + $0x70] sm:$0xf] %vm1989_vm11, %v1950_v3  ;;  %4492 = vmatmul.mubr.msk.bf16.gmra.mxu1 %vm3583_vm0, %v4554_v4 }
 0x244   : > { %v1924_v6 = vpop.permute.xlu1 %1923 }
 0x245   : > { %2005 = vst.msk [vmem:[#allocation2 + $0x3c] sm:$0xf] %vm1989_vm11, %v1924_v6  ;;  %v1922_v7 = vpop.permute.xlu0 %1921 }
 0x246   : > { %2004 = vst.msk [vmem:[#allocation2 + $0x38] sm:$0xf] %vm1989_vm11, %v1922_v7 }
 0x248   : > { %v1956_v8 = vpop.permute.xlu1 %1955 }
 0x249   : > { %2021 = vst.msk [vmem:[#allocation2 + $0x7c] sm:$0xf] %vm1989_vm11, %v1956_v8  ;;  %v1954_v9 = vpop.permute.xlu0 %1953 }
 0x24a   : > { %2020 = vst.msk [vmem:[#allocation2 + $0x78] sm:$0xf] %vm1989_vm11, %v1954_v9 }
 0x24c   : > { %v2257_v10 = vpop.permute.xlu1 %2256 }
 0x24d   : > { %2340 = vst.msk [vmem:[#allocation2 + $0x34] sm:$0xf] %vm2326_vm12, %v2257_v10  ;;  %v2255_v11 = vpop.permute.xlu0 %2254 }
 0x24e   : > { %2339 = vst.msk [vmem:[#allocation2 + $0x30] sm:$0xf] %vm2326_vm12, %v2255_v11 }
 0x250   : > { %v2289_v27 = vpop.permute.xlu1 %2288 }
 0x251   : > { %2356 = vst.msk [vmem:[#allocation2 + $0x74] sm:$0xf] %vm2326_vm12, %v2289_v27  ;;  %v2287_v38 = vpop.permute.xlu0 %2286 }
 0x252   : > { %2355 = vst.msk [vmem:[#allocation2 + $0x70] sm:$0xf] %vm2326_vm12, %v2287_v38 }
 0x254   : > { %v2261_v12 = vpop.permute.xlu1 %2260 }
 0x255   : > { %2342 = vst.msk [vmem:[#allocation2 + $0x3c] sm:$0xf] %vm2326_vm12, %v2261_v12  ;;  %v2259_v13 = vpop.permute.xlu0 %2258 }
 0x256   : > { %2341 = vst.msk [vmem:[#allocation2 + $0x38] sm:$0xf] %vm2326_vm12, %v2259_v13 }
 0x258   : > { %v2293_v14 = vpop.permute.xlu1 %2292 }
 0x259   : > { %2358 = vst.msk [vmem:[#allocation2 + $0x7c] sm:$0xf] %vm2326_vm12, %v2293_v14  ;;  %v2291_v15 = vpop.permute.xlu0 %2290 }
 0x25a   : > { %2357 = vst.msk [vmem:[#allocation2 + $0x78] sm:$0xf] %vm2326_vm12, %v2291_v15 }
 0x25c   : > { %v2451_v5 = vpop.permute.xlu1 %2450 }
 0x25d   : > { %2534 = vst.msk [vmem:[#allocation2 + $0x34] sm:$0xf] %vm2520_vm13, %v2451_v5  ;;  %v2449_v16 = vpop.permute.xlu0 %2448 }
 0x25e   : > { %2533 = vst.msk [vmem:[#allocation2 + $0x30] sm:$0xf] %vm2520_vm13, %v2449_v16 }
 0x260   : > { %v2483_v17 = vpop.permute.xlu1 %2482 }
 0x261   : > { %2550 = vst.msk [vmem:[#allocation2 + $0x74] sm:$0xf] %vm2520_vm13, %v2483_v17  ;;  %v2481_v18 = vpop.permute.xlu0 %2480 }
 0x262   : > { %2549 = vst.msk [vmem:[#allocation2 + $0x70] sm:$0xf] %vm2520_vm13, %v2481_v18 }
 0x264   : > { %v2455_v20 = vpop.permute.xlu1 %2454 }
 0x265   : > { %2536 = vst.msk [vmem:[#allocation2 + $0x3c] sm:$0xf] %vm2520_vm13, %v2455_v20  ;;  %v2453_v60 = vpop.permute.xlu0 %2452 }
 0x266   : > { %2535 = vst.msk [vmem:[#allocation2 + $0x38] sm:$0xf] %vm2520_vm13, %v2453_v60 }
 0x268   : > { %v2487_v21 = vpop.permute.xlu1 %2486 }
 0x269   : > { %2552 = vst.msk [vmem:[#allocation2 + $0x7c] sm:$0xf] %vm2520_vm13, %v2487_v21  ;;  %v2485_v22 = vpop.permute.xlu0 %2484 }
 0x26a   : > { %2551 = vst.msk [vmem:[#allocation2 + $0x78] sm:$0xf] %vm2520_vm13, %v2485_v22  ;;  %v4469_v24 = vpop.f32.mrf.mxu0 }
 0x26b   : > { %v3806_v28 = vmul.f32 %v4469_v24, %v6065_v23 }
 0x26c   : > { %v3012_v29 = vpop.permute.xlu1 %3011  ;;  %v3670_v31 = vpop.f32.mrf.mxu0 }
 0x26d   : > { %3095 = vst.msk [vmem:[#allocation2 + $0x34] sm:$0xf] %vm3081_vm14, %v3012_v29  ;;  %v3010_v30 = vpop.permute.xlu0 %3009  ;;  %v3845_v32 = vadd.f32 %v6071_v26, %v3806_v28  ;;  %v3804_v33 = vmul.f32 %v6065_v23, %v3670_v31 }
 0x26e   : > { %3094 = vst.msk [vmem:[#allocation2 + $0x30] sm:$0xf] %vm3081_vm14, %v3010_v30  ;;  %v4470_v34 = vpop.f32.mrf.mxu0  ;;  %v4485_v35 = vpop.f32.mrf.mxu1 }
 0x26f   : > { %v3877_v19 = vmax.f32 %v3845_v32, 0.0  ;;  %v3843_v36 = vadd.f32 %v6071_v26, %v3804_v33  ;;  %v3807_v37 = vmul.f32 %v4470_v34, %v6065_v23  ;;  %v3822_v39 = vmul.f32 %v4485_v35, %v6065_v23 }
 0x270   : > { %v3044_v25 = vpop.permute.xlu1 %3043  ;;  %v3673_v41 = vpop.f32.mrf.mxu0 }
 0x271   : > { %3111 = vst.msk [vmem:[#allocation2 + $0x74] sm:$0xf] %vm3081_vm14, %v3044_v25  ;;  %v3042_v40 = vpop.permute.xlu0 %3041  ;;  %3909 = vst [vmem:[%s6082_s22 + $0x10] sm:$0xff] %v3877_v19  ;;  %v3875_v43 = vmax.f32 %v3843_v36, 0.0  ;;  %v3846_v44 = vadd.f32 %v6071_v26, %v3807_v37  ;;  %v3861_v45 = vadd.f32 %v6071_v26, %v3822_v39  ;;  %v3805_v62 = vmul.f32 %v6065_v23, %v3673_v41  ;;  %v3734_v46 = vpop.f32.mrf.mxu1 }
 0x272   : > { %3110 = vst.msk [vmem:[#allocation2 + $0x70] sm:$0xf] %vm3081_vm14, %v3042_v40  ;;  %v3820_v47 = vmul.f32 %v6065_v23, %v3734_v46 }
 0x273   : > { %3907 = vst [vmem:[%s6082_s22] sm:$0xff] %v3875_v43  ;;  %v3878_v48 = vmax.f32 %v3846_v44, 0.0  ;;  %v3893_v42 = vmax.f32 %v3861_v45, 0.0  ;;  %v3844_v49 = vadd.f32 %v6071_v26, %v3805_v62  ;;  %v4486_v50 = vpop.f32.mrf.mxu1 }
 0x274   : > { %v3016_v51 = vpop.permute.xlu1 %3015  ;;  %v3859_v52 = vadd.f32 %v6071_v26, %v3820_v47  ;;  %v3823_v53 = vmul.f32 %v4486_v50, %v6065_v23 }
 0x275   : > { %3097 = vst.msk [vmem:[#allocation2 + $0x3c] sm:$0xf] %vm3081_vm14, %v3016_v51  ;;  %v3014_v55 = vpop.permute.xlu0 %3013  ;;  %3910 = vst [vmem:[%s6082_s22 + $0x18] sm:$0xff] %v3878_v48  ;;  %v3876_v56 = vmax.f32 %v3844_v49, 0.0  ;;  %v3737_v57 = vpop.f32.mrf.mxu1 }
 0x276   : > { %3925 = vst [vmem:[%s6082_s22 + $0x90] sm:$0xff] %v3893_v42  ;;  %3096 = vst.msk [vmem:[#allocation2 + $0x38] sm:$0xf] %vm3081_vm14, %v3014_v55  ;;  %v3891_v58 = vmax.f32 %v3859_v52, 0.0  ;;  %v3862_v59 = vadd.f32 %v6071_v26, %v3823_v53  ;;  %v3821_v61 = vmul.f32 %v6065_v23, %v3737_v57 }
 0x277   : > { %3908 = vst [vmem:[%s6082_s22 + $0x8] sm:$0xff] %v3876_v56 }
 0x278   : > { %v3048_v63 = vpop.permute.xlu1 %3047  ;;  %3923 = vst [vmem:[%s6082_s22 + $0x80] sm:$0xff] %v3891_v58  ;;  %v3894_v1 = vmax.f32 %v3862_v59, 0.0  ;;  %v3860_v2 = vadd.f32 %v6071_v26, %v3821_v61 }
 0x279   : > { %3113 = vst.msk [vmem:[#allocation2 + $0x7c] sm:$0xf] %vm3081_vm14, %v3048_v63  ;;  %v3046_v0 = vpop.permute.xlu0 %3045 }
 0x27a   : > { %3112 = vst.msk [vmem:[#allocation2 + $0x78] sm:$0xf] %vm3081_vm14, %v3046_v0  ;;  %3926 = vst [vmem:[%s6082_s22 + $0x98] sm:$0xff] %v3894_v1  ;;  %v3892_v54 = vmax.f32 %v3860_v2, 0.0 }
 0x27c   : > { %v3349_v3 = vpop.permute.xlu1 %3348  ;;  %3924 = vst [vmem:[%s6082_s22 + $0x88] sm:$0xff] %v3892_v54 }
 0x27d   : > { %3432 = vst.msk [vmem:[#allocation2 + $0x34] sm:$0xf] %vm3418_vm15, %v3349_v3  ;;  %v3347_v4 = vpop.permute.xlu0 %3346 }
 0x27e   : > { %3431 = vst.msk [vmem:[#allocation2 + $0x30] sm:$0xf] %vm3418_vm15, %v3347_v4 }
 0x280   : > { %v3381_v6 = vpop.permute.xlu1 %3380 }
 0x281   : > { %3448 = vst.msk [vmem:[#allocation2 + $0x74] sm:$0xf] %vm3418_vm15, %v3381_v6  ;;  %v3379_v7 = vpop.permute.xlu0 %3378 }
 0x282   : > { %3447 = vst.msk [vmem:[#allocation2 + $0x70] sm:$0xf] %vm3418_vm15, %v3379_v7 }
 0x284   : > { %v3353_v8 = vpop.permute.xlu1 %3352 }
 0x285   : > { %3434 = vst.msk [vmem:[#allocation2 + $0x3c] sm:$0xf] %vm3418_vm15, %v3353_v8  ;;  %v3351_v9 = vpop.permute.xlu0 %3350  ;;  %v4555_v10 = vld [vmem:[#allocation2 + $0x30] sm:$0xff]  }
 0x286   : > { %3433 = vst.msk [vmem:[#allocation2 + $0x38] sm:$0xf] %vm3418_vm15, %v3351_v9  ;;  %4479 = vmatprep.mubr.msk.bf16.mxu0 %vm3583_vm0, %v4555_v10 }
 0x288   : > { %v3385_v11 = vpop.permute.xlu1 %3384 }
 0x289   : > { %3450 = vst.msk [vmem:[#allocation2 + $0x7c] sm:$0xf] %vm3418_vm15, %v3385_v11  ;;  %v3383_v27 = vpop.permute.xlu0 %3382  ;;  %v4556_v38 = vld [vmem:[#allocation2 + $0x70] sm:$0xff]  }
 0x28a   : > { %3449 = vst.msk [vmem:[#allocation2 + $0x78] sm:$0xf] %vm3418_vm15, %v3383_v27  ;;  %4495 = vmatprep.mubr.msk.bf16.mxu1 %vm3583_vm0, %v4556_v38 }
 0x28d   : > { %v4557_v12 = vld [vmem:[#allocation2 + $0x38] sm:$0xff]  }
 0x28e   : > { %4480 = vmatmul.mubr.msk.bf16.gmra.mxu0 %vm3583_vm0, %v4557_v12 }
 0x291   : > { %v4558_v13 = vld [vmem:[#allocation2 + $0x78] sm:$0xff]  }
 0x292   : > { %4496 = vmatmul.mubr.msk.bf16.gmra.mxu1 %vm3583_vm0, %v4558_v13 }
 0x2b2   : > { %v4473_v14 = vpop.f32.mrf.mxu0 }
 0x2b3   : > { %v3810_v15 = vmul.f32 %v4473_v14, %v6065_v23 }
 0x2b4   : > { %v3686_v5 = vpop.f32.mrf.mxu0 }
 0x2b5   : > { %v3849_v16 = vadd.f32 %v6071_v26, %v3810_v15  ;;  %v3808_v17 = vmul.f32 %v6065_v23, %v3686_v5 }
 0x2b6   : > { %v4474_v18 = vpop.f32.mrf.mxu0  ;;  %v4489_v20 = vpop.f32.mrf.mxu1 }
 0x2b7   : > { %v3881_v60 = vmax.f32 %v3849_v16, 0.0  ;;  %v3847_v21 = vadd.f32 %v6071_v26, %v3808_v17  ;;  %v3811_v22 = vmul.f32 %v4474_v18, %v6065_v23  ;;  %v3826_v24 = vmul.f32 %v4489_v20, %v6065_v23 }
 0x2b8   : > { %v3689_v28 = vpop.f32.mrf.mxu0  ;;  %v3750_v29 = vpop.f32.mrf.mxu1 }
 0x2b9   : > { %3913 = vst [vmem:[%s6082_s22 + $0x30] sm:$0xff] %v3881_v60  ;;  %v3879_v30 = vmax.f32 %v3847_v21, 0.0  ;;  %v3850_v31 = vadd.f32 %v6071_v26, %v3811_v22  ;;  %v3865_v32 = vadd.f32 %v6071_v26, %v3826_v24  ;;  %v3809_v33 = vmul.f32 %v6065_v23, %v3689_v28 }
 0x2ba   : > { %v3824_v34 = vmul.f32 %v6065_v23, %v3750_v29  ;;  %v4490_v35 = vpop.f32.mrf.mxu1 }
 0x2bb   : > { %3911 = vst [vmem:[%s6082_s22 + $0x20] sm:$0xff] %v3879_v30  ;;  %v3882_v19 = vmax.f32 %v3850_v31, 0.0  ;;  %v3897_v36 = vmax.f32 %v3865_v32, 0.0  ;;  %v3848_v37 = vadd.f32 %v6071_v26, %v3809_v33  ;;  %v3827_v39 = vmul.f32 %v4490_v35, %v6065_v23 }
 0x2bc   : > { %v3863_v25 = vadd.f32 %v6071_v26, %v3824_v34  ;;  %v3753_v40 = vpop.f32.mrf.mxu1 }
 0x2bd   : > { %3914 = vst [vmem:[%s6082_s22 + $0x38] sm:$0xff] %v3882_v19  ;;  %3929 = vst [vmem:[%s6082_s22 + $0xb0] sm:$0xff] %v3897_v36  ;;  %v3880_v41 = vmax.f32 %v3848_v37, 0.0  ;;  %v3866_v43 = vadd.f32 %v6071_v26, %v3827_v39  ;;  %v3825_v44 = vmul.f32 %v6065_v23, %v3753_v40 }
 0x2be   : > { %v3895_v45 = vmax.f32 %v3863_v25, 0.0 }
 0x2bf   : > { %3912 = vst [vmem:[%s6082_s22 + $0x28] sm:$0xff] %v3880_v41  ;;  %v3898_v62 = vmax.f32 %v3866_v43, 0.0  ;;  %v3864_v46 = vadd.f32 %v6071_v26, %v3825_v44 }
 0x2c0   : > { %3927 = vst [vmem:[%s6082_s22 + $0xa0] sm:$0xff] %v3895_v45 }
 0x2c1   : > { %3930 = vst [vmem:[%s6082_s22 + $0xb8] sm:$0xff] %v3898_v62  ;;  %v3896_v47 = vmax.f32 %v3864_v46, 0.0 }
 0x2c3   : > { %3928 = vst [vmem:[%s6082_s22 + $0xa8] sm:$0xff] %v3896_v47 }
 0x2fe   : > { %v4477_v48 = vpop.f32.mrf.mxu0 }
 0x2ff   : > { %v3814_v42 = vmul.f32 %v4477_v48, %v6065_v23 }
 0x300   : > { %v3702_v49 = vpop.f32.mrf.mxu0 }
 0x301   : > { %v3853_v50 = vadd.f32 %v6071_v26, %v3814_v42  ;;  %v3812_v51 = vmul.f32 %v6065_v23, %v3702_v49 }
 0x302   : > { %v4478_v52 = vpop.f32.mrf.mxu0  ;;  %v4493_v53 = vpop.f32.mrf.mxu1 }
 0x303   : > { %v3885_v55 = vmax.f32 %v3853_v50, 0.0  ;;  %v3851_v56 = vadd.f32 %v6071_v26, %v3812_v51  ;;  %v3815_v57 = vmul.f32 %v4478_v52, %v6065_v23  ;;  %v3830_v58 = vmul.f32 %v4493_v53, %v6065_v23 }
 0x304   : > { %v3705_v59 = vpop.f32.mrf.mxu0  ;;  %v3766_v61 = vpop.f32.mrf.mxu1 }
 0x305   : > { %3917 = vst [vmem:[%s6082_s22 + $0x50] sm:$0xff] %v3885_v55  ;;  %v3883_v63 = vmax.f32 %v3851_v56, 0.0  ;;  %v3854_v1 = vadd.f32 %v6071_v26, %v3815_v57  ;;  %v3869_v2 = vadd.f32 %v6071_v26, %v3830_v58  ;;  %v3813_v0 = vmul.f32 %v6065_v23, %v3705_v59 }
 0x306   : > { %v3828_v54 = vmul.f32 %v6065_v23, %v3766_v61  ;;  %v4494_v3 = vpop.f32.mrf.mxu1 }
 0x307   : > { %3915 = vst [vmem:[%s6082_s22 + $0x40] sm:$0xff] %v3883_v63  ;;  %v3886_v4 = vmax.f32 %v3854_v1, 0.0  ;;  %v3901_v6 = vmax.f32 %v3869_v2, 0.0  ;;  %v3852_v7 = vadd.f32 %v6071_v26, %v3813_v0  ;;  %v3831_v8 = vmul.f32 %v4494_v3, %v6065_v23 }
 0x308   : > { %v3867_v9 = vadd.f32 %v6071_v26, %v3828_v54  ;;  %v3769_v10 = vpop.f32.mrf.mxu1 }
 0x309   : > { %3918 = vst [vmem:[%s6082_s22 + $0x58] sm:$0xff] %v3886_v4  ;;  %3933 = vst [vmem:[%s6082_s22 + $0xd0] sm:$0xff] %v3901_v6  ;;  %v3884_v11 = vmax.f32 %v3852_v7, 0.0  ;;  %v3870_v27 = vadd.f32 %v6071_v26, %v3831_v8  ;;  %v3829_v38 = vmul.f32 %v6065_v23, %v3769_v10 }
 0x30a   : > { %v3899_v12 = vmax.f32 %v3867_v9, 0.0 }
 0x30b   : > { %3916 = vst [vmem:[%s6082_s22 + $0x48] sm:$0xff] %v3884_v11  ;;  %v3902_v13 = vmax.f32 %v3870_v27, 0.0  ;;  %v3868_v14 = vadd.f32 %v6071_v26, %v3829_v38 }
 0x30c   : > { %3931 = vst [vmem:[%s6082_s22 + $0xc0] sm:$0xff] %v3899_v12 }
 0x30d   : > { %3934 = vst [vmem:[%s6082_s22 + $0xd8] sm:$0xff] %v3902_v13  ;;  %v3900_v15 = vmax.f32 %v3868_v14, 0.0 }
 0x30f   : > { %3932 = vst [vmem:[%s6082_s22 + $0xc8] sm:$0xff] %v3900_v15 }
 0x34e   : > { %v4481_v5 = vpop.f32.mrf.mxu0 }
 0x34f   : > { %v3818_v16 = vmul.f32 %v4481_v5, %v6065_v23 }
 0x350   : > { %v3718_v17 = vpop.f32.mrf.mxu0 }
 0x351   : > { %v3857_v18 = vadd.f32 %v6071_v26, %v3818_v16  ;;  %v3816_v20 = vmul.f32 %v6065_v23, %v3718_v17 }
 0x352   : > { %v4482_v60 = vpop.f32.mrf.mxu0  ;;  %v4497_v21 = vpop.f32.mrf.mxu1 }
 0x353   : > { %v3889_v22 = vmax.f32 %v3857_v18, 0.0  ;;  %v3855_v24 = vadd.f32 %v6071_v26, %v3816_v20  ;;  %v3819_v28 = vmul.f32 %v4482_v60, %v6065_v23  ;;  %v3834_v29 = vmul.f32 %v4497_v21, %v6065_v23 }
 0x354   : > { %v3721_v30 = vpop.f32.mrf.mxu0  ;;  %v3782_v31 = vpop.f32.mrf.mxu1 }
 0x355   : > { %3921 = vst [vmem:[%s6082_s22 + $0x70] sm:$0xff] %v3889_v22  ;;  %v3887_v32 = vmax.f32 %v3855_v24, 0.0  ;;  %v3858_v33 = vadd.f32 %v6071_v26, %v3819_v28  ;;  %v3873_v34 = vadd.f32 %v6071_v26, %v3834_v29  ;;  %v3817_v35 = vmul.f32 %v6065_v23, %v3721_v30 }
 0x356   : > { %v3832_v19 = vmul.f32 %v6065_v23, %v3782_v31  ;;  %v4498_v36 = vpop.f32.mrf.mxu1 }
 0x357   : > { %3919 = vst [vmem:[%s6082_s22 + $0x60] sm:$0xff] %v3887_v32  ;;  %v3890_v37 = vmax.f32 %v3858_v33, 0.0  ;;  %v3905_v39 = vmax.f32 %v3873_v34, 0.0  ;;  %v3856_v25 = vadd.f32 %v6071_v26, %v3817_v35  ;;  %v3835_v40 = vmul.f32 %v4498_v36, %v6065_v23 }
 0x358   : > { %v3871_v41 = vadd.f32 %v6071_v26, %v3832_v19  ;;  %v3785_v43 = vpop.f32.mrf.mxu1 }
 0x359   : > { %3922 = vst [vmem:[%s6082_s22 + $0x78] sm:$0xff] %v3890_v37  ;;  %3937 = vst [vmem:[%s6082_s22 + $0xf0] sm:$0xff] %v3905_v39  ;;  %v3888_v44 = vmax.f32 %v3856_v25, 0.0  ;;  %v3874_v45 = vadd.f32 %v6071_v26, %v3835_v40  ;;  %v3833_v62 = vmul.f32 %v6065_v23, %v3785_v43 }
 0x35a   : > { %v3903_v46 = vmax.f32 %v3871_v41, 0.0 }
 0x35b   : > { %3920 = vst [vmem:[%s6082_s22 + $0x68] sm:$0xff] %v3888_v44  ;;  %v3906_v47 = vmax.f32 %v3874_v45, 0.0  ;;  %v3872_v48 = vadd.f32 %v6071_v26, %v3833_v62 }
 0x35c   : > { %3935 = vst [vmem:[%s6082_s22 + $0xe0] sm:$0xff] %v3903_v46 }
 0x35d   : > { %3938 = vst [vmem:[%s6082_s22 + $0xf8] sm:$0xff] %v3906_v47  ;;  %v3904_v42 = vmax.f32 %v3872_v48, 0.0 }
 0x35f   : > { %3936 = vst [vmem:[%s6082_s22 + $0xe8] sm:$0xff] %v3904_v42 }
 0x360 PF: > { %s14_s17 = sadd.s32 1, %s4582_s17   ;;  %s6213_s15 = smov %s4578_s16 }
 0x361   : > { %p11_p5 = scmp.ge.s32.totalorder %s14_s17, 4   ;;  %s6214_s16 = smov %s6216_s18 }
 0x363   :  { %13 = sbr.rel (!%p11_p5) target bundleno = 2 (0x2), region = 77 }

</bundles_post_ra>
